<compile_context>
chip_gen: v6e
topology: v6e:2x2x1
jax: 0.10.0
libtpu: 0.0.40
codegen_flags: <defaults>
</compile_context>

<pallas_src>
import functools

import jax
import jax.numpy as jnp
from jax import lax
from jax.experimental import pallas as pl
from jax.experimental.pallas import tpu as pltpu


def _round_up(x, m):
    return ((x + m - 1) // m) * m


# ---------------------------------------------------------------------------
# Fused block kernel
# ---------------------------------------------------------------------------
def _block_kernel(xph_ref, w1_ref, w2_ref, o_ref, y1pad_ref, *,
                  stride, H1, W1, Cinp, Coutp, Hph, B_blk, fold_shortcut):
    s = stride
    BM = B_blk * H1 * W1
    f32 = jnp.float32
    dt = y1pad_ref.dtype

    def x_tap(i, j):
        # Window of x for stencil tap (i, j) at stride s, as a (BM, Cinp) matrix.
        # Phase decomposition (done in the wrapper) makes this a contiguous,
        # unstrided static slice.
        ph = (i % s) * s + (j % s)
        base = ph * Hph + (i // s)
        oj = j // s
        win = xph_ref[:, base:base + H1, oj:oj + W1, :]   # (B_blk, H1, W1, Cinp)
        return win.reshape(BM, Cinp)

    # ---- conv1: single MXU contraction over K = 9*Cinp, fused ReLU ----------
    # (im2col patch lives in VMEM; tap accumulation stays inside the MXU)
    patch1 = jnp.concatenate([x_tap(i, j) for i in range(3) for j in range(3)],
                             axis=-1)                      # (BM, 9*Cinp)
    y1 = jnp.dot(patch1, w1_ref[...], preferred_element_type=f32)
    y1 = jnp.maximum(y1, 0.0).astype(dt)
    # TODO(synk): nn.Dropout(0.5) is identity in eval mode; training-mode
    # dropout (pltpu.prng_random_bits mask + 2x scale) is not reproduced here.

    # ---- keep y1 resident in VMEM with a 1-pixel zero halo -------------------
    # Zero only the thin halo (interior fully overwritten below).  Re-zeroed
    # every grid step so megacore sharding of the batch axis stays correct.
    zrow = jnp.zeros((B_blk, 1, W1 + 2, Coutp), dt)
    zcol = jnp.zeros((B_blk, H1 + 2, 1, Coutp), dt)
    y1pad_ref[:, 0:1, :, :] = zrow
    y1pad_ref[:, H1 + 1:H1 + 2, :, :] = zrow
    y1pad_ref[:, :, 0:1, :] = zcol
    y1pad_ref[:, :, W1 + 1:W1 + 2, :] = zcol
    y1pad_ref[:, 1:H1 + 1, 1:W1 + 1, :] = y1.reshape(B_blk, H1, W1, Coutp)

    def y_tap(i, j):
        return y1pad_ref[:, i:i + H1, j:j + W1, :].reshape(BM, Coutp)

    # ---- conv2 (+ folded 1x1 shortcut) as one MXU contraction ----------------
    taps = [y_tap(i, j) for i in range(3) for j in range(3)]
    if fold_shortcut:
        # shortcut 1x1 conv == tap (1,1) of x; folded into the same dot:
        # K = 9*Coutp + Cinp, weight rows [w2_flat ; ws].
        taps.append(x_tap(1, 1))
        patch2 = jnp.concatenate(taps, axis=-1)
        acc = jnp.dot(patch2, w2_ref[...], preferred_element_type=f32)
    else:
        patch2 = jnp.concatenate(taps, axis=-1)
        acc = jnp.dot(patch2, w2_ref[...], preferred_element_type=f32)
        # identity shortcut: plain add (Cinp == Coutp), no matmul needed.
        acc = acc + x_tap(1, 1).astype(f32)

    out = jnp.maximum(acc, 0.0)
    o_ref[...] = out.reshape(B_blk, H1, W1, Coutp).astype(o_ref.dtype)


# ---------------------------------------------------------------------------
# Chain-friendly forward: NHWC in, NHWC / bf16 / channel-padded out.
# Input may already carry zero-padded channels from a previous block.
# ---------------------------------------------------------------------------
def block_forward_nhwc(x, params, stride, *, compute_dtype=jnp.bfloat16,
                       batch_block=None):
    w1, w2 = params["w1"], params["w2"]
    ws = params.get("ws", None)
    Cout, Cin = int(w1.shape[0]), int(w1.shape[1])
    N, H, W, Cx = x.shape
    assert Cx >= Cin, "input has fewer channels than the conv expects"
    s = int(stride)
    H1 = (H + 2 - 3) // s + 1
    W1 = (W + 2 - 3) // s + 1
    Cinp = _round_up(Cx, 128)          # lane-dense conv1 contraction
    Coutp = _round_up(Cout, 128)       # lane-dense output channels
    if ws is None:
        assert s == 1 and Cin == Cout, \
            "identity shortcut requires stride == 1 and in_channel == out_channel"
        assert Cinp == Coutp, "identity shortcut needs matching padded channels"

    # Batch blocking: fold images into the matmul M dim so small planes don't
    # underfill the MXU; keep the grid length dividing N.
    m_img = H1 * W1
    if batch_block is None:
        b = max(1, min(N, 8, -(-256 // m_img)))
        while N % b:
            b -= 1
    else:
        b = int(batch_block)
        assert N % b == 0
    B_blk = b

    x = x.astype(compute_dtype)
    if Cinp > Cx:
        x = jnp.pad(x, ((0, 0), (0, 0), (0, 0), (0, Cinp - Cx)))

    # Phase-decomposed, spatially padded input: every 3x3 tap (and the 1x1
    # shortcut tap) becomes a contiguous, unstrided window inside the kernel.
    Hph = H1 + (3 + s - 1) // s - 1
    Wph = W1 + (3 + s - 1) // s - 1
    xp = jnp.pad(x, ((0, 0), (1, 1), (1, 1), (0, 0)))
    if s == 1:
        xph = xp                                           # (N, Hph, Wph, Cinp)
    else:
        phases = []
        for p in range(s):
            for q in range(s):
                ph = xp[:, p::s, q::s, :][:, :Hph, :Wph, :]
                ph = jnp.pad(ph, ((0, 0), (0, Hph - ph.shape[1]),
                                  (0, Wph - ph.shape[2]), (0, 0)))
                phases.append(ph)
        xph = jnp.stack(phases, axis=1).reshape(N, s * s * Hph, Wph, Cinp)

    # Weights as lane-dense contraction matrices in the compute dtype.
    w1m = jnp.transpose(w1, (2, 3, 1, 0))                          # (3,3,Cin,Cout)
    w1m = jnp.pad(w1m, ((0, 0), (0, 0), (0, Cinp - Cin), (0, Coutp - Cout)))
    w1m = w1m.reshape(9 * Cinp, Coutp).astype(compute_dtype)

    w2m = jnp.transpose(w2, (2, 3, 1, 0))                          # (3,3,Cout,Cout)
    w2m = jnp.pad(w2m, ((0, 0), (0, 0), (0, Coutp - Cout), (0, Coutp - Cout)))
    w2m = w2m.reshape(9 * Coutp, Coutp)
    fold_shortcut = ws is not None
    if fold_shortcut:
        wsm = jnp.pad(ws[:, :, 0, 0].T, ((0, Cinp - Cin), (0, Coutp - Cout)))
        w2m = jnp.concatenate([w2m, wsm], axis=0)                  # K = 9*Coutp+Cinp
    w2m = w2m.astype(compute_dtype)

    kernel = functools.partial(_block_kernel, stride=s, H1=H1, W1=W1,
                               Cinp=Cinp, Coutp=Coutp, Hph=Hph, B_blk=B_blk,
                               fold_shortcut=fold_shortcut)
    rows = (s * s) * Hph if s > 1 else Hph

    out = pl.pallas_call(
        kernel,
        out_shape=jax.ShapeDtypeStruct((N, H1, W1, Coutp), compute_dtype),
        grid_spec=pltpu.PrefetchScalarGridSpec(
            num_scalar_prefetch=0,
            grid=(N // B_blk,),
            in_specs=[
                pl.BlockSpec((B_blk, rows, Wph, Cinp), lambda b: (b, 0, 0, 0)),
                # Weights: whole-array VMEM residents (single-buffered; their
                # index would be constant anyway, so no per-step DMA needed).
                pl.BlockSpec(memory_space=pltpu.MemorySpace.VMEM),
                pl.BlockSpec(memory_space=pltpu.MemorySpace.VMEM),
            ],
            out_specs=pl.BlockSpec((B_blk, H1, W1, Coutp), lambda b: (b, 0, 0, 0)),
            scratch_shapes=[pltpu.VMEM((B_blk, H1 + 2, W1 + 2, Coutp),
                                       compute_dtype)],
        ),
        compiler_params=pltpu.CompilerParams(
            dimension_semantics=("parallel",),
            vmem_limit_bytes=32 * 1024 * 1024,
        ),
    )(xph, w1m, w2m)
    return out        # (N, H1, W1, Coutp), bf16, padded channels are zero


# ---------------------------------------------------------------------------
# NCHW / f32 interface matching the PyTorch module (demo boundary only).
# TODO(synk): in a real model keep NHWC/bf16/padded layout across blocks and
# drop these transposes / channel slices.
# ---------------------------------------------------------------------------
def block_forward(x_nchw, params, stride, *, compute_dtype=jnp.bfloat16):
    Cout = params["w1"].shape[0]
    x = jnp.transpose(x_nchw, (0, 2, 3, 1))
    out = block_forward_nhwc(x, params, stride, compute_dtype=compute_dtype)
    out = out[..., :Cout].astype(x_nchw.dtype)
    return jnp.transpose(out, (0, 3, 1, 2))


# ---------------------------------------------------------------------------
# Pure-JAX reference (eval mode)
#   compute_dtype=None      -> exact f32 module semantics
#   compute_dtype=bfloat16  -> mirrors the kernel's bf16-in / f32-acc numerics
# ---------------------------------------------------------------------------
def block_forward_ref(x_nchw, params, stride, *, compute_dtype=None):
    dn = ("NCHW", "OIHW", "NCHW")
    cast = (lambda t: t) if compute_dtype is None else (lambda t: t.astype(compute_dtype))
    x = cast(x_nchw)
    y = lax.conv_general_dilated(x, cast(params["w1"]), (stride, stride),
                                 ((1, 1), (1, 1)), dimension_numbers=dn,
                                 preferred_element_type=jnp.float32)
    y = cast(jnp.maximum(y, 0.0))
    y = lax.conv_general_dilated(y, cast(params["w2"]), (1, 1),
                                 ((1, 1), (1, 1)), dimension_numbers=dn,
                                 preferred_element_type=jnp.float32)
    ws = params.get("ws", None)
    if ws is None:
        res = x.astype(jnp.float32)
    else:
        res = lax.conv_general_dilated(x, cast(ws), (stride, stride),
                                       ((0, 0), (0, 0)), dimension_numbers=dn,
                                       preferred_element_type=jnp.float32)
    return jnp.maximum(y + res, 0.0).astype(x_nchw.dtype)


if __name__ == "__main__":
    # Block(in_channel=4, out_channel=8, stride=2): shortcut is a 1x1 conv.
    in_c, out_c, stride = 4, 8, 2
    N, H, W = 2, 16, 16

    key = jax.random.PRNGKey(0)
    kx, k1, k2, ks, kx2, k3, k4 = jax.random.split(key, 7)
    x = jax.random.normal(kx, (N, in_c, H, W), dtype=jnp.float32)
    params = {
        "w1": 0.1 * jax.random.normal(k1, (out_c, in_c, 3, 3), dtype=jnp.float32),
        "w2": 0.1 * jax.random.normal(k2, (out_c, out_c, 3, 3), dtype=jnp.float32),
        "ws": 0.1 * jax.random.normal(ks, (out_c, in_c, 1, 1), dtype=jnp.float32),
    }

    out = jax.block_until_ready(block_forward(x, params, stride))
    ref_bf16 = jax.block_until_ready(
        block_forward_ref(x, params, stride, compute_dtype=jnp.bfloat16))
    ref_f32 = jax.block_until_ready(block_forward_ref(x, params, stride))

    assert out.shape == (N, out_c, H // stride, W // stride), out.shape
    assert jnp.allclose(out, ref_bf16, atol=2e-2, rtol=2e-2), \
        float(jnp.max(jnp.abs(out - ref_bf16)))
    # loose sanity check of the bf16 compute path against pure-f32 semantics
    assert jnp.allclose(out, ref_f32, atol=1e-1, rtol=1e-1), \
        float(jnp.max(jnp.abs(out - ref_f32)))

    # Block(in_channel=8, out_channel=8, stride=1): identity shortcut path.
    x2 = jax.random.normal(kx2, (N, out_c, H, W), dtype=jnp.float32)
    params2 = {
        "w1": 0.1 * jax.random.normal(k3, (out_c, out_c, 3, 3), dtype=jnp.float32),
        "w2": 0.1 * jax.random.normal(k4, (out_c, out_c, 3, 3), dtype=jnp.float32),
    }
    out2 = jax.block_until_ready(block_forward(x2, params2, 1))
    ref2 = block_forward_ref(x2, params2, 1, compute_dtype=jnp.bfloat16)
    assert out2.shape == (N, out_c, H, W), out2.shape
    assert jnp.allclose(out2, ref2, atol=2e-2, rtol=2e-2), \
        float(jnp.max(jnp.abs(out2 - ref2)))

    print("KERNEL_OK")
</pallas_src>

<mosaic_0001>
module attributes {stable_mosaic.version = 11 : i64} {
  func.func @_block_kernel(%arg0: i32, %arg1: memref<2x36x9x128xbf16, #tpu.memory_space<vmem>>, %arg2: memref<1152x128xbf16, #tpu.memory_space<vmem>>, %arg3: memref<1280x128xbf16, #tpu.memory_space<vmem>>, %arg4: memref<2x8x8x128xbf16, #tpu.memory_space<vmem>>, %arg5: memref<2x10x10x128xbf16, #tpu.memory_space<vmem>>) attributes {dimension_semantics = [#tpu.dimension_semantics<parallel>], iteration_bounds = array<i64: 1>, scalar_prefetch = 0 : i64, scratch_operands = 1 : i64, tpu.core_type = #tpu.core_type<tc>, window_params = [{transform_indices = @transform_0, window_bounds = array<i64: 2, 36, 9, 128>}, {pipeline_mode = #tpu.pipeline_mode<synchronous>, transform_indices = @transform_1, window_bounds = array<i64: 1152, 128>}, {pipeline_mode = #tpu.pipeline_mode<synchronous>, transform_indices = @transform_2, window_bounds = array<i64: 1280, 128>}, {transform_indices = @transform_3, window_bounds = array<i64: 2, 8, 8, 128>}]} {
    %c0 = arith.constant 0 : index
    %c0_0 = arith.constant 0 : index
    %c0_1 = arith.constant 0 : index
    %c0_2 = arith.constant 0 : index
    %0 = vector.load %arg1[%c0, %c0_0, %c0_1, %c0_2] : memref<2x36x9x128xbf16, #tpu.memory_space<vmem>>, vector<2x8x8x128xbf16>
    %1 = vector.shape_cast %0 : vector<2x8x8x128xbf16> to vector<128x128xbf16>
    %c0_3 = arith.constant 0 : index
    %c9 = arith.constant 9 : index
    %c0_4 = arith.constant 0 : index
    %c0_5 = arith.constant 0 : index
    %2 = vector.load %arg1[%c0_3, %c9, %c0_4, %c0_5] : memref<2x36x9x128xbf16, #tpu.memory_space<vmem>>, vector<2x8x8x128xbf16>
    %3 = vector.shape_cast %2 : vector<2x8x8x128xbf16> to vector<128x128xbf16>
    %c0_6 = arith.constant 0 : index
    %c0_7 = arith.constant 0 : index
    %c1 = arith.constant 1 : index
    %c0_8 = arith.constant 0 : index
    %4 = vector.load %arg1[%c0_6, %c0_7, %c1, %c0_8] : memref<2x36x9x128xbf16, #tpu.memory_space<vmem>>, vector<2x8x8x128xbf16>
    %5 = vector.shape_cast %4 : vector<2x8x8x128xbf16> to vector<128x128xbf16>
    %c0_9 = arith.constant 0 : index
    %c18 = arith.constant 18 : index
    %c0_10 = arith.constant 0 : index
    %c0_11 = arith.constant 0 : index
    %6 = vector.load %arg1[%c0_9, %c18, %c0_10, %c0_11] : memref<2x36x9x128xbf16, #tpu.memory_space<vmem>>, vector<2x8x8x128xbf16>
    %7 = vector.shape_cast %6 : vector<2x8x8x128xbf16> to vector<128x128xbf16>
    %c0_12 = arith.constant 0 : index
    %c27 = arith.constant 27 : index
    %c0_13 = arith.constant 0 : index
    %c0_14 = arith.constant 0 : index
    %8 = vector.load %arg1[%c0_12, %c27, %c0_13, %c0_14] : memref<2x36x9x128xbf16, #tpu.memory_space<vmem>>, vector<2x8x8x128xbf16>
    %9 = vector.shape_cast %8 : vector<2x8x8x128xbf16> to vector<128x128xbf16>
    %c0_15 = arith.constant 0 : index
    %c18_16 = arith.constant 18 : index
    %c1_17 = arith.constant 1 : index
    %c0_18 = arith.constant 0 : index
    %10 = vector.load %arg1[%c0_15, %c18_16, %c1_17, %c0_18] : memref<2x36x9x128xbf16, #tpu.memory_space<vmem>>, vector<2x8x8x128xbf16>
    %11 = vector.shape_cast %10 : vector<2x8x8x128xbf16> to vector<128x128xbf16>
    %c0_19 = arith.constant 0 : index
    %c1_20 = arith.constant 1 : index
    %c0_21 = arith.constant 0 : index
    %c0_22 = arith.constant 0 : index
    %12 = vector.load %arg1[%c0_19, %c1_20, %c0_21, %c0_22] : memref<2x36x9x128xbf16, #tpu.memory_space<vmem>>, vector<2x8x8x128xbf16>
    %13 = vector.shape_cast %12 : vector<2x8x8x128xbf16> to vector<128x128xbf16>
    %c0_23 = arith.constant 0 : index
    %c10 = arith.constant 10 : index
    %c0_24 = arith.constant 0 : index
    %c0_25 = arith.constant 0 : index
    %14 = vector.load %arg1[%c0_23, %c10, %c0_24, %c0_25] : memref<2x36x9x128xbf16, #tpu.memory_space<vmem>>, vector<2x8x8x128xbf16>
    %15 = vector.shape_cast %14 : vector<2x8x8x128xbf16> to vector<128x128xbf16>
    %c0_26 = arith.constant 0 : index
    %c1_27 = arith.constant 1 : index
    %c1_28 = arith.constant 1 : index
    %c0_29 = arith.constant 0 : index
    %16 = vector.load %arg1[%c0_26, %c1_27, %c1_28, %c0_29] : memref<2x36x9x128xbf16, #tpu.memory_space<vmem>>, vector<2x8x8x128xbf16>
    %17 = vector.shape_cast %16 : vector<2x8x8x128xbf16> to vector<128x128xbf16>
    %18 = tpu.concatenate %1, %3, %5, %7, %9, %11, %13, %15, %17 in 1 : vector<128x128xbf16>, vector<128x128xbf16>, vector<128x128xbf16>, vector<128x128xbf16>, vector<128x128xbf16>, vector<128x128xbf16>, vector<128x128xbf16>, vector<128x128xbf16>, vector<128x128xbf16> -> vector<128x1152xbf16>
    %c0_30 = arith.constant 0 : index
    %c0_31 = arith.constant 0 : index
    %19 = vector.load %arg2[%c0_30, %c0_31] : memref<1152x128xbf16, #tpu.memory_space<vmem>>, vector<1152x128xbf16>
    %cst = arith.constant dense<0.000000e+00> : vector<128x128xf32>
    %20 = tpu.matmul %18, %19, %cst {dimension_numbers = #tpu.dot_dimension_numbers<[1], [0], [0], [1], [0, 0, 1, 1], [], []>} : vector<128x1152xbf16>, vector<1152x128xbf16>, vector<128x128xf32> -> vector<128x128xf32>
    %cst_32 = arith.constant 0.000000e+00 : f32
    %21 = vector.broadcast %cst_32 : f32 to vector<128x128xf32>
    %22 = arith.maximumf %20, %21 : vector<128x128xf32>
    %23 = arith.truncf %22 : vector<128x128xf32> to vector<128x128xbf16>
    %cst_33 = arith.constant 0.000000e+00 : bf16
    %24 = vector.broadcast %cst_33 : bf16 to vector<2x1x10x128xbf16>
    %cst_34 = arith.constant 0.000000e+00 : bf16
    %25 = vector.broadcast %cst_34 : bf16 to vector<2x10x1x128xbf16>
    %c0_35 = arith.constant 0 : index
    %c0_36 = arith.constant 0 : index
    %c0_37 = arith.constant 0 : index
    %c0_38 = arith.constant 0 : index
    %26 = vector.load %arg5[%c0_35, %c0_36, %c0_37, %c0_38] : memref<2x10x10x128xbf16, #tpu.memory_space<vmem>>, vector<2x1x10x128xbf16>
    tpu.vector_store %arg5[%c0_35, %c0_36, %c0_37, %c0_38], %24 {strides = array<i32>} : memref<2x10x10x128xbf16, #tpu.memory_space<vmem>>, vector<2x1x10x128xbf16>,
    %c0_39 = arith.constant 0 : index
    %c9_40 = arith.constant 9 : index
    %c0_41 = arith.constant 0 : index
    %c0_42 = arith.constant 0 : index
    %27 = vector.load %arg5[%c0_39, %c9_40, %c0_41, %c0_42] : memref<2x10x10x128xbf16, #tpu.memory_space<vmem>>, vector<2x1x10x128xbf16>
    tpu.vector_store %arg5[%c0_39, %c9_40, %c0_41, %c0_42], %24 {strides = array<i32>} : memref<2x10x10x128xbf16, #tpu.memory_space<vmem>>, vector<2x1x10x128xbf16>,
    %c0_43 = arith.constant 0 : index
    %c0_44 = arith.constant 0 : index
    %c0_45 = arith.constant 0 : index
    %c0_46 = arith.constant 0 : index
    %28 = vector.load %arg5[%c0_43, %c0_44, %c0_45, %c0_46] : memref<2x10x10x128xbf16, #tpu.memory_space<vmem>>, vector<2x10x1x128xbf16>
    tpu.vector_store %arg5[%c0_43, %c0_44, %c0_45, %c0_46], %25 {strides = array<i32>} : memref<2x10x10x128xbf16, #tpu.memory_space<vmem>>, vector<2x10x1x128xbf16>,
    %c0_47 = arith.constant 0 : index
    %c0_48 = arith.constant 0 : index
    %c9_49 = arith.constant 9 : index
    %c0_50 = arith.constant 0 : index
    %29 = vector.load %arg5[%c0_47, %c0_48, %c9_49, %c0_50] : memref<2x10x10x128xbf16, #tpu.memory_space<vmem>>, vector<2x10x1x128xbf16>
    tpu.vector_store %arg5[%c0_47, %c0_48, %c9_49, %c0_50], %25 {strides = array<i32>} : memref<2x10x10x128xbf16, #tpu.memory_space<vmem>>, vector<2x10x1x128xbf16>,
    %30 = vector.shape_cast %23 : vector<128x128xbf16> to vector<2x8x8x128xbf16>
    %c0_51 = arith.constant 0 : index
    %c1_52 = arith.constant 1 : index
    %c1_53 = arith.constant 1 : index
    %c0_54 = arith.constant 0 : index
    %31 = vector.load %arg5[%c0_51, %c1_52, %c1_53, %c0_54] : memref<2x10x10x128xbf16, #tpu.memory_space<vmem>>, vector<2x8x8x128xbf16>
    tpu.vector_store %arg5[%c0_51, %c1_52, %c1_53, %c0_54], %30 {strides = array<i32>} : memref<2x10x10x128xbf16, #tpu.memory_space<vmem>>, vector<2x8x8x128xbf16>,
    %c0_55 = arith.constant 0 : index
    %c0_56 = arith.constant 0 : index
    %c0_57 = arith.constant 0 : index
    %c0_58 = arith.constant 0 : index
    %32 = vector.load %arg5[%c0_55, %c0_56, %c0_57, %c0_58] : memref<2x10x10x128xbf16, #tpu.memory_space<vmem>>, vector<2x8x8x128xbf16>
    %33 = vector.shape_cast %32 : vector<2x8x8x128xbf16> to vector<128x128xbf16>
    %c0_59 = arith.constant 0 : index
    %c0_60 = arith.constant 0 : index
    %c1_61 = arith.constant 1 : index
    %c0_62 = arith.constant 0 : index
    %34 = vector.load %arg5[%c0_59, %c0_60, %c1_61, %c0_62] : memref<2x10x10x128xbf16, #tpu.memory_space<vmem>>, vector<2x8x8x128xbf16>
    %35 = vector.shape_cast %34 : vector<2x8x8x128xbf16> to vector<128x128xbf16>
    %c0_63 = arith.constant 0 : index
    %c0_64 = arith.constant 0 : index
    %c2 = arith.constant 2 : index
    %c0_65 = arith.constant 0 : index
    %36 = vector.load %arg5[%c0_63, %c0_64, %c2, %c0_65] : memref<2x10x10x128xbf16, #tpu.memory_space<vmem>>, vector<2x8x8x128xbf16>
    %37 = vector.shape_cast %36 : vector<2x8x8x128xbf16> to vector<128x128xbf16>
    %c0_66 = arith.constant 0 : index
    %c1_67 = arith.constant 1 : index
    %c0_68 = arith.constant 0 : index
    %c0_69 = arith.constant 0 : index
    %38 = vector.load %arg5[%c0_66, %c1_67, %c0_68, %c0_69] : memref<2x10x10x128xbf16, #tpu.memory_space<vmem>>, vector<2x8x8x128xbf16>
    %39 = vector.shape_cast %38 : vector<2x8x8x128xbf16> to vector<128x128xbf16>
    %c0_70 = arith.constant 0 : index
    %c1_71 = arith.constant 1 : index
    %c1_72 = arith.constant 1 : index
    %c0_73 = arith.constant 0 : index
    %40 = vector.load %arg5[%c0_70, %c1_71, %c1_72, %c0_73] : memref<2x10x10x128xbf16, #tpu.memory_space<vmem>>, vector<2x8x8x128xbf16>
    %41 = vector.shape_cast %40 : vector<2x8x8x128xbf16> to vector<128x128xbf16>
    %c0_74 = arith.constant 0 : index
    %c1_75 = arith.constant 1 : index
    %c2_76 = arith.constant 2 : index
    %c0_77 = arith.constant 0 : index
    %42 = vector.load %arg5[%c0_74, %c1_75, %c2_76, %c0_77] : memref<2x10x10x128xbf16, #tpu.memory_space<vmem>>, vector<2x8x8x128xbf16>
    %43 = vector.shape_cast %42 : vector<2x8x8x128xbf16> to vector<128x128xbf16>
    %c0_78 = arith.constant 0 : index
    %c2_79 = arith.constant 2 : index
    %c0_80 = arith.constant 0 : index
    %c0_81 = arith.constant 0 : index
    %44 = vector.load %arg5[%c0_78, %c2_79, %c0_80, %c0_81] : memref<2x10x10x128xbf16, #tpu.memory_space<vmem>>, vector<2x8x8x128xbf16>
    %45 = vector.shape_cast %44 : vector<2x8x8x128xbf16> to vector<128x128xbf16>
    %c0_82 = arith.constant 0 : index
    %c2_83 = arith.constant 2 : index
    %c1_84 = arith.constant 1 : index
    %c0_85 = arith.constant 0 : index
    %46 = vector.load %arg5[%c0_82, %c2_83, %c1_84, %c0_85] : memref<2x10x10x128xbf16, #tpu.memory_space<vmem>>, vector<2x8x8x128xbf16>
    %47 = vector.shape_cast %46 : vector<2x8x8x128xbf16> to vector<128x128xbf16>
    %c0_86 = arith.constant 0 : index
    %c2_87 = arith.constant 2 : index
    %c2_88 = arith.constant 2 : index
    %c0_89 = arith.constant 0 : index
    %48 = vector.load %arg5[%c0_86, %c2_87, %c2_88, %c0_89] : memref<2x10x10x128xbf16, #tpu.memory_space<vmem>>, vector<2x8x8x128xbf16>
    %49 = vector.shape_cast %48 : vector<2x8x8x128xbf16> to vector<128x128xbf16>
    %c0_90 = arith.constant 0 : index
    %c27_91 = arith.constant 27 : index
    %c0_92 = arith.constant 0 : index
    %c0_93 = arith.constant 0 : index
    %50 = vector.load %arg1[%c0_90, %c27_91, %c0_92, %c0_93] : memref<2x36x9x128xbf16, #tpu.memory_space<vmem>>, vector<2x8x8x128xbf16>
    %51 = vector.shape_cast %50 : vector<2x8x8x128xbf16> to vector<128x128xbf16>
    %52 = tpu.concatenate %33, %35, %37, %39, %41, %43, %45, %47, %49, %51 in 1 : vector<128x128xbf16>, vector<128x128xbf16>, vector<128x128xbf16>, vector<128x128xbf16>, vector<128x128xbf16>, vector<128x128xbf16>, vector<128x128xbf16>, vector<128x128xbf16>, vector<128x128xbf16>, vector<128x128xbf16> -> vector<128x1280xbf16>
    %c0_94 = arith.constant 0 : index
    %c0_95 = arith.constant 0 : index
    %53 = vector.load %arg3[%c0_94, %c0_95] : memref<1280x128xbf16, #tpu.memory_space<vmem>>, vector<1280x128xbf16>
    %cst_96 = arith.constant dense<0.000000e+00> : vector<128x128xf32>
    %54 = tpu.matmul %52, %53, %cst_96 {dimension_numbers = #tpu.dot_dimension_numbers<[1], [0], [0], [1], [0, 0, 1, 1], [], []>} : vector<128x1280xbf16>, vector<1280x128xbf16>, vector<128x128xf32> -> vector<128x128xf32>
    %cst_97 = arith.constant 0.000000e+00 : f32
    %55 = vector.broadcast %cst_97 : f32 to vector<128x128xf32>
    %56 = arith.maximumf %54, %55 : vector<128x128xf32>
    %57 = vector.shape_cast %56 : vector<128x128xf32> to vector<2x8x8x128xf32>
    %58 = arith.truncf %57 : vector<2x8x8x128xf32> to vector<2x8x8x128xbf16>
    %c0_98 = arith.constant 0 : index
    %c0_99 = arith.constant 0 : index
    %c0_100 = arith.constant 0 : index
    %c0_101 = arith.constant 0 : index
    %59 = vector.load %arg4[%c0_98, %c0_99, %c0_100, %c0_101] : memref<2x8x8x128xbf16, #tpu.memory_space<vmem>>, vector<2x8x8x128xbf16>
    tpu.vector_store %arg4[%c0_98, %c0_99, %c0_100, %c0_101], %58 {strides = array<i32>} : memref<2x8x8x128xbf16, #tpu.memory_space<vmem>>, vector<2x8x8x128xbf16>,
    return
  }
  func.func @transform_0(%arg0: i32) -> (i32, i32, i32, i32) {
    %c0_i32 = arith.constant 0 : i32
    %c0_i32_0 = arith.constant 0 : i32
    %c0_i32_1 = arith.constant 0 : i32
    %c0_i32_2 = arith.constant 0 : i32
    return %arg0, %c0_i32, %c0_i32_0, %c0_i32_1 : i32, i32, i32, i32
  }
  func.func @transform_1(%arg0: i32) -> (i32, i32) {
    %c0_i32 = arith.constant 0 : i32
    %c0_i32_0 = arith.constant 0 : i32
    %c0_i32_1 = arith.constant 0 : i32
    return %c0_i32, %c0_i32_0 : i32, i32
  }
  func.func @transform_2(%arg0: i32) -> (i32, i32) {
    %c0_i32 = arith.constant 0 : i32
    %c0_i32_0 = arith.constant 0 : i32
    %c0_i32_1 = arith.constant 0 : i32
    return %c0_i32, %c0_i32_0 : i32, i32
  }
  func.func @transform_3(%arg0: i32) -> (i32, i32, i32, i32) {
    %c0_i32 = arith.constant 0 : i32
    %c0_i32_0 = arith.constant 0 : i32
    %c0_i32_1 = arith.constant 0 : i32
    %c0_i32_2 = arith.constant 0 : i32
    return %arg0, %c0_i32, %c0_i32_0, %c0_i32_1 : i32, i32, i32, i32
  }
}

</mosaic_0001>

<bundles_post_ra>
// kernel: tpu_custom_call.1
= control target key start
LH: loop header
LB: loop body
LE: loop exit
PB: predicated region body
PF: predicated region fallthrough
CT: control target
= control target key end

     0   :  { %8 = vsyncpa [#allocation4], 0  ;;  %s9296_s0 = inlined_call_operand.vmem [shape: bf16[2,36,9,128], index: 0, kind: input, shape index: {}]   ;;  %s9297_s1 = inlined_call_operand.hbm [shape: bf16[1152,128], index: 1, kind: input, shape index: {}]   ;;  %s9298_s2 = inlined_call_operand.vmem [shape: bf16[1280,128], index: 2, kind: input, shape index: {}]   ;;  %s9299_s3 = inlined_call_operand.hbm [shape: bf16[2,8,8,128], index: 3, kind: output, shape index: {}]  }
   0x1   :  { %9 = vsyncpa [#allocation5], 0  ;;  %s6935_s12 = smov [#allocation3]  }
   0x2   :  { %s17_s13 = sshll.u32 %s6935_s12, 4  ;;  %s18_s13 = int_to_ptr.vmem [resolvable:$true] %s17_s13 }
   0x3   :  { %s6899_s14 = scalar_lea.vmem %s18_s13, 9216  ;;  %p6904_p1 = scmp.lt.s32.totalorder %s18_s13, %s18_s13 }
   0x4   :  { %p6900_p0 = scmp.ne.s32.totalorder %s18_s13, %s6899_s14  ;;  %p6905_p2 = scmp.lt.s32.totalorder %s6899_s14, %s6899_s14 }
   0x6   :  { %p6906_p3 = por %p6905_p2, %p6904_p1 }
   0x8   :  { %p6907_p4 = pnand %p6906_p3, %p6900_p0 }
   0xa   :  { %6910 = shalt.err (!%p6907_p4)
}
   0xb   :  { %s6936_s15 = smov 64   ;;  %s6937_s16 = smov 4  }
   0xc   :  { %23 = dma.hbm_to_vmem [thread:$0]  %s9297_s1, 9216, %s18_s13, [#allocation4], %s6936_s15, %s6936_s15, %s6937_s16  }
   0xd   :  { %6931 = dma.done.wait [#allocation4], 9216  }
   0xe   :  { %6932 = vsyncadd [#allocation4], 4294958080  ;;  %v6658_v0 = vld [vmem:[#allocation3 + $0x78] sm:$0xff]   ;;  %v6662_v4 = vld [vmem:[#allocation3 + $0x70] sm:$0xff]   ;;  %vm79_vm0 = vsmask.f32 3328 }
   0xf   :  { %v6659_v1 = vld [vmem:[#allocation3 + $0xf8] sm:$0xff]   ;;  %6013 = vmatprep.subr.bf16.mxu0 %v6658_v0  ;;  %v6663_v5 = vld [vmem:[#allocation3 + $0xf0] sm:$0xff]   ;;  %v6666_v8 = vld [vmem:[#allocation3 + $0x68] sm:$0xff]   ;;  %vm80_vm1 = vsmask.f32 7440  ;;  %v9307_v63 = vmov 0 }
  0x10   :  { %v6660_v2 = vld [vmem:[#allocation3 + $0x38] sm:$0xff]   ;;  %6077 = vmatprep.subr.bf16.mxu1 %v6659_v1  ;;  %v6664_v6 = vld [vmem:[#allocation3 + $0x30] sm:$0xff]   ;;  %v6667_v9 = vld [vmem:[#allocation3 + $0xe8] sm:$0xff]   ;;  %vm2332_vm3 = vcmask 1040384   ;;  %vm2333_vm4 = vsmask.f32 256 }
  0x11   :  { %v6661_v3 = vld [vmem:[#allocation3 + $0xb8] sm:$0xff]   ;;  %6014 = vmatpush3.bf16.msra.mxu0 %v6660_v2  ;;  %v6665_v7 = vld [vmem:[#allocation3 + $0xb0] sm:$0xff]   ;;  %v6668_v10 = vld [vmem:[#allocation3 + $0x28] sm:$0xff]   ;;  %vm2395_vm6 = vsmask.f32 7938  ;;  %vm2658_vm8 = vcmask 1043456  }
  0x12   :  { %6078 = vmatpush3.bf16.msra.mxu1 %v6661_v3  ;;  %6015 = vmatprep.subr.bf16.mxu0 %v6662_v4  ;;  %v6669_v11 = vld [vmem:[#allocation3 + $0xa8] sm:$0xff]   ;;  %v6670_v12 = vld [vmem:[#allocation3 + $0x60] sm:$0xff]   ;;  %v6674_v16 = vld [vmem:[#allocation3 + $0x58] sm:$0xff]   ;;  %vm3060_vm10 = vcmask 1042432   ;;  %vm3061_vm11 = vcmask 1046532  }
  0x13   :  { %6079 = vmatprep.subr.bf16.mxu1 %v6663_v5  ;;  %v6671_v13 = vld [vmem:[#allocation3 + $0xe0] sm:$0xff]   ;;  %v6675_v17 = vld [vmem:[#allocation3 + $0xd8] sm:$0xff]   ;;  %v6678_v20 = vld [vmem:[#allocation3 + $0x50] sm:$0xff]  }
  0x14   :  { %v6672_v14 = vld [vmem:[#allocation3 + $0x20] sm:$0xff]   ;;  %v6676_v18 = vld [vmem:[#allocation3 + $0x18] sm:$0xff]   ;;  %v6679_v21 = vld [vmem:[#allocation3 + $0xd0] sm:$0xff]  }
  0x15   :  { %6016 = vmatpush3.bf16.msra.mxu0 %v6664_v6  ;;  %v6673_v15 = vld [vmem:[#allocation3 + $0xa0] sm:$0xff]   ;;  %v6677_v19 = vld [vmem:[#allocation3 + $0x98] sm:$0xff]   ;;  %v6680_v22 = vld [vmem:[#allocation3 + $0x10] sm:$0xff]  }
  0x16   :  { %6080 = vmatpush3.bf16.msra.mxu1 %v6665_v7  ;;  %6017 = vmatprep.subr.bf16.mxu0 %v6666_v8  ;;  %v6681_v23 = vld [vmem:[#allocation3 + $0x90] sm:$0xff]   ;;  %v6682_v24 = vld [vmem:[#allocation3 + $0x48] sm:$0xff]   ;;  %v6686_v28 = vld [vmem:[#allocation3 + $0x40] sm:$0xff]  }
  0x17   :  { %6081 = vmatprep.subr.bf16.mxu1 %v6667_v9  ;;  %v6683_v25 = vld [vmem:[#allocation3 + $0xc8] sm:$0xff]   ;;  %v6687_v29 = vld [vmem:[#allocation3 + $0xc0] sm:$0xff]   ;;  %v5470_v33 = vld [vmem:[%s9296_s0 + $0x90] sm:$0xf] }
  0x18   :  { %v6684_v26 = vld [vmem:[#allocation3 + $0x8] sm:$0xff]   ;;  %v6688_v30 = vld [vmem:[#allocation3] sm:$0xff]   ;;  %v5471_v34 = vld [vmem:[%s9296_s0 + $0x98] sm:$0xf]  ;;  %v357_v36 = vshrl.u32 %v5470_v33, 16  ;;  %v360_v37 = vshll.u32 %v5470_v33, 16 }
  0x19   :  { %6018 = vmatpush3.bf16.msra.mxu0 %v6668_v10  ;;  %v6685_v27 = vld [vmem:[#allocation3 + $0x88] sm:$0xff]   ;;  %v6689_v31 = vld [vmem:[#allocation3 + $0x80] sm:$0xff]   ;;  %v5590_v39 = vcombine.low %v5470_v33, %v5471_v34  ;;  %v6693_v44 = vld [vmem:[#allocation3 + $0x178] sm:$0xff]   ;;  %v371_v47 = vshrl.u32 %v5471_v34, 16  ;;  %v374_v48 = vshll.u32 %v5471_v34, 16 }
  0x1a   :  { %6082 = vmatpush3.bf16.msra.mxu1 %v6669_v11  ;;  %6019 = vmatprep.subr.bf16.mxu0 %v6670_v12  ;;  %v6690_v32 = vld [vmem:[%s9296_s0 + $0x48] ss:$8 sps:$4 sm:$0xff]   ;;  %v30_v35 = vld [vmem:[%s9296_s0] sm:$0xf]  ;;  %v63_v43 = vld [vmem:[%s9296_s0 + $0x4] sm:$0x1] }
  0x1b   :  { %6083 = vmatprep.subr.bf16.mxu1 %v6671_v13  ;;  %1846 = vmatprep.mubr.bf16.mxu0 %v6690_v32  ;;  %v31_v38 = vld [vmem:[%s9296_s0 + $0x8] sm:$0xf]  ;;  %v83_v40 = vshrl.u32 %v30_v35, 16  ;;  %v86_v41 = vshll.u32 %v30_v35, 16  ;;  %v359_v45 = vrot.slane %v357_v36, 4  ;;  %v362_v46 = vrot.slane %v360_v37, 5  ;;  %vm6989_vm2 = vmor %vm79_vm0, %vm80_vm1 }
  0x1c   :  { %v97_v42 = vshrl.u32 %v31_v38, 16  ;;  %v64_v49 = vld [vmem:[%s9296_s0 + $0xc] sm:$0x1]  ;;  %1943 = vmatprep.mubr.bf16.mxu1 %v5590_v39  ;;  %v100_v53 = vshll.u32 %v31_v38, 16  ;;  %v5566_v54 = vcombine.low %v30_v35, %v31_v38  ;;  %v92_v55 = vshll.u32 %v63_v43, 16  ;;  %v6694_v56 = vld [vmem:[#allocation3 + $0x138] sm:$0xff]   ;;  %vm7786_vm5 = vmand %vm2332_vm3, %vm2333_vm4 }
  0x1d   :  { %6020 = vmatpush3.bf16.msra.mxu0 %v6672_v14  ;;  %v85_v50 = vrot.slane %v83_v40, 4  ;;  %v88_v51 = vrot.slane %v86_v41, 5  ;;  %v106_v59 = vshll.u32 %v64_v49, 16  ;;  %v363_v60 = vor.u32 %v362_v46, %v359_v45  ;;  %v6698_v1 = vld [vmem:[#allocation3 + $0x170] sm:$0xff]   ;;  %v6695_v5 = vld [vmem:[%s9296_s0 + $0x58] ss:$8 sps:$4 sm:$0xff]   ;;  %vm7796_vm7 = vmand %vm2332_vm3, %vm2395_vm6 }
  0x1e   :  { %6084 = vmatpush3.bf16.msra.mxu1 %v6673_v15  ;;  %6021 = vmatprep.subr.bf16.mxu0 %v6674_v16  ;;  %v99_v52 = vrot.slane %v97_v42, 4  ;;  %v102_v57 = vrot.slane %v100_v53, 5  ;;  %v373_v61 = vrot.slane %v371_v47, 4  ;;  %v376_v62 = vrot.slane %v374_v48, 5  ;;  %v5472_v6 = vld [vmem:[%s9296_s0 + $0xa0] sm:$0xf]  ;;  %vm8155_vm9 = vmand %vm2658_vm8, %vm2395_vm6 }
  0x1f   :  { %6085 = vmatprep.subr.bf16.mxu1 %v6675_v17  ;;  %v89_v58 = vor.u32 %v88_v51, %v85_v50  ;;  %v9308_v63 = vsel %vm6989_vm2, 4294967295, %v9307_v63  ;;  %v94_v0 = vrot.slane %v92_v55, 5  ;;  %v108_v4 = vrot.slane %v106_v59, 5  ;;  %v7002_v7 = vld [vmem:[%s9296_s0 + $0xa8] sm:$0xf]  ;;  %v6699_v12 = vld [vmem:[#allocation3 + $0x130] sm:$0xff]   ;;  %vm8256_vm12 = vmor %vm3060_vm10, %vm3061_vm11 }
  0x20   :  { %9309 = vst [vmem:[#allocation9_spill] sm:$0xff] %v9308_v63  ;;  %v103_v3 = vor.u32 %v102_v57, %v99_v52  ;;  %v32_v8 = vld [vmem:[%s9296_s0 + $0x10] sm:$0xf]  ;;  %v33_v11 = vld [vmem:[%s9296_s0 + $0x18] sm:$0xf]  ;;  %v7012_v13 = vrot.slane %v363_v60, 4  ;;  %v377_v14 = vor.u32 %v376_v62, %v373_v61 }
  0x21   :  { %6022 = vmatpush3.bf16.msra.mxu0 %v6676_v18  ;;  %v90_v2 = vrot.slane %v89_v58, 4  ;;  %v111_v15 = vshrl.u32 %v32_v8, 16  ;;  %v65_v16 = vld [vmem:[%s9296_s0 + $0x14] sm:$0x1]  ;;  %v6703_v17 = vld [vmem:[#allocation3 + $0x168] sm:$0xff]   ;;  %v6708_v32 = vld [vmem:[#allocation3 + $0x160] sm:$0xff]  }
  0x22   :  { %6086 = vmatpush3.bf16.msra.mxu1 %v6677_v19  ;;  %6023 = vmatprep.subr.bf16.mxu0 %v6678_v20  ;;  %v104_v10 = vrot.slane %v103_v3, 4  ;;  %v385_v19 = vshrl.u32 %v5472_v6, 16  ;;  %v5591_v20 = vcombine.low %v5472_v6, %v7002_v7  ;;  %v388_v35 = vshll.u32 %v5472_v6, 16  ;;  %v6700_v40 = vld [vmem:[%s9296_s0 + $0x68] ss:$8 sps:$4 sm:$0xff]   ;;  %v6709_v42 = vld [vmem:[#allocation3 + $0x120] sm:$0xff]  }
  0x23   :  { %6087 = vmatprep.subr.bf16.mxu1 %v6679_v21  ;;  %v95_v9 = vsel %vm6989_vm2, %v90_v2, %v94_v0  ;;  %v114_v21 = vshll.u32 %v32_v8, 16  ;;  %v7029_v41 = vld [vmem:[%s9296_s0 + $0xb0] sm:$0xf]  ;;  %v7031_v43 = vrot.slane %v377_v14, 4  ;;  %v7036_v45 = vld [vmem:[%s9296_s0 + $0xb8] sm:$0xf] }
  0x24   :  { %v109_v18 = vsel %vm6989_vm2, %v104_v10, %v108_v4  ;;  %v34_v46 = vld [vmem:[%s9296_s0 + $0x20] sm:$0xf]  ;;  %v399_v47 = vshrl.u32 %v7002_v7, 16  ;;  %v35_v49 = vld [vmem:[%s9296_s0 + $0x28] sm:$0xf]  ;;  %v6713_v51 = vld [vmem:[#allocation3 + $0x158] sm:$0xff]   ;;  %v5592_v58 = vcombine.low %v7029_v41, %v7036_v45 }
  0x25   :  { %6024 = vmatpush3.bf16.msra.mxu0 %v6680_v22  ;;  %v66_v22 = vld [vmem:[%s9296_s0 + $0x1c] sm:$0x1]  ;;  %v139_v50 = vshrl.u32 %v34_v46, 16  ;;  %v7045_v52 = vrot.slane %v385_v19, 4  ;;  %v7047_v53 = vrot.slane %v388_v35, 5  ;;  %v142_v60 = vshll.u32 %v34_v46, 16 }
  0x26   :  { %6088 = vmatpush3.bf16.msra.mxu1 %v6681_v23  ;;  %6025 = vmatprep.subr.bf16.mxu0 %v6682_v24  ;;  %v5582_v23 = vcombine.low %v95_v9, %v109_v18  ;;  %v113_v24 = vrot.slane %v111_v15, 4  ;;  %v68_v61 = vld [vmem:[%s9296_s0 + $0x2c] sm:$0x1]  ;;  %v6714_v62 = vld [vmem:[#allocation3 + $0x118] sm:$0xff]   ;;  %v153_v2 = vshrl.u32 %v35_v49, 16  ;;  %v156_v3 = vshll.u32 %v35_v49, 16 }
  0x27   :  { %6089 = vmatprep.subr.bf16.mxu1 %v6683_v25  ;;  %v125_v25 = vshrl.u32 %v33_v11, 16  ;;  %v141_v59 = vrot.slane %v139_v50, 4  ;;  %v6715_v0 = vld [vmem:[#allocation3 + $0x1f8] sm:$0xff]   ;;  %v5568_v4 = vcombine.low %v34_v46, %v35_v49  ;;  %v6723_v49 = vld [vmem:[#allocation3 + $0x110] sm:$0xff]  }
  0x28   :  { %v155_v9 = vrot.slane %v153_v2, 4  ;;  %v158_v10 = vrot.slane %v156_v3, 5  ;;  %v6705_v15 = vld [vmem:[%s9296_s0 + $0x78] ss:$8 sps:$4 sm:$0xff]   ;;  %v39_v3 = vld [vmem:[%s9296_s0 + $0x128] sm:$0xf] }
  0x29   :  { %6026 = vmatpush3.bf16.msra.mxu0 %v6684_v26  ;;  %v128_v26 = vshll.u32 %v33_v11, 16  ;;  %v127_v33 = vrot.slane %v125_v25, 4  ;;  %v427_v25 = vshrl.u32 %v7036_v45, 16 }
  0x2a   :  { %6090 = vmatpush3.bf16.msra.mxu1 %v6685_v27  ;;  %6027 = vmatprep.subr.bf16.mxu0 %v6686_v28  ;;  %v6704_v27 = vld [vmem:[#allocation3 + $0x128] sm:$0xff]   ;;  %v116_v28 = vrot.slane %v114_v21, 5  ;;  %v159_v18 = vor.u32 %v158_v10, %v155_v9  ;;  %v416_v21 = vshll.u32 %v7029_v41, 16  ;;  %v71_v9 = vld [vmem:[%s9296_s0 + $0x124] sm:$0x1] }
  0x2b   :  { %6091 = vmatprep.subr.bf16.mxu1 %v6687_v29  ;;  %v5567_v29 = vcombine.low %v32_v8, %v33_v11  ;;  %v130_v34 = vrot.slane %v128_v26, 5  ;;  %v6716_v8 = vld [vmem:[#allocation3 + $0x1b8] sm:$0xff]   ;;  %v7062_v11 = vrot.slane %v399_v47, 4 }
  0x2c   :  { %v117_v36 = vor.u32 %v116_v28, %v113_v24  ;;  %v7082_v24 = vld [vmem:[%s9296_s0 + $0xc8] sm:$0xf]  ;;  %v160_v26 = vrot.slane %v159_v18, 4 }
  0x2d   :  { %6028 = vmatpush3.bf16.msra.mxu0 %v6688_v30  ;;  %v120_v30 = vshll.u32 %v65_v16, 16  ;;  %v131_v38 = vor.u32 %v130_v34, %v127_v33  ;;  %v70_v33 = vld [vmem:[%s9296_s0 + $0x3c] sm:$0x1]  ;;  %v6720_v34 = vld [vmem:[#allocation3 + $0x1b0] sm:$0xff]   ;;  %v455_v10 = vshrl.u32 %v7082_v24, 16  ;;  %v6725_v18 = vld [vmem:[#allocation3 + $0x1a8] sm:$0xff]  }
  0x2e   :  { %6092 = vmatpush3.bf16.msra.mxu1 %v6689_v31  ;;  %6141 = vmatprep.subr.bf16.mxu0 %v6693_v44  ;;  %v134_v31 = vshll.u32 %v66_v22, 16  ;;  %v118_v44 = vrot.slane %v117_v36, 4 }
  0x2f   :  { %v122_v37 = vrot.slane %v120_v30, 5  ;;  %v132_v48 = vrot.slane %v131_v38, 4  ;;  %6205 = vmatprep.subr.bf16.mxu1 %v6715_v0  ;;  %v430_v30 = vshll.u32 %v7036_v45, 16  ;;  %v7119_v0 = vrot.slane %v416_v21, 5  ;;  %v40_v45 = vld [vmem:[%s9296_s0 + $0x130] sm:$0xf] }
  0x30   :  { %1847 = vmatmul.mubr.bf16.vlgmr.msra.gmra.mxu0 %v5566_v54  ;;  %v136_v39 = vrot.slane %v134_v31, 5  ;;  %v402_v54 = vshll.u32 %v7002_v7, 16  ;;  %v162_v7 = vshll.u32 %v68_v61, 16  ;;  %v7114_v61 = vld [vmem:[%s9296_s0 + $0x1b8] sm:$0xf]  ;;  %v209_v21 = vshrl.u32 %v39_v3, 16 }
  0x31   :  { %6142 = vmatpush3.bf16.msra.mxu0 %v6694_v56  ;;  %1854 = vmatprep.mubr.bf16.mxu0 %v6695_v5  ;;  %v123_v55 = vsel %vm6989_vm2, %v118_v44, %v122_v37  ;;  %v67_v56 = vld [vmem:[%s9296_s0 + $0x24] sm:$0x1]  ;;  %v144_v5 = vrot.slane %v142_v60, 5  ;;  %v7109_v60 = vld [vmem:[%s9296_s0 + $0x1b0] sm:$0xf] }
  0x32   :  { %6143 = vmatprep.subr.bf16.mxu0 %v6698_v1  ;;  %1944 = vmatmul.mubr.bf16.vlgmr.msra.gmra.mxu1 %v5582_v23  ;;  %v137_v57 = vsel %vm6989_vm2, %v132_v48, %v136_v39  ;;  %v148_v6 = vshll.u32 %v67_v56, 16  ;;  %v7067_v16 = vrot.slane %v402_v54, 5  ;;  %v164_v19 = vrot.slane %v162_v7, 5  ;;  %v7077_v23 = vld [vmem:[%s9296_s0 + $0xc0] sm:$0xf]  ;;  %v6722_v39 = vld [vmem:[#allocation3 + $0x150] sm:$0xff]  }
  0x33   :  { %1951 = vmatprep.mubr.bf16.mxu1 %v5591_v20  ;;  %v5583_v1 = vcombine.low %v123_v55, %v137_v57  ;;  %v36_v20 = vld [vmem:[%s9296_s0 + $0x30] sm:$0xf]  ;;  %6206 = vmatpush3.bf16.msra.mxu1 %v6716_v8  ;;  %v5593_v36 = vcombine.low %v7077_v23, %v7082_v24  ;;  %v190_v48 = vshll.u32 %v70_v33, 16  ;;  %v6729_v33 = vld [vmem:[#allocation3 + $0x1a0] sm:$0xff]  }
  0x34   :  { %v150_v14 = vrot.slane %v148_v6, 5  ;;  %v167_v28 = vshrl.u32 %v36_v20, 16  ;;  %v165_v35 = vsel %vm6989_vm2, %v160_v26, %v164_v19  ;;  %v170_v38 = vshll.u32 %v36_v20, 16 }
  0x35   :  { %6144 = vmatpush3.bf16.msra.mxu0 %v6699_v12  ;;  %v145_v12 = vor.u32 %v144_v5, %v141_v59  ;;  %v192_v57 = vrot.slane %v190_v48, 5  ;;  %v441_v5 = vshrl.u32 %v7077_v23, 16  ;;  %v444_v6 = vshll.u32 %v7077_v23, 16  ;;  %v6726_v23 = vld [vmem:[#allocation3 + $0x1e0] sm:$0xff]  }
  0x36   :  { %6145 = vmatprep.subr.bf16.mxu0 %v6703_v17  ;;  %v413_v17 = vshrl.u32 %v7029_v41, 16  ;;  %v169_v37 = vrot.slane %v167_v28, 4  ;;  %v172_v46 = vrot.slane %v170_v38, 5  ;;  %v204_v28 = vshll.u32 %v71_v9, 16  ;;  %v7149_v48 = vld [vmem:[%s9296_s0 + $0x1c0] sm:$0xf] }
  0x37   :  { %v146_v22 = vrot.slane %v145_v12, 4 }
  0x38   :  { %1855 = vmatmul.mubr.bf16.gmra.mxu0 %v5567_v29  ;;  %v6717_v29 = vld [vmem:[#allocation3 + $0x1f0] sm:$0xff]   ;;  %v7101_v54 = vrot.slane %v413_v17, 4  ;;  %v173_v55 = vor.u32 %v172_v46, %v169_v37  ;;  %v72_v17 = vld [vmem:[%s9296_s0 + $0x12c] sm:$0x1] }
  0x39   :  { %6146 = vmatpush3.bf16.msra.mxu0 %v6704_v27  ;;  %1862 = vmatprep.mubr.bf16.mxu0 %v6700_v40  ;;  %v37_v27 = vld [vmem:[%s9296_s0 + $0x38] sm:$0xf]  ;;  %v151_v31 = vsel %vm6989_vm2, %v146_v22, %v150_v14  ;;  %v5594_v14 = vcombine.low %v7109_v60, %v7114_v61  ;;  %v212_v22 = vshll.u32 %v39_v3, 16 }
  0x3a   :  { %6147 = vmatprep.subr.bf16.mxu0 %v6708_v32  ;;  %1952 = vmatmul.mubr.bf16.gmra.mxu1 %v5583_v1  ;;  %v69_v32 = vld [vmem:[%s9296_s0 + $0x34] sm:$0x1]  ;;  %v5584_v40 = vcombine.low %v151_v31, %v165_v35  ;;  %v181_v41 = vshrl.u32 %v37_v27, 16  ;;  %v5569_v44 = vcombine.low %v36_v20, %v37_v27  ;;  %v7121_v1 = vrot.slane %v427_v25, 4 }
  0x3b   :  { %1959 = vmatprep.mubr.bf16.mxu1 %v5592_v58  ;;  %6207 = vmatprep.subr.bf16.mxu1 %v6717_v29  ;;  %v176_v47 = vshll.u32 %v69_v32, 16  ;;  %v6710_v58 = vld [vmem:[%s9296_s0 + $0x168] ss:$8 sps:$4 sm:$0xff]   ;;  %v174_v2 = vrot.slane %v173_v55, 4  ;;  %v211_v29 = vrot.slane %v209_v21, 4  ;;  %v214_v31 = vrot.slane %v212_v22, 5 }
  0x3c   :  { %6208 = vmatpush3.bf16.msra.mxu1 %v6720_v34  ;;  %v183_v50 = vrot.slane %v181_v41, 4  ;;  %v218_v32 = vshll.u32 %v72_v17, 16  ;;  %v206_v35 = vrot.slane %v204_v28, 5  ;;  %v6733_v41 = vld [vmem:[#allocation3 + $0x1d8] sm:$0xff]   ;;  %v458_v55 = vshll.u32 %v7082_v24, 16  ;;  %v6740_v22 = vld [vmem:[#allocation3 + $0x140] sm:$0xff]  }
  0x3d   :  { %6148 = vmatpush3.bf16.msra.mxu0 %v6709_v42  ;;  %v184_v42 = vshll.u32 %v37_v27, 16  ;;  %v178_v56 = vrot.slane %v176_v47, 5  ;;  %v215_v37 = vor.u32 %v214_v31, %v211_v29  ;;  %v6718_v47 = vld [vmem:[%s9296_s0 + $0x178] ss:$8 sps:$4 sm:$0xff]   ;;  %v469_v24 = vshrl.u32 %v7109_v60, 16 }
  0x3e   :  { %6149 = vmatprep.subr.bf16.mxu0 %v6713_v51  ;;  %v220_v38 = vrot.slane %v218_v32, 5  ;;  %v6727_v31 = vld [vmem:[%s9296_s0 + $0x188] ss:$8 sps:$4 sm:$0xff]  }
  0x3f   :  { %v186_v51 = vrot.slane %v184_v42, 5  ;;  %v179_v12 = vsel %vm6989_vm2, %v174_v2, %v178_v56  ;;  %v216_v42 = vrot.slane %v215_v37, 4  ;;  %v7172_v2 = vrot.slane %v455_v10, 4  ;;  %v73_v10 = vld [vmem:[%s9296_s0 + $0x134] sm:$0x1] }
  0x40   :  { %1863 = vmatmul.mubr.bf16.gmra.mxu0 %v5568_v4  ;;  %v6724_v4 = vld [vmem:[#allocation3 + $0x1e8] sm:$0xff]   ;;  %v7192_v32 = vld [vmem:[%s9296_s0 + $0x1d0] sm:$0xf]  ;;  %v7204_v37 = vld [vmem:[%s9296_s0 + $0x1d8] sm:$0xf] }
  0x41   :  { %6150 = vmatpush3.bf16.msra.mxu0 %v6714_v62  ;;  %1870 = vmatprep.mubr.bf16.mxu0 %v6705_v15  ;;  %v187_v59 = vor.u32 %v186_v51, %v183_v50  ;;  %v38_v62 = vld [vmem:[%s9296_s0 + $0x120] sm:$0xf]  ;;  %v7158_v50 = vrot.slane %v430_v30, 5  ;;  %v7160_v51 = vrot.slane %v441_v5, 4  ;;  %v221_v56 = vsel %vm6989_vm2, %v216_v42, %v220_v38  ;;  %v6738_v30 = vld [vmem:[#allocation3 + $0x190] sm:$0xff]  }
  0x42   :  { %6151 = vmatprep.subr.bf16.mxu0 %v6722_v39  ;;  %1960 = vmatmul.mubr.bf16.gmra.mxu1 %v5584_v40  ;;  %v195_v8 = vshrl.u32 %v38_v62, 16  ;;  %v198_v15 = vshll.u32 %v38_v62, 16  ;;  %v5570_v27 = vcombine.low %v38_v62, %v39_v3  ;;  %v6732_v39 = vld [vmem:[#allocation3 + $0x108] sm:$0xff]   ;;  %v472_v3 = vshll.u32 %v7109_v60, 16  ;;  %v74_v60 = vld [vmem:[%s9296_s0 + $0x13c] sm:$0x1] }
  0x43   :  { %1967 = vmatprep.mubr.bf16.mxu1 %v5593_v36  ;;  %v188_v7 = vrot.slane %v187_v59, 4  ;;  %6209 = vmatprep.subr.bf16.mxu1 %v6724_v4  ;;  %v6731_v36 = vld [vmem:[#allocation3 + $0x148] sm:$0xff]   ;;  %v41_v4 = vld [vmem:[%s9296_s0 + $0x138] sm:$0xf]  ;;  %v223_v5 = vshrl.u32 %v40_v45, 16  ;;  %v7206_v38 = vrot.slane %v469_v24, 4 }
  0x44   :  { %v197_v20 = vrot.slane %v195_v8, 4  ;;  %v200_v26 = vrot.slane %v198_v15, 5  ;;  %6210 = vmatpush3.bf16.msra.mxu1 %v6725_v18  ;;  %v237_v8 = vshrl.u32 %v41_v4, 16  ;;  %v240_v9 = vshll.u32 %v41_v4, 16 }
  0x45   :  { %6152 = vmatpush3.bf16.msra.mxu0 %v6723_v49  ;;  %v193_v19 = vsel %vm6989_vm2, %v188_v7, %v192_v57  ;;  %6211 = vmatprep.subr.bf16.mxu1 %v6726_v23  ;;  %v7154_v49 = vld [vmem:[%s9296_s0 + $0x1c8] sm:$0xf]  ;;  %v6735_v57 = vld [vmem:[#allocation3 + $0x1d0] sm:$0xff]   ;;  %v226_v7 = vshll.u32 %v40_v45, 16  ;;  %v232_v15 = vshll.u32 %v73_v10, 16 }
  0x46   :  { %v5585_v25 = vcombine.low %v179_v12, %v193_v19  ;;  %v201_v34 = vor.u32 %v200_v26, %v197_v20  ;;  %6153 = vmatprep.subr.bf16.mxu0 %v6731_v36  ;;  %v5595_v62 = vcombine.low %v7149_v48, %v7154_v49  ;;  %v225_v12 = vrot.slane %v223_v5, 4 }
  0x47   :  { %v228_v17 = vrot.slane %v226_v7, 5  ;;  %v239_v18 = vrot.slane %v237_v8, 4  ;;  %v242_v19 = vrot.slane %v240_v9, 5  ;;  %v246_v20 = vshll.u32 %v74_v60, 16  ;;  %v6743_v9 = vld [vmem:[#allocation3 + $0x188] sm:$0xff]  }
  0x48   :  { %1871 = vmatmul.mubr.bf16.gmra.mxu0 %v5569_v44  ;;  %v202_v40 = vrot.slane %v201_v34, 4  ;;  %6212 = vmatpush3.bf16.msra.mxu1 %v6729_v33  ;;  %v6734_v44 = vld [vmem:[#allocation3 + $0x198] sm:$0xff]   ;;  %v234_v21 = vrot.slane %v232_v15, 5  ;;  %v7194_v33 = vrot.slane %v458_v55, 5  ;;  %v486_v34 = vshll.u32 %v7114_v61, 16 }
  0x49   :  { %1878 = vmatprep.mubr.bf16.mxu0 %v6710_v58  ;;  %6154 = vmatpush3.bf16.msra.mxu0 %v6732_v39  ;;  %v7165_v58 = vrot.slane %v444_v6, 5  ;;  %v483_v6 = vshrl.u32 %v7114_v61, 16  ;;  %v229_v23 = vor.u32 %v228_v17, %v225_v12  ;;  %v248_v26 = vrot.slane %v246_v20, 5  ;;  %v6745_v17 = vld [vmem:[#allocation3 + $0x180] sm:$0xff]  }
  0x4a   :  { %1968 = vmatmul.mubr.bf16.gmra.mxu1 %v5585_v25  ;;  %v207_v46 = vsel %vm6989_vm2, %v202_v40, %v206_v35  ;;  %6213 = vmatprep.subr.bf16.mxu1 %v6733_v41  ;;  %v243_v25 = vor.u32 %v242_v19, %v239_v18  ;;  %v7208_v39 = vrot.slane %v472_v3, 5  ;;  %v5596_v61 = vcombine.low %v7192_v32, %v7204_v37  ;;  %v42_v41 = vld [vmem:[%s9296_s0 + $0x140] sm:$0xf]  ;;  %v7229_v19 = vld [vmem:[#allocation3 + $0x238] sm:$0xff]  }
  0x4b   :  { %1975 = vmatprep.mubr.bf16.mxu1 %v5594_v14  ;;  %v5586_v59 = vcombine.low %v207_v46, %v221_v56  ;;  %v5571_v14 = vcombine.low %v40_v45, %v41_v4  ;;  %6155 = vmatprep.subr.bf16.mxu0 %v6740_v22  ;;  %v230_v28 = vrot.slane %v229_v23, 4  ;;  %v7215_v42 = vrot.slane %v483_v6, 4  ;;  %v43_v46 = vld [vmem:[%s9296_s0 + $0x148] sm:$0xf]  ;;  %v75_v45 = vld [vmem:[%s9296_s0 + $0x144] sm:$0x1] }
  0x4c   :  { %6214 = vmatpush3.bf16.msra.mxu1 %v6734_v44  ;;  %v244_v29 = vrot.slane %v243_v25, 4  ;;  %v497_v44 = vshrl.u32 %v7149_v48, 16  ;;  %v254_v55 = vshll.u32 %v42_v41, 16  ;;  %v500_v56 = vshll.u32 %v7149_v48, 16  ;;  %v76_v4 = vld [vmem:[%s9296_s0 + $0x14c] sm:$0x1] }
  0x4d   :  { %6215 = vmatprep.subr.bf16.mxu1 %v6735_v57  ;;  %v235_v35 = vsel %vm6989_vm2, %v230_v28, %v234_v21  ;;  %v511_v57 = vshrl.u32 %v7154_v49, 16  ;;  %v5572_v3 = vcombine.low %v42_v41, %v43_v46  ;;  %v260_v5 = vshll.u32 %v75_v45, 16  ;;  %v6742_v6 = vld [vmem:[#allocation3 + $0x1c8] sm:$0xff]   ;;  %v6736_v25 = vld [vmem:[%s9296_s0 + $0x198] ss:$8 sps:$4 sm:$0xff]  }
  0x4e   :  { %v249_v36 = vsel %vm6989_vm2, %v244_v29, %v248_v26  ;;  %v256_v24 = vrot.slane %v254_v55, 5  ;;  %v274_v8 = vshll.u32 %v76_v4, 16  ;;  %v514_v20 = vshll.u32 %v7154_v49, 16  ;;  %v7243_v26 = vld [vmem:[%s9296_s0 + $0x1e0] sm:$0xf] }
  0x4f   :  { %v5587_v40 = vcombine.low %v235_v35, %v249_v36  ;;  %v262_v12 = vrot.slane %v260_v5, 5  ;;  %v7248_v49 = vld [vmem:[%s9296_s0 + $0x1e8] sm:$0xf]  ;;  %v7252_v28 = vrot.slane %v497_v44, 4  ;;  %v7254_v29 = vrot.slane %v500_v56, 5 }
  0x50   :  { %1879 = vmatmul.mubr.bf16.gmra.mxu0 %v5570_v27  ;;  %6216 = vmatpush3.bf16.msra.mxu1 %v6738_v30  ;;  %v6741_v27 = vld [vmem:[#allocation3 + $0x100] sm:$0xff]   ;;  %v276_v15 = vrot.slane %v274_v8, 5  ;;  %v7256_v35 = vrot.slane %v511_v57, 4  ;;  %v7258_v36 = vrot.slane %v514_v20, 5  ;;  %v539_v44 = vshrl.u32 %v7204_v37, 16 }
  0x51   :  { %1886 = vmatprep.mubr.bf16.mxu0 %v6718_v47  ;;  %6156 = vmatpush3.bf16.msra.mxu0 %v6741_v27  ;;  %v251_v47 = vshrl.u32 %v42_v41, 16  ;;  %v7250_v27 = vrot.slane %v486_v34, 5  ;;  %v525_v34 = vshrl.u32 %v7192_v32, 16  ;;  %v528_v41 = vshll.u32 %v7192_v32, 16 }
  0x52   :  { %1976 = vmatmul.mubr.bf16.gmra.mxu1 %v5586_v59  ;;  %v265_v59 = vshrl.u32 %v43_v46, 16  ;;  %6217 = vmatprep.subr.bf16.mxu1 %v6742_v6  ;;  %v542_v55 = vshll.u32 %v7204_v37, 16 }
  0x53   :  { %1983 = vmatprep.mubr.bf16.mxu1 %v5595_v62  ;;  %v268_v62 = vshll.u32 %v43_v46, 16  ;;  %v253_v30 = vrot.slane %v251_v47, 4  ;;  %6605 = vmatprep.subr.bf16.mxu0 %v7229_v19  ;;  %v45_v46 = vld [vmem:[%s9296_s0 + $0x158] sm:$0xf]  ;;  %v7278_v37 = vrot.slane %v525_v34, 4 }
  0x54   :  { %v267_v48 = vrot.slane %v265_v59, 4  ;;  %6218 = vmatpush3.bf16.msra.mxu1 %v6743_v9  ;;  %v293_v57 = vshrl.u32 %v45_v46, 16  ;;  %v296_v59 = vshll.u32 %v45_v46, 16 }
  0x55   :  { %v270_v7 = vrot.slane %v268_v62, 5  ;;  %v257_v10 = vor.u32 %v256_v24, %v253_v30  ;;  %v77_v62 = vld [vmem:[%s9296_s0 + $0x154] sm:$0x1]  ;;  %v78_v30 = vld [vmem:[%s9296_s0 + $0x15c] sm:$0x1] }
  0x56   :  { %v288_v24 = vshll.u32 %v77_v62, 16  ;;  %v295_v4 = vrot.slane %v293_v57, 4  ;;  %v298_v5 = vrot.slane %v296_v59, 5  ;;  %v302_v6 = vshll.u32 %v78_v30, 16  ;;  %v5505_v57 = vld [vmem:[%s9296_s0 + $0xac] sm:$0x1] }
  0x57   :  { %v271_v60 = vor.u32 %v270_v7, %v267_v48  ;;  %v258_v18 = vrot.slane %v257_v10, 4  ;;  %v7280_v48 = vrot.slane %v528_v41, 5  ;;  %v6746_v41 = vld [vmem:[%s9296_s0 + $0xd8] ss:$8 sps:$4 sm:$0xff]   ;;  %v570_v62 = vshll.u32 %v7248_v49, 16  ;;  %v6751_v30 = vld [vmem:[#allocation3 + $0x230] sm:$0xff]  }
  0x58   :  { %1887 = vmatmul.mubr.bf16.gmra.mxu0 %v5571_v14  ;;  %v6744_v14 = vld [vmem:[#allocation3 + $0x1c0] sm:$0xff]   ;;  %v290_v8 = vrot.slane %v288_v24, 5  ;;  %v299_v9 = vor.u32 %v298_v5, %v295_v4  ;;  %v304_v10 = vrot.slane %v302_v6, 5  ;;  %v433_v5 = vor.u32 %v7158_v50, %v7121_v1 }
  0x59   :  { %1894 = vmatprep.mubr.bf16.mxu0 %v6727_v31  ;;  %6219 = vmatprep.subr.bf16.mxu1 %v6744_v14  ;;  %v272_v21 = vrot.slane %v271_v60, 4  ;;  %v263_v22 = vsel %vm6989_vm2, %v258_v18, %v262_v12  ;;  %v391_v12 = vor.u32 %v7047_v53, %v7045_v52  ;;  %v5503_v18 = vld [vmem:[%s9296_s0 + $0x9c] sm:$0x1]  ;;  %v6752_v6 = vld [vmem:[%s9296_s0 + $0x60] ss:$8 sps:$4 sm:$0xff]  }
  0x5a   :  { %1984 = vmatmul.mubr.bf16.gmra.mxu1 %v5587_v40  ;;  %v5597_v40 = vcombine.low %v7243_v26, %v7248_v49  ;;  %v300_v60 = vrot.slane %v299_v9, 4  ;;  %v380_v53 = vshll.u32 %v5503_v18, 16 }
  0x5b   :  { %1991 = vmatprep.mubr.bf16.mxu1 %v5596_v61  ;;  %v277_v23 = vsel %vm6989_vm2, %v272_v21, %v276_v15  ;;  %6220 = vmatpush3.bf16.msra.mxu1 %v6745_v17  ;;  %v44_v61 = vld [vmem:[%s9296_s0 + $0x150] sm:$0xf]  ;;  %v5502_v15 = vld [vmem:[%s9296_s0 + $0x94] sm:$0x1]  ;;  %v7287_v17 = vrot.slane %v539_v44, 4  ;;  %v7292_v21 = vrot.slane %v542_v55, 5  ;;  %v405_v44 = vor.u32 %v7067_v16, %v7062_v11 }
  0x5c   :  { %v5588_v31 = vcombine.low %v263_v22, %v277_v23  ;;  %v279_v47 = vshrl.u32 %v44_v61, 16  ;;  %v282_v56 = vshll.u32 %v44_v61, 16  ;;  %v5573_v32 = vcombine.low %v44_v61, %v45_v46  ;;  %v7317_v55 = vld [vmem:[%s9296_s0 + $0x8] sm:$0xf]  ;;  %v7322_v11 = vld [vmem:[%s9296_s0 + $0x10] sm:$0xf] }
  0x5d   :  { %v366_v20 = vshll.u32 %v5502_v15, 16  ;;  %v305_v52 = vsel %vm6989_vm2, %v300_v60, %v304_v10  ;;  %v553_v23 = vshrl.u32 %v7243_v26, 16  ;;  %v556_v61 = vshll.u32 %v7243_v26, 16  ;;  %v5506_v10 = vld [vmem:[%s9296_s0 + $0xb4] sm:$0x1] }
  0x5e   :  { %v281_v45 = vrot.slane %v279_v47, 4  ;;  %v382_v34 = vrot.slane %v380_v53, 5  ;;  %v6748_v47 = vld [vmem:[%s9296_s0 + $0x50] ss:$8 sps:$4 sm:$0xff]   ;;  %v419_v16 = vor.u32 %v7119_v0, %v7101_v54  ;;  %v5614_v54 = vcombine.low %v7317_v55, %v7322_v11  ;;  %v5507_v15 = vld [vmem:[%s9296_s0 + $0xbc] sm:$0x1] }
  0x5f   :  { %v7334_v24 = vrot.slane %v553_v23, 4  ;;  %v422_v18 = vshll.u32 %v5506_v10, 16  ;;  %v436_v53 = vshll.u32 %v5507_v15, 16  ;;  %v461_v23 = vor.u32 %v7194_v33, %v7172_v2 }
  0x60   :  { %1895 = vmatmul.mubr.bf16.gmra.mxu0 %v5572_v3  ;;  %v284_v3 = vrot.slane %v282_v56, 5  ;;  %v383_v26 = vsel %vm6989_vm2, %v7031_v43, %v382_v34  ;;  %v567_v56 = vshrl.u32 %v7248_v49, 16  ;;  %v420_v4 = vrot.slane %v419_v16, 4 }
  0x61   :  { %1902 = vmatprep.mubr.bf16.mxu0 %v6736_v25  ;;  %v424_v34 = vrot.slane %v422_v18, 5 }
  0x62   :  { %1992 = vmatmul.mubr.bf16.gmra.mxu1 %v5588_v31  ;;  %v285_v7 = vor.u32 %v284_v3, %v281_v45  ;;  %v368_v31 = vrot.slane %v366_v20, 5  ;;  %v406_v45 = vrot.slane %v405_v44, 4  ;;  %v447_v20 = vor.u32 %v7165_v58, %v7160_v51  ;;  %v6759_v51 = vld [vmem:[#allocation3 + $0x220] sm:$0xff]  }
  0x63   :  { %1999 = vmatprep.mubr.bf16.mxu1 %v5597_v40  ;;  %v392_v40 = vrot.slane %v391_v12, 4  ;;  %v6755_v12 = vld [vmem:[#allocation3 + $0x228] sm:$0xff]   ;;  %v489_v58 = vor.u32 %v7250_v27, %v7215_v42  ;;  %v438_v44 = vrot.slane %v436_v53, 5  ;;  %v6756_v27 = vld [vmem:[%s9296_s0 + $0x70] ss:$8 sps:$4 sm:$0xff]  }
  0x64   :  { %v286_v14 = vrot.slane %v285_v7, 4  ;;  %v369_v46 = vsel %vm6989_vm2, %v7012_v13, %v368_v31  ;;  %v5504_v13 = vld [vmem:[%s9296_s0 + $0xa4] sm:$0x1]  ;;  %v5520_v7 = vld [vmem:[%s9296_s0 + $0x18] sm:$0xf]  ;;  %v7369_v31 = vrot.slane %v556_v61, 5 }
  0x65   :  { %v5606_v43 = vcombine.low %v369_v46, %v383_v26  ;;  %v394_v59 = vshll.u32 %v5504_v13, 16  ;;  %v659_v50 = vshrl.u32 %v5520_v7, 16  ;;  %v503_v46 = vor.u32 %v7254_v29, %v7252_v28  ;;  %v5508_v29 = vld [vmem:[%s9296_s0 + $0xc4] sm:$0x1] }
  0x66   :  { %v291_v22 = vsel %vm6989_vm2, %v286_v14, %v290_v8  ;;  %v5521_v8 = vld [vmem:[%s9296_s0 + $0x20] sm:$0xf]  ;;  %v7379_v61 = vrot.slane %v570_v62, 5  ;;  %v448_v26 = vrot.slane %v447_v20, 4  ;;  %v462_v13 = vrot.slane %v461_v23, 4 }
  0x67   :  { %v5589_v25 = vcombine.low %v291_v22, %v305_v52  ;;  %v396_v0 = vrot.slane %v394_v59, 5  ;;  %v673_v9 = vshrl.u32 %v5521_v8, 16  ;;  %v676_v60 = vshll.u32 %v5521_v8, 16  ;;  %v6750_v22 = vld [vmem:[%s9296_s0 + $0xe8] ss:$8 sps:$4 sm:$0xff]  }
  0x68   :  { %1903 = vmatmul.mubr.bf16.gmra.mxu0 %v5573_v32  ;;  %v408_v32 = vshll.u32 %v5505_v57, 16  ;;  %v434_v52 = vrot.slane %v433_v5, 4  ;;  %v6754_v59 = vld [vmem:[%s9296_s0 + $0xf8] ss:$8 sps:$4 sm:$0xff]   ;;  %v5522_v62 = vld [vmem:[%s9296_s0 + $0x28] sm:$0xf] }
  0x69   :  { %2040 = vmatprep.mubr.bf16.mxu0 %v5606_v43  ;;  %v397_v49 = vsel %vm6989_vm2, %v392_v40, %v396_v0  ;;  %v661_v40 = vrot.slane %v659_v50, 4  ;;  %v675_v2 = vrot.slane %v673_v9, 4  ;;  %v678_v33 = vrot.slane %v676_v60, 5  ;;  %v6763_v43 = vld [vmem:[#allocation3 + $0x218] sm:$0xff]  }
  0x6a   :  { %2000 = vmatmul.mubr.bf16.gmra.mxu1 %v5589_v25  ;;  %v410_v3 = vrot.slane %v408_v32, 5  ;;  %v475_v25 = vor.u32 %v7208_v39, %v7206_v38  ;;  %v425_v38 = vsel %vm6989_vm2, %v420_v4, %v424_v34  ;;  %v7377_v39 = vrot.slane %v567_v56, 4  ;;  %v5511_v20 = vld [vmem:[%s9296_s0 + $0x1bc] sm:$0x1] }
  0x6b   :  { %2137 = vmatprep.mubr.bf16.mxu1 %v6748_v47  ;;  %v5615_v47 = vcombine.low %v5520_v7, %v5521_v8  ;;  %v439_v42 = vsel %vm6989_vm2, %v434_v52, %v438_v44  ;;  %v7391_v56 = vrot.slane %v489_v58, 4  ;;  %v450_v32 = vshll.u32 %v5508_v29, 16  ;;  %v6767_v8 = vld [vmem:[#allocation3 + $0x210] sm:$0xff]   ;;  %v5525_v58 = vld [vmem:[%s9296_s0 + $0x40] sm:$0xf] }
  0x6c   :  { %v411_v1 = vsel %vm6989_vm2, %v406_v45, %v410_v3  ;;  %v5608_v28 = vcombine.low %v425_v38, %v439_v42  ;;  %v7389_v16 = vrot.slane %v475_v25, 4  ;;  %v5509_v45 = vld [vmem:[%s9296_s0 + $0xcc] sm:$0x1]  ;;  %v679_v0 = vor.u32 %v678_v33, %v675_v2  ;;  %v5523_v3 = vld [vmem:[%s9296_s0 + $0x30] sm:$0xf] }
  0x6d   :  { %v5607_v14 = vcombine.low %v397_v49, %v411_v1  ;;  %v687_v4 = vshrl.u32 %v5522_v62, 16  ;;  %v464_v5 = vshll.u32 %v5509_v45, 16  ;;  %v690_v49 = vshll.u32 %v5522_v62, 16  ;;  %v5526_v29 = vld [vmem:[%s9296_s0 + $0x128] sm:$0xf] }
  0x6e   :  { %v704_v1 = vshll.u32 %v5523_v3, 16  ;;  %v5616_v15 = vcombine.low %v5522_v62, %v5523_v3  ;;  %v492_v23 = vshll.u32 %v5511_v20, 16  ;;  %v729_v33 = vshrl.u32 %v5525_v58, 16 }
  0x6f   :  { %v466_v50 = vrot.slane %v464_v5, 5  ;;  %v7423_v60 = vrot.slane %v687_v4, 4  ;;  %v743_v45 = vshrl.u32 %v5526_v29, 16 }
  0x70   :  { %2041 = vmatmul.mubr.bf16.vlgmr.msra.gmra.mxu0 %v6746_v41  ;;  %v7440_v52 = vrot.slane %v704_v1, 5  ;;  %v494_v2 = vrot.slane %v492_v23, 5  ;;  %v6762_v1 = vld [vmem:[%s9296_s0 + $0x1f8] ss:$8 sps:$4 sm:$0xff]  }
  0x71   :  { %6606 = vmatpush3.bf16.msra.mxu0 %v7229_v19  ;;  %v662_v19 = vshll.u32 %v5520_v7, 16  ;;  %2048 = vmatprep.mubr.bf16.mxu0 %v5607_v14  ;;  %v452_v7 = vrot.slane %v450_v32, 5  ;;  %v7421_v14 = vrot.slane %v679_v0, 4  ;;  %v746_v32 = vshll.u32 %v5526_v29, 16 }
  0x72   :  { %6607 = vmatprep.subr.bf16.mxu0 %v6751_v30  ;;  %2138 = vmatmul.mubr.bf16.vlgmr.msra.gmra.mxu1 %v5614_v54  ;;  %v517_v54 = vor.u32 %v7258_v36, %v7256_v35  ;;  %v531_v35 = vor.u32 %v7280_v48, %v7278_v37  ;;  %v545_v36 = vor.u32 %v7292_v21, %v7287_v17  ;;  %v5510_v48 = vld [vmem:[%s9296_s0 + $0x1b4] sm:$0x1]  ;;  %v7430_v17 = vrot.slane %v690_v49, 5 }
  0x73   :  { %2145 = vmatprep.mubr.bf16.mxu1 %v6752_v6  ;;  %v664_v41 = vrot.slane %v662_v19, 5  ;;  %v701_v6 = vshrl.u32 %v5523_v3, 16  ;;  %v453_v9 = vsel %vm6989_vm2, %v448_v26, %v452_v7  ;;  %v467_v37 = vsel %vm6989_vm2, %v462_v13, %v466_v50  ;;  %v5512_v13 = vld [vmem:[%s9296_s0 + $0x1c4] sm:$0x1] }
  0x74   :  { %v7417_v10 = vrot.slane %v517_v54, 4  ;;  %v5609_v18 = vcombine.low %v453_v9, %v467_v37  ;;  %v478_v53 = vshll.u32 %v5510_v48, 16  ;;  %v7442_v25 = vrot.slane %v531_v35, 4  ;;  %v5514_v37 = vld [vmem:[%s9296_s0 + $0x1d4] sm:$0x1] }
  0x75   :  { %6608 = vmatpush3.bf16.msra.mxu0 %v6751_v30  ;;  %v665_v57 = vor.u32 %v664_v41, %v661_v40  ;;  %v7402_v30 = vrot.slane %v503_v46, 4  ;;  %v7432_v21 = vrot.slane %v701_v6, 4  ;;  %v5524_v40 = vld [vmem:[%s9296_s0 + $0x38] sm:$0xf]  ;;  %v7450_v34 = vrot.slane %v545_v36, 4 }
  0x76   :  { %6609 = vmatprep.subr.bf16.mxu0 %v6755_v12  ;;  %v715_v41 = vshrl.u32 %v5524_v40, 16  ;;  %v718_v44 = vshll.u32 %v5524_v40, 16  ;;  %v480_v46 = vrot.slane %v478_v53, 5  ;;  %v495_v42 = vsel %vm6989_vm2, %v7391_v56, %v494_v2 }
  0x77   :  { %v7413_v19 = vrot.slane %v665_v57, 4  ;;  %v5527_v57 = vld [vmem:[%s9296_s0 + $0x130] sm:$0xf]  ;;  %v506_v62 = vshll.u32 %v5512_v13, 16  ;;  %v631_v0 = vshrl.u32 %v7317_v55, 16  ;;  %v7497_v50 = vrot.slane %v743_v45, 4 }
  0x78   :  { %2049 = vmatmul.mubr.bf16.gmra.mxu0 %v6750_v22  ;;  %v6771_v22 = vld [vmem:[#allocation3 + $0x208] sm:$0xff]   ;;  %v481_v38 = vsel %vm6989_vm2, %v7389_v16, %v480_v46  ;;  %v573_v16 = vor.u32 %v7379_v61, %v7377_v39  ;;  %v7474_v56 = vrot.slane %v715_v41, 4  ;;  %v7483_v3 = vrot.slane %v718_v44, 5 }
  0x79   :  { %6610 = vmatpush3.bf16.msra.mxu0 %v6755_v12  ;;  %2056 = vmatprep.mubr.bf16.mxu0 %v5608_v28  ;;  %v559_v12 = vor.u32 %v7369_v31, %v7334_v24  ;;  %v6760_v24 = vld [vmem:[%s9296_s0 + $0x80] ss:$8 sps:$4 sm:$0xff]   ;;  %v5610_v26 = vcombine.low %v481_v38, %v495_v42  ;;  %v6764_v28 = vld [vmem:[%s9296_s0 + $0x170] ss:$8 sps:$4 sm:$0xff]   ;;  %v7485_v39 = vrot.slane %v729_v33, 4  ;;  %v757_v61 = vshrl.u32 %v5527_v57, 16 }
  0x7a   :  { %6611 = vmatprep.subr.bf16.mxu0 %v6759_v51  ;;  %2146 = vmatmul.mubr.bf16.gmra.mxu1 %v5615_v47  ;;  %v6758_v31 = vld [vmem:[%s9296_s0 + $0x108] ss:$8 sps:$4 sm:$0xff]   ;;  %v732_v47 = vshll.u32 %v5525_v58, 16  ;;  %v508_v4 = vrot.slane %v506_v62, 5  ;;  %v760_v49 = vshll.u32 %v5527_v57, 16  ;;  %v7489_v7 = vrot.slane %v573_v16, 4 }
  0x7b   :  { %2153 = vmatprep.mubr.bf16.mxu1 %v6756_v27  ;;  %v6775_v27 = vld [vmem:[#allocation3 + $0x200] sm:$0xff]   ;;  %v7499_v35 = vrot.slane %v746_v32, 5  ;;  %v7504_v9 = vrot.slane %v631_v0, 4  ;;  %v634_v48 = vshll.u32 %v7317_v55, 16  ;;  %v5618_v20 = vcombine.low %v5526_v29, %v5527_v57  ;;  %v6766_v44 = vld [vmem:[%s9296_s0 + $0x208] ss:$8 sps:$4 sm:$0xff]  }
  0x7c   :  { %v7487_v5 = vrot.slane %v732_v47, 5  ;;  %v5529_v55 = vld [vmem:[%s9296_s0 + $0x140] sm:$0xf]  ;;  %v645_v41 = vshrl.u32 %v7322_v11, 16  ;;  %v5517_v13 = vld [vmem:[%s9296_s0 + $0x1ec] sm:$0x1]  ;;  %v707_v62 = vor.u32 %v7440_v52, %v7432_v21 }
  0x7d   :  { %6612 = vmatpush3.bf16.msra.mxu0 %v6759_v51  ;;  %v7452_v51 = vrot.slane %v559_v12, 4  ;;  %v7506_v12 = vrot.slane %v757_v61, 4  ;;  %v785_v2 = vshrl.u32 %v5529_v55, 16  ;;  %v788_v33 = vshll.u32 %v5529_v55, 16  ;;  %v6772_v32 = vld [vmem:[%s9296_s0 + $0x190] ss:$8 sps:$4 sm:$0xff]  }
  0x7e   :  { %6613 = vmatprep.subr.bf16.mxu0 %v6763_v43  ;;  %v5560_v21 = vld [vmem:[%s9296_s0 + $0x13c] sm:$0x1] }
  0x7f   :  { %v7566_v45 = vrot.slane %v785_v2, 4  ;;  %v5553_v2 = vld [vmem:[%s9296_s0 + $0x24] sm:$0x1] }
  0x80   :  { %2057 = vmatmul.mubr.bf16.gmra.mxu0 %v6754_v59  ;;  %v5513_v59 = vld [vmem:[%s9296_s0 + $0x1cc] sm:$0x1] }
  0x81   :  { %6614 = vmatpush3.bf16.msra.mxu0 %v6763_v43  ;;  %2064 = vmatprep.mubr.bf16.mxu0 %v5609_v18  ;;  %v5617_v43 = vcombine.low %v5524_v40, %v5525_v58  ;;  %v520_v54 = vshll.u32 %v5513_v59, 16  ;;  %v576_v59 = vshll.u32 %v5517_v13, 16 }
  0x82   :  { %6615 = vmatprep.subr.bf16.mxu0 %v6767_v8  ;;  %2154 = vmatmul.mubr.bf16.gmra.mxu1 %v5616_v15 }
  0x83   :  { %2161 = vmatprep.mubr.bf16.mxu1 %v6760_v24  ;;  %v522_v6 = vrot.slane %v520_v54, 5  ;;  %v534_v24 = vshll.u32 %v5514_v37, 16  ;;  %v7595_v37 = vld [vmem:[%s9296_s0 + $0x158] sm:$0xf] }
  0x85   :  { %6616 = vmatpush3.bf16.msra.mxu0 %v6767_v8  ;;  %v509_v8 = vsel %vm6989_vm2, %v7402_v30, %v508_v4  ;;  %v523_v36 = vsel %vm6989_vm2, %v7417_v10, %v522_v6  ;;  %v7511_v30 = vld [vmem:[%s9296_s0 + $0x138] sm:$0xf]  ;;  %v5515_v10 = vld [vmem:[%s9296_s0 + $0x1dc] sm:$0x1]  ;;  %v536_v40 = vrot.slane %v534_v24, 5  ;;  %v578_v4 = vrot.slane %v576_v59, 5 }
  0x86   :  { %6617 = vmatprep.subr.bf16.mxu0 %v6771_v22  ;;  %v5611_v15 = vcombine.low %v509_v8, %v523_v36  ;;  %v771_v18 = vshrl.u32 %v7511_v30, 16  ;;  %v774_v53 = vshll.u32 %v7511_v30, 16  ;;  %v548_v23 = vshll.u32 %v5515_v10, 16 }
  0x87   :  { %v537_v47 = vsel %vm6989_vm2, %v7442_v25, %v536_v40  ;;  %v5619_v0 = vcombine.low %v7511_v30, %v5529_v55  ;;  %v7579_v6 = vrot.slane %v788_v33, 5  ;;  %v579_v30 = vsel %vm6989_vm2, %v7489_v7, %v578_v4  ;;  %v6770_v7 = vld [vmem:[%s9296_s0 + $0x218] ss:$8 sps:$4 sm:$0xff]  }
  0x88   :  { %2065 = vmatmul.mubr.bf16.gmra.mxu0 %v6758_v31  ;;  %v7525_v31 = vrot.slane %v760_v49, 5  ;;  %v550_v58 = vrot.slane %v548_v23, 5  ;;  %v7534_v46 = vrot.slane %v771_v18, 4  ;;  %v7539_v38 = vrot.slane %v774_v53, 5  ;;  %v5550_v18 = vld [vmem:[%s9296_s0 + $0xc] sm:$0x1] }
  0x89   :  { %2072 = vmatprep.mubr.bf16.mxu0 %v5610_v26  ;;  %6618 = vmatpush3.bf16.msra.mxu0 %v6771_v22  ;;  %v6768_v22 = vld [vmem:[%s9296_s0 + $0x180] ss:$8 sps:$4 sm:$0xff]   ;;  %v5516_v26 = vld [vmem:[%s9296_s0 + $0x1e4] sm:$0x1]  ;;  %v749_v49 = vor.u32 %v7499_v35, %v7497_v50  ;;  %v5551_v53 = vld [vmem:[%s9296_s0 + $0x14] sm:$0x1] }
  0x8a   :  { %6619 = vmatprep.subr.bf16.mxu0 %v6775_v27  ;;  %2162 = vmatmul.mubr.bf16.gmra.mxu1 %v5617_v43  ;;  %v551_v42 = vsel %vm6989_vm2, %v7450_v34, %v550_v58  ;;  %v693_v34 = vor.u32 %v7430_v17, %v7423_v60  ;;  %v7562_v43 = vld [vmem:[%s9296_s0 + $0x150] sm:$0xf]  ;;  %v562_v57 = vshll.u32 %v5516_v26, 16  ;;  %v721_v60 = vor.u32 %v7483_v3, %v7474_v56  ;;  %v5554_v26 = vld [vmem:[%s9296_s0 + $0x2c] sm:$0x1] }
  0x8b   :  { %2169 = vmatprep.mubr.bf16.mxu1 %v6764_v28  ;;  %v636_v28 = vrot.slane %v634_v48, 5  ;;  %v5612_v16 = vcombine.low %v537_v47, %v551_v42  ;;  %v813_v54 = vshrl.u32 %v7562_v43, 16  ;;  %v735_v17 = vor.u32 %v7487_v5, %v7485_v39  ;;  %v7600_v48 = vld [vmem:[%s9296_s0 + $0x160] sm:$0xf]  ;;  %v5562_v39 = vld [vmem:[%s9296_s0 + $0x14c] sm:$0x1] }
  0x8c   :  { %v564_v61 = vrot.slane %v562_v57, 5  ;;  %v816_v36 = vshll.u32 %v7562_v43, 16  ;;  %v763_v10 = vor.u32 %v7525_v31, %v7506_v12  ;;  %v777_v23 = vor.u32 %v7539_v38, %v7534_v46  ;;  %v5564_v50 = vld [vmem:[%s9296_s0 + $0x15c] sm:$0x1] }
  0x8d   :  { %6620 = vmatpush3.bf16.msra.mxu0 %v6775_v27  ;;  %v7547_v27 = vld [vmem:[%s9296_s0 + $0x148] sm:$0xf]  ;;  %v7611_v24 = vrot.slane %v813_v54, 4  ;;  %v830_v55 = vshll.u32 %v7595_v37, 16  ;;  %v841_v40 = vshrl.u32 %v7600_v48, 16  ;;  %v844_v58 = vshll.u32 %v7600_v48, 16 }
  0x8e   :  { %v799_v25 = vshrl.u32 %v7547_v27, 16  ;;  %v802_v29 = vshll.u32 %v7547_v27, 16  ;;  %v7630_v33 = vrot.slane %v816_v36, 5  ;;  %v647_v42 = vrot.slane %v645_v41, 4  ;;  %v6776_v41 = vld [vmem:[%s9296_s0 + $0x1a0] ss:$8 sps:$4 sm:$0xff]  }
  0x8f   :  { %v682_v59 = vshll.u32 %v5553_v2, 16  ;;  %v7647_v54 = vrot.slane %v830_v55, 5  ;;  %v7653_v4 = vrot.slane %v693_v34, 4  ;;  %v5559_v55 = vld [vmem:[%s9296_s0 + $0x134] sm:$0x1]  ;;  %v5621_v35 = vcombine.low %v7595_v37, %v7600_v48 }
  0x90   :  { %2073 = vmatmul.mubr.bf16.gmra.mxu0 %v6762_v1  ;;  %v7581_v8 = vrot.slane %v799_v25, 4  ;;  %v7583_v1 = vrot.slane %v802_v29, 5  ;;  %v654_v29 = vshll.u32 %v5551_v53, 16  ;;  %v778_v12 = vrot.slane %v777_v23, 4 }
  0x91   :  { %2080 = vmatprep.mubr.bf16.mxu0 %v5611_v15  ;;  %v565_v15 = vsel %vm6989_vm2, %v7452_v51, %v564_v61  ;;  %v637_v51 = vor.u32 %v636_v28, %v7504_v9  ;;  %v5552_v9 = vld [vmem:[%s9296_s0 + $0x1c] sm:$0x1]  ;;  %v7651_v61 = vrot.slane %v844_v58, 5 }
  0x92   :  { %2170 = vmatmul.mubr.bf16.gmra.mxu1 %v5618_v20  ;;  %v5620_v20 = vcombine.low %v7547_v27, %v7562_v43  ;;  %v5613_v47 = vcombine.low %v565_v15, %v579_v30  ;;  %v648_v27 = vshll.u32 %v7322_v11, 16  ;;  %v668_v13 = vshll.u32 %v5552_v9, 16  ;;  %v5556_v11 = vld [vmem:[%s9296_s0 + $0x3c] sm:$0x1] }
  0x93   :  { %2177 = vmatprep.mubr.bf16.mxu1 %v6768_v22  ;;  %v827_v22 = vshrl.u32 %v7595_v37, 16  ;;  %v638_v28 = vrot.slane %v637_v51, 4  ;;  %v656_v15 = vrot.slane %v654_v29, 5  ;;  %v5558_v51 = vld [vmem:[%s9296_s0 + $0x12c] sm:$0x1]  ;;  %v724_v9 = vshll.u32 %v5556_v11, 16 }
  0x94   :  { %v650_v57 = vrot.slane %v648_v27, 5  ;;  %v670_v53 = vrot.slane %v668_v13, 5  ;;  %v805_v27 = vor.u32 %v7583_v1, %v7581_v8  ;;  %v5565_v8 = vld [vmem:[%s9296_s0 + $0x164] sm:$0x1] }
  0x95   :  { %v7639_v43 = vrot.slane %v827_v22, 4  ;;  %v791_v22 = vor.u32 %v7579_v6, %v7566_v45  ;;  %v684_v45 = vrot.slane %v682_v59, 5  ;;  %v726_v3 = vrot.slane %v724_v9, 5 }
  0x96   :  { %v651_v36 = vor.u32 %v650_v57, %v647_v42  ;;  %v5561_v42 = vld [vmem:[%s9296_s0 + $0x144] sm:$0x1]  ;;  %v806_v13 = vrot.slane %v805_v27, 4  ;;  %v850_v38 = vshll.u32 %v5565_v8, 16 }
  0x97   :  { %v794_v29 = vshll.u32 %v5561_v42, 16  ;;  %v685_v37 = vsel %vm6989_vm2, %v7421_v14, %v684_v45  ;;  %v792_v31 = vrot.slane %v791_v22, 4  ;;  %v833_v14 = vor.u32 %v7647_v54, %v7639_v43 }
  0x98   :  { %2081 = vmatmul.mubr.bf16.gmra.mxu0 %v6766_v44  ;;  %v640_v44 = vshll.u32 %v5550_v18, 16  ;;  %v5557_v18 = vld [vmem:[%s9296_s0 + $0x44] sm:$0x1]  ;;  %v652_v58 = vrot.slane %v651_v36, 4 }
  0x99   :  { %2088 = vmatprep.mubr.bf16.mxu0 %v5612_v16  ;;  %v5555_v16 = vld [vmem:[%s9296_s0 + $0x34] sm:$0x1]  ;;  %v738_v2 = vshll.u32 %v5557_v18, 16  ;;  %v834_v36 = vrot.slane %v833_v14, 4 }
  0x9a   :  { %2178 = vmatmul.mubr.bf16.gmra.mxu1 %v5619_v0  ;;  %v642_v25 = vrot.slane %v640_v44, 5  ;;  %v7649_v0 = vrot.slane %v841_v40, 4  ;;  %v710_v30 = vshll.u32 %v5555_v16, 16  ;;  %v6774_v40 = vld [vmem:[%s9296_s0 + $0x228] ss:$8 sps:$4 sm:$0xff]   ;;  %v722_v44 = vrot.slane %v721_v60, 4 }
  0x9b   :  { %2185 = vmatprep.mubr.bf16.mxu1 %v6772_v32  ;;  %v696_v32 = vshll.u32 %v5554_v26, 16  ;;  %v657_v56 = vsel %vm6989_vm2, %v652_v58, %v656_v15  ;;  %v750_v60 = vrot.slane %v749_v49, 4  ;;  %v819_v26 = vor.u32 %v7630_v33, %v7611_v24 }
  0x9c   :  { %v643_v34 = vsel %vm6989_vm2, %v638_v28, %v642_v25  ;;  %v712_v52 = vrot.slane %v710_v30, 5  ;;  %v671_v49 = vsel %vm6989_vm2, %v7413_v19, %v670_v53  ;;  %v764_v28 = vrot.slane %v763_v10, 4 }
  0x9d   :  { %v698_v6 = vrot.slane %v696_v32, 5  ;;  %v5630_v5 = vcombine.low %v643_v34, %v657_v56  ;;  %v780_v25 = vshll.u32 %v5560_v21, 16  ;;  %v740_v1 = vrot.slane %v738_v2, 5  ;;  %v6778_v21 = vld [vmem:[%s9298_s2 + $0x78] sm:$0xff]   ;;  %v6780_v2 = vld [vmem:[%s9298_s2 + $0x70] sm:$0xff]  }
  0x9e   :  { %v796_v10 = vrot.slane %v794_v29, 5  ;;  %v808_v16 = vshll.u32 %v5562_v39, 16  ;;  %v836_v32 = vshll.u32 %v5564_v50, 16  ;;  %v5631_v11 = vcombine.low %v671_v49, %v685_v37  ;;  %6285 = vmatprep.subr.bf16.mxu1 %v6778_v21  ;;  %v6782_v39 = vld [vmem:[%s9298_s2 + $0x68] sm:$0xff]   ;;  %v6784_v29 = vld [vmem:[%s9298_s2 + $0x60] sm:$0xff]  }
  0x9f   :  { %v699_v19 = vsel %vm6989_vm2, %v7653_v4, %v698_v6  ;;  %v782_v48 = vrot.slane %v780_v25, 5  ;;  %v847_v46 = vor.u32 %v7651_v61, %v7649_v0  ;;  %v727_v43 = vsel %vm6989_vm2, %v722_v44, %v726_v3  ;;  %v6785_v37 = vld [vmem:[%s9298_s2 + $0x20] sm:$0xff]  }
  0xa0   :  { %2089 = vmatmul.mubr.bf16.gmra.mxu0 %v6770_v7  ;;  %v708_v7 = vrot.slane %v707_v62, 4  ;;  %v736_v62 = vrot.slane %v735_v17, 4  ;;  %v5563_v17 = vld [vmem:[%s9296_s0 + $0x154] sm:$0x1]  ;;  %v810_v23 = vrot.slane %v808_v16, 5  ;;  %v838_v15 = vrot.slane %v836_v32, 5 }
  0xa1   :  { %2096 = vmatprep.mubr.bf16.mxu0 %v5613_v47  ;;  %v752_v47 = vshll.u32 %v5558_v51, 16  ;;  %v822_v59 = vshll.u32 %v5563_v17, 16  ;;  %v848_v18 = vrot.slane %v847_v46, 4  ;;  %v852_v51 = vrot.slane %v850_v38, 5  ;;  %v6787_v16 = vld [vmem:[%s9298_s2 + $0xb8] sm:$0xff]  }
  0xa2   :  { %2186 = vmatmul.mubr.bf16.gmra.mxu1 %v5620_v20  ;;  %v766_v20 = vshll.u32 %v5559_v55, 16  ;;  %v713_v57 = vsel %vm6989_vm2, %v708_v7, %v712_v52  ;;  %v741_v54 = vsel %vm6989_vm2, %v736_v62, %v740_v1  ;;  %v783_v53 = vsel %vm6989_vm2, %v778_v12, %v782_v48  ;;  %v6779_v52 = vld [vmem:[%s9298_s2 + $0x38] sm:$0xff]  }
  0xa3   :  { %2193 = vmatprep.mubr.bf16.mxu1 %v6776_v41  ;;  %v754_v24 = vrot.slane %v752_v47, 5  ;;  %v820_v41 = vrot.slane %v819_v26, 4  ;;  %v824_v4 = vrot.slane %v822_v59, 5  ;;  %v5632_v30 = vcombine.low %v699_v19, %v713_v57  ;;  %6286 = vmatpush3.bf16.msra.mxu1 %v6779_v52  ;;  %v6781_v47 = vld [vmem:[%s9298_s2 + $0x30] sm:$0xff]   ;;  %v6786_v48 = vld [vmem:[%s9298_s2 + $0xf8] sm:$0xff]  }
  0xa4   :  { %v768_v33 = vrot.slane %v766_v20, 5  ;;  %v5633_v61 = vcombine.low %v727_v43, %v741_v54  ;;  %v797_v7 = vsel %vm6989_vm2, %v792_v31, %v796_v10  ;;  %v811_v9 = vsel %vm6989_vm2, %v806_v13, %v810_v23  ;;  %6287 = vmatprep.subr.bf16.mxu1 %v6780_v2  ;;  %6349 = vmatprep.subr.bf16.mxu0 %v6786_v48  ;;  %v2406_v23 = vld [vmem:[#allocation2 + $0x1c] sm:$0x1] }
  0xa5   :  { %v755_v22 = vsel %vm6989_vm2, %v750_v60, %v754_v24  ;;  %v825_v55 = vsel %vm6989_vm2, %v820_v41, %v824_v4  ;;  %v839_v45 = vsel %vm6989_vm2, %v834_v36, %v838_v15  ;;  %v853_v6 = vsel %vm6989_vm2, %v848_v18, %v852_v51  ;;  %v6788_v4 = vld [vmem:[%s9298_s2 + $0xf0] sm:$0xff]  }
  0xa6   :  { %v769_v0 = vsel %vm6989_vm2, %v764_v28, %v768_v33  ;;  %v5636_v58 = vcombine.low %v811_v9, %v825_v55  ;;  %v5637_v44 = vcombine.low %v839_v45, %v853_v6  ;;  %v9310_v38 = vmov 0  ;;  %v6790_v51 = vld [vmem:[%s9298_s2 + $0xb0] sm:$0xff]   ;;  %v2347_v6 = vld [vmem:[#allocation2 + $0x20] sm:$0x1] }
  0xa7   :  { %v5634_v34 = vcombine.low %v755_v22, %v769_v0  ;;  %6288 = vmatpush3.bf16.msra.mxu1 %v6781_v47  ;;  %v9311_v38 = vsel %vm7786_vm5, 4294967295, %v9310_v38  ;;  %v9313_v18 = vmov 0  ;;  %v2407_v54 = vsel %vm7796_vm7, 0, %v2406_v23 }
  0xa8   :  { %2097 = vmatmul.mubr.bf16.gmra.mxu0 %v6774_v40  ;;  %v5635_v40 = vcombine.low %v783_v53, %v797_v7  ;;  %6289 = vmatprep.subr.bf16.mxu1 %v6782_v39  ;;  %9312 = vst [vmem:[#allocation10_spill] sm:$0xff] %v9311_v38  ;;  %v9314_v18 = vsel %vm7796_vm7, 4294967295, %v9313_v18  ;;  %2408 = vst [vmem:[#allocation2 + $0x1c] sm:$0x1] %v2407_v54  ;;  %v2400_v53 = vld [vmem:[#allocation2 + $0xc] sm:$0x1] }
  0xa9   :  { %6621 = vmatprep.mubr.bf16.mxu0 %v5630_v5  ;;  %v6783_v5 = vld [vmem:[%s9298_s2 + $0x28] sm:$0xff]   ;;  %9315 = vst [vmem:[#allocation11_spill] sm:$0xff] %v9314_v18  ;;  %v2401_v55 = vsel %vm7796_vm7, 0, %v2400_v53 }
  0xaa   :  { %2194 = vmatmul.mubr.bf16.gmra.mxu1 %v5621_v35  ;;  %v6792_v7 = vld [vmem:[%s9298_s2 + $0xe8] sm:$0xff]   ;;  %2402 = vst [vmem:[#allocation2 + $0xc] sm:$0x1] %v2401_v55 }
  0xab   :  { %6290 = vmatpush3.bf16.msra.mxu1 %v6783_v5  ;;  %v2374_v53 = vld [vmem:[#allocation2 + $0x68] sm:$0x1] }
  0xac   :  { %6291 = vmatprep.subr.bf16.mxu1 %v6784_v29  ;;  %v6798_v29 = vld [vmem:[%s9298_s2 + $0xd8] sm:$0xff]  }
  0xaf   :  { %6292 = vmatpush3.bf16.msra.mxu1 %v6785_v37 }
  0xb0   :  { %6622 = vmatmul.mubr.bf16.vlgmr.msra.gmra.mxu0 %v5631_v11  ;;  %v2344_v11 = vld [vmem:[#allocation2 + $0x18] sm:$0x1] }
  0xb1   :  { %6625 = vmatprep.mubr.bf16.mxu0 %v5632_v30  ;;  %6350 = vmatpush3.bf16.msra.mxu0 %v6787_v16  ;;  %v2345_v30 = vsel %vm7786_vm5, 0, %v2344_v11  ;;  %v2421_v16 = vld [vmem:[#allocation2 + $0x44] sm:$0x1]  ;;  %v6791_v11 = vld [vmem:[%s9298_s2 + $0x18] sm:$0xff]  }
  0xb2   :  { %2346 = vst [vmem:[#allocation2 + $0x18] sm:$0x1] %v2345_v30  ;;  %6351 = vmatprep.subr.bf16.mxu0 %v6788_v4  ;;  %v2422_v23 = vsel %vm7796_vm7, 0, %v2421_v16  ;;  %v2415_v30 = vld [vmem:[#allocation2 + $0x34] sm:$0x1] }
  0xb3   :  { %2423 = vst [vmem:[#allocation2 + $0x44] sm:$0x1] %v2422_v23  ;;  %v2448_v23 = vld [vmem:[#allocation2 + $0x8c] sm:$0x1] }
  0xb5   :  { %6352 = vmatpush3.bf16.msra.mxu0 %v6790_v51 }
  0xb6   :  { %6353 = vmatprep.subr.bf16.mxu0 %v6792_v7  ;;  %v2436_v7 = vld [vmem:[#allocation2 + $0x6c] sm:$0x1] }
  0xb8   :  { %6626 = vmatmul.mubr.bf16.gmra.mxu0 %v5633_v61 }
  0xb9   :  { %6629 = vmatprep.mubr.bf16.mxu0 %v5634_v34  ;;  %v2338_v34 = vld [vmem:[#allocation2 + $0x8] sm:$0x1] }
  0xba   :  { %v2339_v9 = vsel %vm7786_vm5, 0, %v2338_v34 }
  0xbb   :  { %2340 = vst [vmem:[#allocation2 + $0x8] sm:$0x1] %v2339_v9  ;;  %v6800_v9 = vld [vmem:[%s9298_s2 + $0xd0] sm:$0xff]  }
  0xc0   :  { %6630 = vmatmul.mubr.bf16.gmra.mxu0 %v5635_v40  ;;  %v6793_v40 = vld [vmem:[%s9298_s2 + $0xa8] sm:$0xff]  }
  0xc1   :  { %6633 = vmatprep.mubr.bf16.mxu0 %v5636_v58  ;;  %6354 = vmatpush3.bf16.msra.mxu0 %v6793_v40  ;;  %v2375_v40 = vsel %vm7786_vm5, 0, %v2374_v53  ;;  %v2442_v53 = vld [vmem:[#allocation2 + $0x7c] sm:$0x1] }
  0xc2   :  { %2376 = vst [vmem:[#allocation2 + $0x68] sm:$0x1] %v2375_v40  ;;  %v2389_v40 = vld [vmem:[#allocation2 + $0x90] sm:$0x1] }
  0xc8   :  { %6634 = vmatmul.mubr.bf16.gmra.mxu0 %v5637_v44  ;;  %v2409_v44 = vld [vmem:[#allocation2 + $0x24] sm:$0x1] }
  0xf0   :  { %v6029_v62 = vpop.f32.mrf.mxu0 }
  0xf2   :  { %v6030_v42 = vpop.f32.mrf.mxu0  ;;  %v6093_v20 = vpop.f32.mrf.mxu1 }
  0xf3   :  { %v6031_v56 = vadd.f32 %v6030_v42, %v6029_v62  ;;  %v2348_v62 = vsel %vm7786_vm5, 0, %v2347_v6  ;;  %v2410_v42 = vsel %vm7796_vm7, 0, %v2409_v44  ;;  %v6802_v44 = vld [vmem:[%s9298_s2 + $0x90] sm:$0xff]  }
  0xf4   :  { %v6032_v3 = vpop.f32.mrf.mxu0  ;;  %v6094_v27 = vpop.f32.mrf.mxu1  ;;  %2349 = vst [vmem:[#allocation2 + $0x20] sm:$0x1] %v2348_v62  ;;  %2411 = vst [vmem:[#allocation2 + $0x24] sm:$0x1] %v2410_v42  ;;  %v2430_v42 = vld [vmem:[#allocation2 + $0x5c] sm:$0x1] }
  0xf5   :  { %v6095_v26 = vadd.f32 %v6094_v27, %v6093_v20  ;;  %v6796_v27 = vld [vmem:[%s9298_s2 + $0xa0] sm:$0xff]  }
  0xf6   :  { %v6033_v60 = vpop.f32.mrf.mxu0  ;;  %v6096_v35 = vpop.f32.mrf.mxu1 }
  0xf7   :  { %v7768_v28 = vadd.f32 %v6095_v26, %v6031_v56  ;;  %v6034_v25 = vadd.f32 %v6033_v60, %v6032_v3  ;;  %v2341_v56 = vld [vmem:[#allocation2 + $0x10] sm:$0x1]  ;;  %v2403_v3 = vld [vmem:[#allocation2 + $0x14] sm:$0x1] }
  0xf8   :  { %v6035_v17 = vpop.f32.mrf.mxu0  ;;  %v6097_v1 = vpop.f32.mrf.mxu1  ;;  %v2342_v39 = vsel %vm7786_vm5, 0, %v2341_v56  ;;  %v2404_v5 = vsel %vm7796_vm7, 0, %v2403_v3  ;;  %v6938_v56 = vmov 0  }
  0xf9   :  { %v6098_v24 = vadd.f32 %v6097_v1, %v6096_v35  ;;  %2343 = vst [vmem:[#allocation2 + $0x10] sm:$0x1] %v2342_v39  ;;  %2405 = vst [vmem:[#allocation2 + $0x14] sm:$0x1] %v2404_v5  ;;  %v2356_v35 = vld [vmem:[#allocation2 + $0x38] sm:$0x1] }
  0xfa   :  { %v6036_v50 = vpop.f32.mrf.mxu0  ;;  %v6099_v12 = vpop.f32.mrf.mxu1  ;;  %2323 = vst [vmem:[#allocation2] sm:$0xf] %v6938_v56  ;;  %2324 = vst [vmem:[#allocation2 + $0x4] sm:$0x1] %v6938_v56  ;;  %v2431_v39 = vsel %vm7796_vm7, 0, %v2430_v42 }
  0xfb   :  { %v6037_v49 = vadd.f32 %v6036_v50, %v6035_v17  ;;  %v7776_v19 = vadd.f32 %v6098_v24, %v6034_v25  ;;  %v6794_v17 = vld [vmem:[%s9298_s2 + $0xe0] sm:$0xff]   ;;  %v2350_v24 = vld [vmem:[#allocation2 + $0x28] sm:$0x1]  ;;  %2325 = vst [vmem:[#allocation2 + $0x50] sm:$0xf] %v6938_v56 }
  0xfc   :  { %v6038_v8 = vpop.f32.mrf.mxu0  ;;  %v6100_v10 = vpop.f32.mrf.mxu1  ;;  %6355 = vmatprep.subr.bf16.mxu0 %v6794_v17  ;;  %v2351_v48 = vsel %vm7786_vm5, 0, %v2350_v24  ;;  %2326 = vst [vmem:[#allocation2 + $0x54] sm:$0x1] %v6938_v56  ;;  %2328 = vst [vmem:[#allocation2 + $0x48] sm:$0xf] %v6938_v56 }
  0xfd   :  { %v6101_v57 = vadd.f32 %v6100_v10, %v6099_v12  ;;  %6356 = vmatpush3.bf16.msra.mxu0 %v6796_v27  ;;  %2352 = vst [vmem:[#allocation2 + $0x28] sm:$0x1] %v2351_v48  ;;  %2329 = vst [vmem:[#allocation2 + $0x4c] sm:$0x1] %v6938_v56  ;;  %v2377_v27 = vld [vmem:[#allocation2 + $0x70] sm:$0x1] }
  0xfe   :  { %v6039_v33 = vpop.f32.mrf.mxu0  ;;  %v6102_v14 = vpop.f32.mrf.mxu1  ;;  %6357 = vmatprep.subr.bf16.mxu0 %v6798_v29  ;;  %2330 = vst [vmem:[#allocation2 + $0x98] sm:$0xf] %v6938_v56  ;;  %2331 = vst [vmem:[#allocation2 + $0x9c] sm:$0x1] %v6938_v56  ;;  %v2433_v29 = vld [vmem:[#allocation2 + $0x64] sm:$0x1] }
  0xff   :  { %v7784_v41 = vadd.f32 %v6101_v57, %v6037_v49  ;;  %v6040_v46 = vadd.f32 %v6039_v33, %v6038_v8  ;;  %v2418_v49 = vld [vmem:[#allocation2 + $0x3c] sm:$0x1]  ;;  %v2357_v8 = vsel %vm7786_vm5, 0, %v2356_v35  ;;  %v2412_v33 = vld [vmem:[#allocation2 + $0x2c] sm:$0x1]  ;;  %v2434_v16 = vsel %vm7796_vm7, 0, %v2433_v29 }
 0x100   :  { %v6041_v31 = vpop.f32.mrf.mxu0  ;;  %v6103_v36 = vpop.f32.mrf.mxu1  ;;  %v2419_v1 = vsel %vm7796_vm7, 0, %v2418_v49  ;;  %2358 = vst [vmem:[#allocation2 + $0x38] sm:$0x1] %v2357_v8  ;;  %v2413_v10 = vsel %vm7796_vm7, 0, %v2412_v33  ;;  %v6799_v57 = vld [vmem:[%s9298_s2 + $0x98] sm:$0xff]   ;;  %v2378_v49 = vsel %vm7786_vm5, 0, %v2377_v27 }
 0x101   :  { %v6104_v43 = vadd.f32 %v6103_v36, %v6102_v14  ;;  %2420 = vst [vmem:[#allocation2 + $0x3c] sm:$0x1] %v2419_v1  ;;  %2414 = vst [vmem:[#allocation2 + $0x2c] sm:$0x1] %v2413_v10  ;;  %6358 = vmatpush3.bf16.msra.mxu0 %v6799_v57  ;;  %v2371_v33 = vld [vmem:[#allocation2 + $0x60] sm:$0x1] }
 0x102   :  { %v6042_v13 = vpop.f32.mrf.mxu0  ;;  %v6105_v0 = vpop.f32.mrf.mxu1  ;;  %6359 = vmatprep.subr.bf16.mxu0 %v6800_v9  ;;  %2432 = vst [vmem:[#allocation2 + $0x5c] sm:$0x1] %v2431_v39  ;;  %2379 = vst [vmem:[#allocation2 + $0x70] sm:$0x1] %v2378_v49  ;;  %v6801_v10 = vld [vmem:[%s9298_s2 + $0x48] sm:$0xff]   ;;  %v6806_v57 = vld [vmem:[%s9298_s2 + $0xc0] sm:$0xff]  }
 0x103   :  { %v6043_v59 = vadd.f32 %v6042_v13, %v6041_v31  ;;  %v7805_v22 = vadd.f32 %v6104_v43, %v6040_v46  ;;  %v2359_v13 = vld [vmem:[#allocation2 + $0x40] sm:$0x1]  ;;  %2435 = vst [vmem:[#allocation2 + $0x64] sm:$0x1] %v2434_v16  ;;  %v2445_v42 = vld [vmem:[#allocation2 + $0x84] sm:$0x1] }
 0x104   :  { %v6044_v32 = vpop.f32.mrf.mxu0  ;;  %v6106_v58 = vpop.f32.mrf.mxu1  ;;  %v2360_v46 = vsel %vm7786_vm5, 0, %v2359_v13  ;;  %v2372_v13 = vsel %vm7786_vm5, 0, %v2371_v33  ;;  %v6807_v9 = vld [vmem:[%s9298_s2 + $0x40] sm:$0xff]  }
 0x105   :  { %v6107_v21 = vadd.f32 %v6106_v58, %v6105_v0  ;;  %2361 = vst [vmem:[#allocation2 + $0x40] sm:$0x1] %v2360_v46  ;;  %v2416_v0 = vsel %vm7796_vm7, 0, %v2415_v30  ;;  %v2437_v58 = vsel %vm7796_vm7, 0, %v2436_v7  ;;  %6360 = vmatpush3.bf16.msra.mxu0 %v6802_v44  ;;  %2373 = vst [vmem:[#allocation2 + $0x60] sm:$0x1] %v2372_v13 }
 0x106   :  { %v6045_v15 = vpop.f32.mrf.mxu0  ;;  %v6108_v2 = vpop.f32.mrf.mxu1  ;;  %2417 = vst [vmem:[#allocation2 + $0x34] sm:$0x1] %v2416_v0  ;;  %2438 = vst [vmem:[#allocation2 + $0x6c] sm:$0x1] %v2437_v58  ;;  %v2449_v30 = vsel %vm7796_vm7, 0, %v2448_v23  ;;  %v2443_v7 = vsel %vm7796_vm7, 0, %v2442_v53 }
 0x107   :  { %v7821_v60 = vadd.f32 %v6107_v21, %v6043_v59  ;;  %v6046_v20 = vadd.f32 %v6045_v15, %v6044_v32  ;;  %v6789_v32 = vld [vmem:[%s9298_s2 + $0x58] sm:$0xff]   ;;  %v2353_v15 = vld [vmem:[#allocation2 + $0x30] sm:$0x1]  ;;  %2450 = vst [vmem:[#allocation2 + $0x8c] sm:$0x1] %v2449_v30 }
 0x108   :  { %v6047_v61 = vpop.f32.mrf.mxu0  ;;  %v6109_v26 = vpop.f32.mrf.mxu1  ;;  %6293 = vmatprep.subr.bf16.mxu1 %v6789_v32  ;;  %v2354_v54 = vsel %vm7786_vm5, 0, %v2353_v15  ;;  %v6803_v32 = vld [vmem:[%s9298_s2 + $0x8] sm:$0xff]   ;;  %2444 = vst [vmem:[#allocation2 + $0x7c] sm:$0x1] %v2443_v7  ;;  %v2451_v58 = vld [vmem:[#allocation2 + $0x94] sm:$0x1] }
 0x109   :  { %v6110_v25 = vadd.f32 %v6109_v26, %v6108_v2  ;;  %6294 = vmatpush3.bf16.msra.mxu1 %v6791_v11  ;;  %2355 = vst [vmem:[#allocation2 + $0x30] sm:$0x1] %v2354_v54  ;;  %v6797_v2 = vld [vmem:[%s9298_s2 + $0x10] sm:$0xff]   ;;  %v2386_v11 = vld [vmem:[#allocation2 + $0x88] sm:$0x1] }
 0x10a   :  { %v6048_v45 = vpop.f32.mrf.mxu0  ;;  %v6111_v12 = vpop.f32.mrf.mxu1  ;;  %v2439_v26 = vld [vmem:[#allocation2 + $0x74] sm:$0x1]  ;;  %v2387_v46 = vsel %vm7786_vm5, 0, %v2386_v11  ;;  %v2380_v54 = vld [vmem:[#allocation2 + $0x78] sm:$0x1] }
 0x10b   :  { %v6049_v52 = vadd.f32 %v6048_v45, %v6047_v61  ;;  %v7840_v37 = vadd.f32 %v6110_v25, %v6046_v20  ;;  %v2440_v25 = vsel %vm7796_vm7, 0, %v2439_v26  ;;  %2388 = vst [vmem:[#allocation2 + $0x88] sm:$0x1] %v2387_v46 }
 0x10c   :  { %v6050_v47 = vpop.f32.mrf.mxu0  ;;  %v6112_v59 = vpop.f32.mrf.mxu1  ;;  %2441 = vst [vmem:[#allocation2 + $0x74] sm:$0x1] %v2440_v25 }
 0x10d   :  { %v6113_v4 = vadd.f32 %v6112_v59, %v6111_v12  ;;  %v6805_v12 = vld [vmem:[%s9298_s2 + $0x88] sm:$0xff]  }
 0x10e   :  { %v6051_v50 = vpop.f32.mrf.mxu0  ;;  %v6114_v51 = vpop.f32.mrf.mxu1 }
 0x10f   :  { %v7863_v61 = vadd.f32 %v6113_v4, %v6049_v52  ;;  %v6052_v34 = vadd.f32 %v6051_v50, %v6050_v47  ;;  %v6795_v52 = vld [vmem:[%s9298_s2 + $0x50] sm:$0xff]   ;;  %v2368_v47 = vld [vmem:[#allocation2 + $0x58] sm:$0x1]  ;;  %v6804_v50 = vld [vmem:[%s9298_s2 + $0xc8] sm:$0xff]  }
 0x110   :  { %v6053_v31 = vpop.f32.mrf.mxu0  ;;  %v6115_v55 = vpop.f32.mrf.mxu1  ;;  %6295 = vmatprep.subr.bf16.mxu1 %v6795_v52  ;;  %v2369_v20 = vsel %vm7786_vm5, 0, %v2368_v47  ;;  %6361 = vmatprep.subr.bf16.mxu0 %v6804_v50  ;;  %v6808_v4 = vld [vmem:[%s9298_s2 + $0x80] sm:$0xff]   ;;  %v2452_v52 = vsel %vm7796_vm7, 0, %v2451_v58 }
 0x111   :  { %v6116_v45 = vadd.f32 %v6115_v55, %v6114_v51  ;;  %6296 = vmatpush3.bf16.msra.mxu1 %v6797_v2  ;;  %2370 = vst [vmem:[#allocation2 + $0x58] sm:$0x1] %v2369_v20  ;;  %6362 = vmatpush3.bf16.msra.mxu0 %v6805_v12  ;;  %2453 = vst [vmem:[#allocation2 + $0x94] sm:$0x1] %v2452_v52  ;;  %v2383_v47 = vld [vmem:[#allocation2 + $0x80] sm:$0x1] }
 0x112   :  { %v6054_v14 = vpop.f32.mrf.mxu0  ;;  %v6117_v21 = vpop.f32.mrf.mxu1  ;;  %6297 = vmatprep.subr.bf16.mxu1 %v6801_v10  ;;  %6363 = vmatprep.subr.bf16.mxu0 %v6806_v57  ;;  %v2384_v39 = vsel %vm7786_vm5, 0, %v2383_v47  ;;  %v2427_v52 = vld [vmem:[#allocation2 + $0x54] sm:$0x1] }
 0x113   :  { %v6055_v36 = vadd.f32 %v6054_v14, %v6053_v31  ;;  %v7878_v62 = vadd.f32 %v6116_v45, %v6052_v34  ;;  %v2381_v34 = vsel %vm7786_vm5, 0, %v2380_v54  ;;  %v6809_v45 = vld [vmem:[%s9298_s2] sm:$0xff]   ;;  %2385 = vst [vmem:[#allocation2 + $0x80] sm:$0x1] %v2384_v39 }
 0x114   :  { %v6056_v43 = vpop.f32.mrf.mxu0  ;;  %v6118_v3 = vpop.f32.mrf.mxu1  ;;  %2382 = vst [vmem:[#allocation2 + $0x78] sm:$0x1] %v2381_v34 }
 0x115   :  { %v6119_v5 = vadd.f32 %v6118_v3, %v6117_v21  ;;  %6298 = vmatpush3.bf16.msra.mxu1 %v6803_v32  ;;  %6364 = vmatpush3.bf16.msra.mxu0 %v6808_v4  ;;  %v2390_v21 = vsel %vm7786_vm5, 0, %v2389_v40 }
 0x116   :  { %v6057_v6 = vpop.f32.mrf.mxu0  ;;  %v6120_v35 = vpop.f32.mrf.mxu1  ;;  %6299 = vmatprep.subr.bf16.mxu1 %v6807_v9  ;;  %2391 = vst [vmem:[#allocation2 + $0x90] sm:$0x1] %v2390_v21  ;;  %v2365_v21 = vld [vmem:[#allocation2 + $0x50] sm:$0x1] }
 0x117   :  { %v7894_v8 = vadd.f32 %v6119_v5, %v6055_v36  ;;  %v6058_v1 = vadd.f32 %v6057_v6, %v6056_v43  ;;  %v2397_v36 = vld [vmem:[#allocation2 + $0x4] sm:$0x1]  ;;  %v2446_v5 = vsel %vm7796_vm7, 0, %v2445_v42  ;;  %v2366_v47 = vsel %vm7786_vm5, 0, %v2365_v21 }
 0x118   :  { %v6059_v17 = vpop.f32.mrf.mxu0  ;;  %v6121_v31 = vpop.f32.mrf.mxu1  ;;  %v2398_v51 = vsel %vm7796_vm7, 0, %v2397_v36  ;;  %2447 = vst [vmem:[#allocation2 + $0x84] sm:$0x1] %v2446_v5  ;;  %v2428_v42 = vsel %vm7796_vm7, 0, %v2427_v52  ;;  %2367 = vst [vmem:[#allocation2 + $0x50] sm:$0x1] %v2366_v47 }
 0x119   :  { %9316 = vst [vmem:[#allocation12_spill] sm:$0xff] %v7894_v8  ;;  %v6122_v59 = vadd.f32 %v6121_v31, %v6120_v35  ;;  %2399 = vst [vmem:[#allocation2 + $0x4] sm:$0x1] %v2398_v51  ;;  %6300 = vmatpush3.bf16.msra.mxu1 %v6809_v45  ;;  %v2335_v35 = vld [vmem:[#allocation2] sm:$0x1]  ;;  %v6813_v51 = vld [vmem:[%s9298_s2 + $0x178] sm:$0xff]  }
 0x11a   :  { %v6060_v24 = vpop.f32.mrf.mxu0  ;;  %v6123_v0 = vpop.f32.mrf.mxu1  ;;  %v2336_v49 = vsel %vm7786_vm5, 0, %v2335_v35  ;;  %6413 = vmatprep.subr.bf16.mxu1 %v6813_v51  ;;  %2429 = vst [vmem:[#allocation2 + $0x54] sm:$0x1] %v2428_v42  ;;  %v8051_v8 = vld [vmem:[#allocation2] sm:$0xe] }
 0x11b   :  { %v6061_v48 = vadd.f32 %v6060_v24, %v6059_v17  ;;  %v7917_v15 = vadd.f32 %v6122_v59, %v6058_v1  ;;  %2337 = vst [vmem:[#allocation2] sm:$0x1] %v2336_v49 }
 0x11c   :  { %v6062_v14 = vpop.f32.mrf.mxu0  ;;  %v6124_v55 = vpop.f32.mrf.mxu1 }
 0x11d   :  { %9317 = vst [vmem:[#allocation13_spill] sm:$0xff] %v7917_v15  ;;  %v6125_v6 = vadd.f32 %v6124_v55, %v6123_v0 }
 0x11e   :  { %v6063_v43 = vpop.f32.mrf.mxu0  ;;  %v6126_v2 = vpop.f32.mrf.mxu1 }
 0x11f   :  { %v7937_v56 = vadd.f32 %v6125_v6, %v6061_v48  ;;  %v6064_v3 = vadd.f32 %v6063_v43, %v6062_v14 }
 0x120   :  { %v6065_v44 = vpop.f32.mrf.mxu0  ;;  %v6127_v17 = vpop.f32.mrf.mxu1 }
 0x121   :  { %9318 = vst [vmem:[#allocation14_spill] sm:$0xff] %v7937_v56  ;;  %v6128_v26 = vadd.f32 %v6127_v17, %v6126_v2 }
 0x122   :  { %v6066_v20 = vpop.f32.mrf.mxu0  ;;  %v6129_v1 = vpop.f32.mrf.mxu1 }
 0x123   :  { %v6067_v27 = vadd.f32 %v6066_v20, %v6065_v44  ;;  %v7945_v25 = vadd.f32 %v6128_v26, %v6064_v3 }
 0x124   :  { %v6068_v50 = vpop.f32.mrf.mxu0  ;;  %v6130_v33 = vpop.f32.mrf.mxu1 }
 0x125   :  { %9319 = vst [vmem:[#allocation15_spill] sm:$0xff] %v7945_v25  ;;  %v6131_v29 = vadd.f32 %v6130_v33, %v6129_v1 }
 0x126   :  { %v6069_v24 = vpop.f32.mrf.mxu0  ;;  %v6132_v12 = vpop.f32.mrf.mxu1 }
 0x127   :  { %v7947_v48 = vadd.f32 %v6131_v29, %v6067_v27  ;;  %v6070_v10 = vadd.f32 %v6069_v24, %v6068_v50 }
 0x128   :  { %v6071_v31 = vpop.f32.mrf.mxu0  ;;  %v6133_v13 = vpop.f32.mrf.mxu1 }
 0x129   :  { %9320 = vst [vmem:[#allocation16_spill] sm:$0xff] %v7947_v48  ;;  %v6134_v57 = vadd.f32 %v6133_v13, %v6132_v12 }
 0x12a   :  { %v6072_v16 = vpop.f32.mrf.mxu0  ;;  %v7955_v11 = vpop.f32.mrf.mxu1 }
 0x12b   :  { %v7949_v59 = vadd.f32 %v6072_v16, %v6071_v31  ;;  %v7951_v14 = vadd.f32 %v6134_v57, %v6070_v10  ;;  %v6827_v31 = vld [vmem:[%s9298_s2 + $0x1f8] sm:$0xff]  }
 0x12c   :  { %v7953_v32 = vpop.f32.mrf.mxu0  ;;  %v7959_v23 = vpop.f32.mrf.mxu1  ;;  %6477 = vmatprep.subr.bf16.mxu0 %v6827_v31 }
 0x12d   :  { %9321 = vst [vmem:[#allocation17_spill] sm:$0xff] %v7949_v59  ;;  %9322 = vst [vmem:[#allocation18_spill] sm:$0xff] %v7951_v14  ;;  %v8037_v14 = vld [vmem:[#allocation2] sm:$0xf] }
 0x12e   :  { %v7957_v46 = vpop.f32.mrf.mxu0  ;;  %v7961_v4 = vpop.f32.mrf.mxu1  ;;  %9334 = vst [vmem:[#allocation30_spill] sm:$0xff] %v8037_v14  ;;  %v2789_v15 = vshrl.u32 %v8037_v14, 16 }
 0x130   :  { %v7963_v36 = vpop.f32.mrf.mxu0  ;;  %v7965_v30 = vpop.f32.mrf.mxu1 }
 0x132   :  { %v7970_v43 = vpop.f32.mrf.mxu0  ;;  %v7972_v54 = vpop.f32.mrf.mxu1 }
 0x134   :  { %v7974_v0 = vpop.f32.mrf.mxu0  ;;  %v7976_v34 = vpop.f32.mrf.mxu1 }
 0x136   :  { %v6161_v53 = vpop.f32.mrf.mxu0  ;;  %v7978_v7 = vpop.f32.mrf.mxu1 }
 0x138   :  { %v7980_v9 = vpop.f32.mrf.mxu0  ;;  %v7982_v55 = vpop.f32.mrf.mxu1 }
 0x13a   :  { %v6164_v40 = vpop.f32.mrf.mxu0  ;;  %v7984_v58 = vpop.f32.mrf.mxu1 }
 0x13c   :  { %v6166_v45 = vpop.f32.mrf.mxu0  ;;  %v7986_v6 = vpop.f32.mrf.mxu1 }
 0x13e   :  { %v6167_v44 = vpop.f32.mrf.mxu0  ;;  %v7988_v2 = vpop.f32.mrf.mxu1 }
 0x140   :  { %v6169_v3 = vpop.f32.mrf.mxu0  ;;  %v7994_v20 = vpop.f32.mrf.mxu1 }
 0x142   :  { %v6170_v39 = vpop.f32.mrf.mxu0  ;;  %v7996_v5 = vpop.f32.mrf.mxu1 }
 0x144   :  { %v6172_v17 = vpop.f32.mrf.mxu0  ;;  %v7998_v27 = vpop.f32.mrf.mxu1 }
 0x146   :  { %v6173_v26 = vpop.f32.mrf.mxu0  ;;  %v8000_v50 = vpop.f32.mrf.mxu1 }
 0x147   :  { %v6174_v59 = vadd.f32 %v6173_v26, %v6172_v17 }
 0x148   :  { %v6175_v35 = vpop.f32.mrf.mxu0  ;;  %v8002_v49 = vpop.f32.mrf.mxu1 }
 0x14a   :  { %v6176_v1 = vpop.f32.mrf.mxu0  ;;  %v8004_v24 = vpop.f32.mrf.mxu1 }
 0x14c   :  { %v6178_v33 = vpop.f32.mrf.mxu0  ;;  %v8006_v29 = vpop.f32.mrf.mxu1 }
 0x14e   :  { %v6179_v12 = vpop.f32.mrf.mxu0  ;;  %v8011_v10 = vpop.f32.mrf.mxu1 }
 0x150   :  { %v8013_v13 = vpop.f32.mrf.mxu0  ;;  %v8015_v16 = vpop.f32.mrf.mxu1 }
 0x151   :  { %9323 = vst [vmem:[#allocation19_spill] sm:$0xff] %v8013_v13  ;;  %v6171_v13 = vadd.f32 %v6170_v39, %v6169_v3  ;;  %v6226_v3 = vadd.f32 %v7982_v55, %v7978_v7  ;;  %v6244_v55 = vadd.f32 %v8015_v16, %v8011_v10 }
 0x152   :  { %v8017_v57 = vpop.f32.mrf.mxu0  ;;  %v8019_v51 = vpop.f32.mrf.mxu1 }
 0x153   :  { %9324 = vst [vmem:[#allocation20_spill] sm:$0xff] %v8017_v57  ;;  %9325 = vst [vmem:[#allocation21_spill] sm:$0xff] %v8019_v51 }
 0x154   :  { %v8021_v21 = vpop.f32.mrf.mxu0  ;;  %v8023_v52 = vpop.f32.mrf.mxu1 }
 0x155   :  { %9326 = vst [vmem:[#allocation22_spill] sm:$0xff] %v8021_v21  ;;  %9327 = vst [vmem:[#allocation23_spill] sm:$0xff] %v8023_v52  ;;  %v2792_v52 = vshll.u32 %v8037_v14, 16  ;;  %v6159_v14 = vadd.f32 %v7970_v43, %v7963_v36  ;;  %v6168_v21 = vadd.f32 %v6167_v44, %v6166_v45 }
 0x156   :  { %v8025_v47 = vpop.f32.mrf.mxu0  ;;  %v8027_v42 = vpop.f32.mrf.mxu1 }
 0x157   :  { %9328 = vst [vmem:[#allocation24_spill] sm:$0xff] %v8025_v47  ;;  %9329 = vst [vmem:[#allocation25_spill] sm:$0xff] %v8027_v42  ;;  %v2043_v44 = vadd.f32 %v6159_v14, %v7768_v28  ;;  %v2059_v14 = vadd.f32 %v6171_v13, %v7821_v60 }
 0x158   :  { %v8029_v18 = vpop.f32.mrf.mxu0  ;;  %v8031_v63 = vpop.f32.mrf.mxu1 }
 0x159   :  { %9330 = vst [vmem:[#allocation26_spill] sm:$0xff] %v8029_v18  ;;  %9331 = vst [vmem:[#allocation27_spill] sm:$0xff] %v8031_v63  ;;  %v8055_v18 = vrot.slane %v2789_v15, 4 }
 0x15a   :  { %v8033_v38 = vpop.f32.mrf.mxu0  ;;  %v8035_v31 = vpop.f32.mrf.mxu1 }
 0x15b   :  { %9332 = vst [vmem:[#allocation28_spill] sm:$0xff] %v8033_v38  ;;  %9333 = vst [vmem:[#allocation29_spill] sm:$0xff] %v8035_v31  ;;  %v8053_v38 = vld [vmem:[#allocation2 + $0x4] sm:$0x1] }
 0x15c   :  { %v8039_v48 = vpop.f32.mrf.mxu0  ;;  %v8041_v25 = vpop.f32.mrf.mxu1  ;;  %v3065_v15 = vrot.slane %v8053_v38, 5 }
 0x15d   :  { %9335 = vst [vmem:[#allocation31_spill] sm:$0xff] %v8039_v48  ;;  %9336 = vst [vmem:[#allocation32_spill] sm:$0xff] %v8041_v25  ;;  %v8057_v48 = vrot.slane %v2792_v52, 5  ;;  %v2798_v52 = vshll.u32 %v8053_v38, 16 }
 0x15e   :  { %v6191_v56 = vpop.f32.mrf.mxu0  ;;  %v8045_v42 = vpop.f32.mrf.mxu1  ;;  %v9345_v26 = vld [vmem:[#allocation24_spill] sm:$0xff] }
 0x15f   :  { %9337 = vst [vmem:[#allocation33_spill] sm:$0xff] %v8045_v42  ;;  %v6162_v42 = vadd.f32 %v6161_v53, %v7974_v0  ;;  %v2795_v43 = vor.u32 %v8057_v48, %v8055_v18  ;;  %v6137_v0 = vadd.f32 %v7959_v23, %v7955_v11  ;;  %v6140_v53 = vadd.f32 %v7965_v30, %v7961_v4 }
 0x160   :  { %v8047_v51 = vpop.f32.mrf.mxu0  ;;  %v8049_v63 = vpop.f32.mrf.mxu1  ;;  %v6229_v23 = vadd.f32 %v7986_v6, %v7984_v58  ;;  %v2054_v4 = vadd.f32 %v6168_v21, %v7805_v22  ;;  %v6232_v30 = vadd.f32 %v7994_v20, %v7988_v2  ;;  %v6241_v22 = vadd.f32 %v8006_v29, %v8004_v24  ;;  %v8104_v58 = vld [vmem:[#allocation2 + $0x50] sm:$0xf]  ;;  %v9341_v6 = vld [vmem:[#allocation17_spill] sm:$0xff]  ;;  %v9343_v20 = vld [vmem:[#allocation20_spill] sm:$0xff] }
 0x161   :  { %9338 = vst [vmem:[#allocation34_spill] sm:$0xff] %v8047_v51  ;;  %9339 = vst [vmem:[#allocation35_spill] sm:$0xff] %v8049_v63  ;;  %v5726_v51 = vrot.slane %v8051_v8, 9  ;;  %v6165_v63 = vadd.f32 %v6164_v40, %v7980_v9  ;;  %v6177_v9 = vadd.f32 %v6176_v1, %v6175_v35  ;;  %v6180_v40 = vadd.f32 %v6179_v12, %v6178_v33  ;;  %v9346_v35 = vld [vmem:[#allocation26_spill] sm:$0xff] }
 0x162   :  { %v6194_v31 = vpop.f32.mrf.mxu0  ;;  %v8059_v25 = vpop.f32.mrf.mxu1  ;;  %v2002_v2 = vadd.f32 %v6137_v0, %v9341_v6  ;;  %v2151_v13 = vadd.f32 %v6232_v30, %v2054_v4  ;;  %v9353_v30 = vld [vmem:[#allocation13_spill] sm:$0xff]  ;;  %v9355_v6 = vld [vmem:[#allocation27_spill] sm:$0xff] }
 0x163   :  { %9340 = vst [vmem:[#allocation36_spill] sm:$0xff] %v8059_v25  ;;  %v6076_v25 = vadd.f32 %v7957_v46, %v7953_v32  ;;  %v6223_v32 = vadd.f32 %v7976_v34, %v7972_v54  ;;  %v2046_v46 = vadd.f32 %v6162_v42, %v7776_v19  ;;  %v2051_v11 = vadd.f32 %v6165_v63, %v7784_v41 }
 0x164   :  { %v6196_v47 = vpop.f32.mrf.mxu0  ;;  %v8066_v57 = vpop.f32.mrf.mxu1  ;;  %v6235_v19 = vadd.f32 %v7998_v27, %v7996_v5  ;;  %v2062_v54 = vadd.f32 %v6174_v59, %v7840_v37  ;;  %v6238_v34 = vadd.f32 %v8002_v49, %v8000_v50  ;;  %v2067_v41 = vadd.f32 %v6177_v9, %v7863_v61  ;;  %v9342_v59 = vld [vmem:[#allocation19_spill] sm:$0xff]  ;;  %v9344_v61 = vld [vmem:[#allocation22_spill] sm:$0xff]  ;;  %v9347_v49 = vld [vmem:[#allocation28_spill] sm:$0xff] }
 0x165   :  { %v2070_v7 = vadd.f32 %v6180_v40, %v7878_v62  ;;  %v2005_v37 = vadd.f32 %v6140_v53, %v6076_v25  ;;  %v6183_v5 = vadd.f32 %v9343_v20, %v9342_v59  ;;  %v2140_v27 = vadd.f32 %v6223_v32, %v2043_v44  ;;  %v9348_v29 = vld [vmem:[#allocation31_spill] sm:$0xff]  ;;  %v9350_v44 = vld [vmem:[#allocation12_spill] sm:$0xff]  ;;  %v9356_v59 = vld [vmem:[#allocation14_spill] sm:$0xff] }
 0x166   :  { %v6197_v36 = vpop.f32.mrf.mxu0  ;;  %v8078_v45 = vpop.f32.mrf.mxu1  ;;  %v6186_v50 = vadd.f32 %v9345_v26, %v9344_v61  ;;  %v6189_v62 = vadd.f32 %v9347_v49, %v9346_v35  ;;  %v2148_v24 = vadd.f32 %v6229_v23, %v2051_v11  ;;  %v2143_v33 = vadd.f32 %v6226_v3, %v2046_v46  ;;  %v9351_v46 = vld [vmem:[#allocation21_spill] sm:$0xff]  ;;  %v9352_v3 = vld [vmem:[#allocation23_spill] sm:$0xff] }
 0x167   :  { %v6192_v12 = vadd.f32 %v6191_v56, %v9348_v29  ;;  %v8114_v16 = vadd.f32 %v6235_v19, %v2059_v14  ;;  %v2901_v25 = vshrl.u32 %v8104_v58, 16  ;;  %v2164_v53 = vadd.f32 %v6241_v22, %v2067_v41  ;;  %v9354_v19 = vld [vmem:[#allocation25_spill] sm:$0xff] }
 0x168   :  { %v6199_v39 = vpop.f32.mrf.mxu0  ;;  %v6261_v28 = vpop.f32.mrf.mxu1  ;;  %v9349_v21 = vld [vmem:[#allocation34_spill] sm:$0xff]  ;;  %v8118_v9 = vadd.f32 %v6244_v55, %v2070_v7  ;;  %v8120_v40 = vadd.f32 %v6238_v34, %v2062_v54  ;;  %v2075_v32 = vadd.f32 %v6183_v5, %v9350_v44  ;;  %v6247_v56 = vadd.f32 %v9352_v3, %v9351_v46  ;;  %v9357_v22 = vld [vmem:[#allocation29_spill] sm:$0xff]  ;;  %v9358_v7 = vld [vmem:[#allocation32_spill] sm:$0xff] }
 0x169   :  { %v6195_v42 = vadd.f32 %v6194_v31, %v9349_v21  ;;  %v6198_v11 = vadd.f32 %v6197_v36, %v6196_v47  ;;  %v2078_v14 = vadd.f32 %v6186_v50, %v9353_v30  ;;  %v6250_v31 = vadd.f32 %v9355_v6, %v9354_v19  ;;  %v9359_v34 = vld [vmem:[#allocation15_spill] sm:$0xff]  ;;  %v9360_v5 = vld [vmem:[#allocation33_spill] sm:$0xff]  ;;  %v9362_v36 = vld [vmem:[#allocation16_spill] sm:$0xff] }
 0x16a   :  { %v6200_v63 = vpop.f32.mrf.mxu0  ;;  %v6263_v60 = vpop.f32.mrf.mxu1  ;;  %v2083_v20 = vadd.f32 %v6189_v62, %v9356_v59  ;;  %v6253_v54 = vadd.f32 %v9358_v7, %v9357_v22  ;;  %v2086_v55 = vadd.f32 %v6192_v12, %v9359_v34  ;;  %v9361_v61 = vld [vmem:[#allocation35_spill] sm:$0xff]  ;;  %v9364_v62 = vld [vmem:[#allocation18_spill] sm:$0xff]  ;;  %v6262_v44 = vadd.f32 %v6261_v28, %v8078_v45 }
 0x16b   :  { %v6201_v23 = vadd.f32 %v6200_v63, %v6199_v39  ;;  %v6256_v26 = vadd.f32 %v9361_v61, %v9360_v5  ;;  %v2091_v39 = vadd.f32 %v6195_v42, %v9362_v36  ;;  %v9363_v63 = vld [vmem:[#allocation36_spill] sm:$0xff] }
 0x16c   :  { %v6202_v17 = vpop.f32.mrf.mxu0  ;;  %v6264_v1 = vpop.f32.mrf.mxu1  ;;  %v6259_v50 = vadd.f32 %v8066_v57, %v9363_v63  ;;  %v8141_v59 = vadd.f32 %v6253_v54, %v2083_v20  ;;  %v8143_v57 = vadd.f32 %v6250_v31, %v2078_v14  ;;  %v2675_v14 = vld [vmem:[#allocation2 + $0x1c] sm:$0x1] }
 0x16d   :  { %v2099_v46 = vadd.f32 %v6201_v23, %v2002_v2  ;;  %v6265_v3 = vadd.f32 %v6264_v1, %v6263_v60  ;;  %v8145_v22 = vadd.f32 %v6256_v26, %v2086_v55  ;;  %v2672_v23 = vld [vmem:[#allocation2 + $0x18] sm:$0xf]  ;;  %v2660_v26 = vld [vmem:[#allocation2 + $0x8] sm:$0xf] }
 0x16e   :  { %v6203_v10 = vpop.f32.mrf.mxu0  ;;  %v6266_v0 = vpop.f32.mrf.mxu1  ;;  %v8149_v2 = vadd.f32 %v6259_v50, %v2091_v39 }
 0x16f   :  { %v6204_v35 = vadd.f32 %v6203_v10, %v6202_v17  ;;  %v8139_v17 = vadd.f32 %v6247_v56, %v2075_v32  ;;  %v8147_v60 = vadd.f32 %v6265_v3, %v2099_v46 }
 0x170   :  { %v6623_v4 = vpop.f32.mrf.mxu0  ;;  %v6267_v49 = vpop.f32.mrf.mxu1 }
 0x171   :  { %v2245_v41 = vadd.f32 %v6623_v4, %v2148_v24  ;;  %v2094_v24 = vadd.f32 %v6198_v11, %v9364_v62  ;;  %v2102_v10 = vadd.f32 %v6204_v35, %v2005_v37  ;;  %v6268_v42 = vadd.f32 %v6267_v49, %v6266_v0  ;;  %v2663_v35 = vld [vmem:[#allocation2 + $0xc] sm:$0x1] }
 0x172   :  { %v2236_v47 = vpop.f32.mrf.mxu0 }
 0x173   :  { %v2301_v29 = vmax.f32 %v2245_v41, 0.0  ;;  %v2237_v21 = vadd.f32 %v2236_v47, %v2140_v27  ;;  %v8151_v1 = vadd.f32 %v6262_v44, %v2094_v24  ;;  %v8159_v54 = vadd.f32 %v6268_v42, %v2102_v10 }
 0x174   :  { %v6624_v12 = vpop.f32.mrf.mxu0 }
 0x175   :  { %v5952_v4 = vpack.c.bf16 %v2301_v29, %v2301_v29  ;;  %v2299_v30 = vmax.f32 %v2237_v21, 0.0  ;;  %v2248_v19 = vadd.f32 %v6624_v12, %v2151_v13 }
 0x176   :  { %v2239_v6 = vpop.f32.mrf.mxu0 }
 0x177   :  { %v2514_v27 = vshrl.u32 %v5952_v4, 16  ;;  %v5950_v41 = vpack.c.bf16 %v2299_v30, %v2299_v30  ;;  %v2302_v11 = vmax.f32 %v2248_v19, 0.0  ;;  %v2240_v45 = vadd.f32 %v2239_v6, %v2143_v33  ;;  %v2678_v30 = vld [vmem:[#allocation2 + $0x20] sm:$0xf]  ;;  %v2681_v19 = vld [vmem:[#allocation2 + $0x24] sm:$0x1] }
 0x178   :  { %v6627_v28 = vpop.f32.mrf.mxu0  ;;  %v2517_v13 = vshll.u32 %v5952_v4, 16 }
 0x179   :  { %v2516_v37 = vrot.slane %v2514_v27, 7  ;;  %v2498_v0 = vshrl.u32 %v5950_v41, 16  ;;  %v5953_v32 = vpack.c.bf16 %v2302_v11, %v2302_v11  ;;  %v2501_v33 = vshll.u32 %v5950_v41, 16 }
 0x17a   :  { %v2300_v31 = vmax.f32 %v2240_v45, 0.0  ;;  %v2261_v20 = vadd.f32 %v6627_v28, %v2164_v53  ;;  %v2252_v7 = vpop.f32.mrf.mxu0  ;;  %v2666_v28 = vld [vmem:[#allocation2 + $0x10] sm:$0xf] }
 0x17b   :  { %v2519_v34 = vor.u32 %v2517_v13, %v2516_v37  ;;  %v2520_v55 = vrot.slane %v2516_v37, 4  ;;  %v2500_v5 = vrot.slane %v2498_v0, 7  ;;  %v2522_v61 = vshrl.u32 %v5953_v32, 16  ;;  %v2669_v37 = vld [vmem:[#allocation2 + $0x14] sm:$0x1] }
 0x17c   :  { %v2525_v47 = vshll.u32 %v5953_v32, 16  ;;  %v5951_v36 = vpack.c.bf16 %v2300_v31, %v2300_v31  ;;  %v2305_v39 = vmax.f32 %v2261_v20, 0.0  ;;  %v2253_v63 = vadd.f32 %v2252_v7, %v8114_v16  ;;  %v6628_v50 = vpop.f32.mrf.mxu0 }
 0x17d   :  { %v2673_v49 = vsel %vm8155_vm9, %v2519_v34, %v2672_v23  ;;  %v2676_v53 = vsel %vm7786_vm5, %v2520_v55, %v2675_v14  ;;  %v2503_v21 = vor.u32 %v2501_v33, %v2500_v5  ;;  %v2504_v62 = vrot.slane %v2500_v5, 4 }
 0x17e   :  { %2674 = vst [vmem:[#allocation2 + $0x18] sm:$0xf] %v2673_v49  ;;  %2677 = vst [vmem:[#allocation2 + $0x1c] sm:$0x1] %v2676_v53  ;;  %v2524_v24 = vrot.slane %v2522_v61, 7  ;;  %v2506_v44 = vshrl.u32 %v5951_v36, 16  ;;  %v5956_v3 = vpack.c.bf16 %v2305_v39, %v2305_v39  ;;  %v2255_v12 = vpop.f32.mrf.mxu0  ;;  %v2264_v42 = vadd.f32 %v6628_v50, %v8118_v9 }
 0x17f   :  { %v2509_v46 = vshll.u32 %v5951_v36, 16  ;;  %v2661_v4 = vsel %vm8155_vm9, %v2503_v21, %v2660_v26  ;;  %v2664_v16 = vsel %vm7786_vm5, %v2504_v62, %v2663_v35  ;;  %v2303_v10 = vmax.f32 %v2253_v63, 0.0  ;;  %v2696_v26 = vld [vmem:[#allocation2 + $0x38] sm:$0xf]  ;;  %v2699_v35 = vld [vmem:[#allocation2 + $0x3c] sm:$0x1] }
 0x180   :  { %2662 = vst [vmem:[#allocation2 + $0x8] sm:$0xf] %v2661_v4  ;;  %2665 = vst [vmem:[#allocation2 + $0xc] sm:$0x1] %v2664_v16  ;;  %v2527_v6 = vor.u32 %v2525_v47, %v2524_v24  ;;  %v2528_v27 = vrot.slane %v2524_v24, 4  ;;  %v2508_v41 = vrot.slane %v2506_v44, 7  ;;  %v6631_v45 = vpop.f32.mrf.mxu0  ;;  %v2256_v23 = vadd.f32 %v2255_v12, %v8120_v40 }
 0x181   :  { %v2546_v11 = vshrl.u32 %v5956_v3, 16  ;;  %v2549_v13 = vshll.u32 %v5956_v3, 16  ;;  %v5954_v0 = vpack.c.bf16 %v2303_v10, %v2303_v10  ;;  %v2306_v32 = vmax.f32 %v2264_v42, 0.0  ;;  %v2684_v21 = vld [vmem:[#allocation2 + $0x28] sm:$0xf] }
 0x182   :  { %v2679_v14 = vsel %vm8155_vm9, %v2527_v6, %v2678_v30  ;;  %v2682_v9 = vsel %vm7786_vm5, %v2528_v27, %v2681_v19  ;;  %v2511_v33 = vor.u32 %v2509_v46, %v2508_v41  ;;  %v2512_v31 = vrot.slane %v2508_v41, 4  ;;  %v2268_v20 = vpop.f32.mrf.mxu0  ;;  %v2687_v62 = vld [vmem:[#allocation2 + $0x2c] sm:$0x1] }
 0x183   :  { %2680 = vst [vmem:[#allocation2 + $0x20] sm:$0xf] %v2679_v14  ;;  %2683 = vst [vmem:[#allocation2 + $0x24] sm:$0x1] %v2682_v9  ;;  %v2548_v7 = vrot.slane %v2546_v11, 7  ;;  %v2530_v34 = vshrl.u32 %v5954_v0, 16  ;;  %v5957_v5 = vpack.c.bf16 %v2306_v32, %v2306_v32  ;;  %v2277_v36 = vadd.f32 %v6631_v45, %v8141_v59 }
 0x184   :  { %v2533_v55 = vshll.u32 %v5954_v0, 16  ;;  %v2667_v61 = vsel %vm8155_vm9, %v2511_v33, %v2666_v28  ;;  %v2670_v40 = vsel %vm7786_vm5, %v2512_v31, %v2669_v37  ;;  %v2304_v47 = vmax.f32 %v2256_v23, 0.0  ;;  %v6632_v39 = vpop.f32.mrf.mxu0  ;;  %v2702_v11 = vld [vmem:[#allocation2 + $0x40] sm:$0xf]  ;;  %v2705_v45 = vld [vmem:[#allocation2 + $0x44] sm:$0x1] }
 0x185   :  { %2668 = vst [vmem:[#allocation2 + $0x10] sm:$0xf] %v2667_v61  ;;  %2671 = vst [vmem:[#allocation2 + $0x14] sm:$0x1] %v2670_v40  ;;  %v2551_v63 = vor.u32 %v2549_v13, %v2548_v7  ;;  %v2552_v50 = vrot.slane %v2548_v7, 4  ;;  %v2532_v49 = vrot.slane %v2530_v34, 7  ;;  %v2269_v3 = vadd.f32 %v2268_v20, %v8139_v17 }
 0x186   :  { %v2554_v53 = vshrl.u32 %v5957_v5, 16  ;;  %v2557_v24 = vshll.u32 %v5957_v5, 16  ;;  %v5955_v44 = vpack.c.bf16 %v2304_v47, %v2304_v47  ;;  %v2309_v46 = vmax.f32 %v2277_v36, 0.0  ;;  %v2271_v12 = vpop.f32.mrf.mxu0  ;;  %v2690_v9 = vld [vmem:[#allocation2 + $0x30] sm:$0xf] }
 0x187   :  { %v2697_v4 = vsel %vm8155_vm9, %v2551_v63, %v2696_v26  ;;  %v2700_v59 = vsel %vm7786_vm5, %v2552_v50, %v2699_v35  ;;  %v2535_v16 = vor.u32 %v2533_v55, %v2532_v49  ;;  %v2536_v30 = vrot.slane %v2532_v49, 4  ;;  %v2693_v33 = vld [vmem:[#allocation2 + $0x34] sm:$0x1]  ;;  %v2723_v63 = vld [vmem:[#allocation2 + $0x6c] sm:$0x1] }
 0x188   :  { %2698 = vst [vmem:[#allocation2 + $0x38] sm:$0xf] %v2697_v4  ;;  %2701 = vst [vmem:[#allocation2 + $0x3c] sm:$0x1] %v2700_v59  ;;  %v2556_v19 = vrot.slane %v2554_v53, 7  ;;  %v2538_v10 = vshrl.u32 %v5955_v44, 16  ;;  %v5960_v6 = vpack.c.bf16 %v2309_v46, %v2309_v46  ;;  %v6635_v27 = vpop.f32.mrf.mxu0  ;;  %v2280_v37 = vadd.f32 %v6632_v39, %v8145_v22 }
 0x189   :  { %v2541_v42 = vshll.u32 %v5955_v44, 16  ;;  %v2685_v41 = vsel %vm8155_vm9, %v2535_v16, %v2684_v21  ;;  %v2688_v17 = vsel %vm7786_vm5, %v2536_v30, %v2687_v62  ;;  %v2307_v28 = vmax.f32 %v2269_v3, 0.0  ;;  %v2720_v39 = vld [vmem:[#allocation2 + $0x68] sm:$0xf]  ;;  %v2708_v46 = vld [vmem:[#allocation2 + $0x58] sm:$0xf] }
 0x18a   :  { %2686 = vst [vmem:[#allocation2 + $0x28] sm:$0xf] %v2685_v41  ;;  %2689 = vst [vmem:[#allocation2 + $0x2c] sm:$0x1] %v2688_v17  ;;  %v2559_v13 = vor.u32 %v2557_v24, %v2556_v19  ;;  %v2560_v0 = vrot.slane %v2556_v19, 4  ;;  %v2540_v32 = vrot.slane %v2538_v10, 7  ;;  %v2284_v14 = vpop.f32.mrf.mxu0  ;;  %v2272_v34 = vadd.f32 %v2271_v12, %v8143_v57 }
 0x18b   :  { %v2578_v23 = vshrl.u32 %v5960_v6, 16  ;;  %v2581_v31 = vshll.u32 %v5960_v6, 16  ;;  %v5958_v20 = vpack.c.bf16 %v2307_v28, %v2307_v28  ;;  %v2310_v7 = vmax.f32 %v2280_v37, 0.0  ;;  %v2711_v3 = vld [vmem:[#allocation2 + $0x5c] sm:$0x1] }
 0x18c   :  { %v2703_v55 = vsel %vm8155_vm9, %v2559_v13, %v2702_v11  ;;  %v2706_v22 = vsel %vm7786_vm5, %v2560_v0, %v2705_v45  ;;  %v2543_v5 = vor.u32 %v2541_v42, %v2540_v32  ;;  %v2544_v61 = vrot.slane %v2540_v32, 4  ;;  %v6636_v53 = vpop.f32.mrf.mxu0  ;;  %v2726_v45 = vld [vmem:[#allocation2 + $0x70] sm:$0xf]  ;;  %v2729_v28 = vld [vmem:[#allocation2 + $0x74] sm:$0x1] }
 0x18d   :  { %2704 = vst [vmem:[#allocation2 + $0x40] sm:$0xf] %v2703_v55  ;;  %2707 = vst [vmem:[#allocation2 + $0x44] sm:$0x1] %v2706_v22  ;;  %v2580_v40 = vrot.slane %v2578_v23, 7  ;;  %v2562_v26 = vshrl.u32 %v5958_v20, 16  ;;  %v5961_v47 = vpack.c.bf16 %v2310_v7, %v2310_v7  ;;  %v2293_v49 = vadd.f32 %v6635_v27, %v8147_v60 }
 0x18e   :  { %v2565_v35 = vshll.u32 %v5958_v20, 16  ;;  %v2691_v36 = vsel %vm8155_vm9, %v2543_v5, %v2690_v9  ;;  %v2694_v57 = vsel %vm7786_vm5, %v2544_v61, %v2693_v33  ;;  %v2308_v50 = vmax.f32 %v2272_v34, 0.0  ;;  %v2287_v17 = vpop.f32.mrf.mxu0  ;;  %v2714_v9 = vld [vmem:[#allocation2 + $0x60] sm:$0xf]  ;;  %v2717_v33 = vld [vmem:[#allocation2 + $0x64] sm:$0x1] }
 0x18f   :  { %2692 = vst [vmem:[#allocation2 + $0x30] sm:$0xf] %v2691_v36  ;;  %2695 = vst [vmem:[#allocation2 + $0x34] sm:$0x1] %v2694_v57  ;;  %v2583_v21 = vor.u32 %v2581_v31, %v2580_v40  ;;  %v2584_v62 = vrot.slane %v2580_v40, 4  ;;  %v2564_v24 = vrot.slane %v2562_v26, 7  ;;  %v2285_v16 = vadd.f32 %v2284_v14, %v8149_v2 }
 0x190   :  { %v2586_v44 = vshrl.u32 %v5961_v47, 16  ;;  %v2589_v12 = vshll.u32 %v5961_v47, 16  ;;  %v5959_v4 = vpack.c.bf16 %v2308_v50, %v2308_v50  ;;  %v2313_v59 = vmax.f32 %v2293_v49, 0.0  ;;  %v2744_v36 = vld [vmem:[#allocation2 + $0x88] sm:$0xf] }
 0x191   :  { %v2721_v30 = vsel %vm8155_vm9, %v2583_v21, %v2720_v39  ;;  %v2724_v60 = vsel %vm7786_vm5, %v2584_v62, %v2723_v63  ;;  %v2567_v19 = vor.u32 %v2565_v35, %v2564_v24  ;;  %v2568_v10 = vrot.slane %v2564_v24, 4  ;;  %v2747_v57 = vld [vmem:[#allocation2 + $0x8c] sm:$0x1]  ;;  %v2732_v21 = vld [vmem:[#allocation2 + $0x78] sm:$0xf] }
 0x192   :  { %2722 = vst [vmem:[#allocation2 + $0x68] sm:$0xf] %v2721_v30  ;;  %2725 = vst [vmem:[#allocation2 + $0x6c] sm:$0x1] %v2724_v60  ;;  %v2588_v42 = vrot.slane %v2586_v44, 7  ;;  %v2570_v6 = vshrl.u32 %v5959_v4, 16  ;;  %v5964_v41 = vpack.c.bf16 %v2313_v59, %v2313_v59  ;;  %v2296_v13 = vadd.f32 %v6636_v53, %v8159_v54 }
 0x193   :  { %v2573_v27 = vshll.u32 %v5959_v4, 16  ;;  %v2709_v11 = vsel %vm8155_vm9, %v2567_v19, %v2708_v46  ;;  %v2712_v2 = vsel %vm7786_vm5, %v2568_v10, %v2711_v3  ;;  %v2311_v37 = vmax.f32 %v2285_v16, 0.0  ;;  %v2735_v24 = vld [vmem:[#allocation2 + $0x7c] sm:$0x1]  ;;  %v8221_v46 = vld [vmem:[#allocation2 + $0x54] sm:$0x1] }
 0x194   :  { %2710 = vst [vmem:[#allocation2 + $0x58] sm:$0xf] %v2709_v11  ;;  %2713 = vst [vmem:[#allocation2 + $0x5c] sm:$0x1] %v2712_v2  ;;  %v2591_v0 = vor.u32 %v2589_v12, %v2588_v42  ;;  %v2592_v32 = vrot.slane %v2588_v42, 4  ;;  %v2572_v23 = vrot.slane %v2570_v6, 7  ;;  %v2288_v7 = vadd.f32 %v2287_v17, %v8151_v1 }
 0x195   :  { %v2610_v14 = vshrl.u32 %v5964_v41, 16  ;;  %v5962_v31 = vpack.c.bf16 %v2311_v37, %v2311_v37  ;;  %v2314_v20 = vmax.f32 %v2296_v13, 0.0  ;;  %v2904_v34 = vshll.u32 %v8104_v58, 16  ;;  %v2750_v60 = vld [vmem:[#allocation2 + $0x90] sm:$0xf] }
 0x196   :  { %v2727_v55 = vsel %vm8155_vm9, %v2591_v0, %v2726_v45  ;;  %v2730_v54 = vsel %vm7786_vm5, %v2592_v32, %v2729_v28  ;;  %v2575_v22 = vor.u32 %v2573_v27, %v2572_v23  ;;  %v2576_v5 = vrot.slane %v2572_v23, 4  ;;  %v3127_v19 = vld [vmem:[#allocation2 + $0x8] sm:$0xf]  ;;  %v2753_v11 = vld [vmem:[#allocation2 + $0x94] sm:$0x1] }
 0x197   :  { %2728 = vst [vmem:[#allocation2 + $0x70] sm:$0xf] %v2727_v55  ;;  %2731 = vst [vmem:[#allocation2 + $0x74] sm:$0x1] %v2730_v54  ;;  %v2612_v61 = vrot.slane %v2610_v14, 7  ;;  %v2613_v40 = vshll.u32 %v5964_v41, 16  ;;  %v5965_v35 = vpack.c.bf16 %v2314_v20, %v2314_v20  ;;  %v3066_v54 = vsel %vm8256_vm12, %v5726_v51, %v3065_v15 }
 0x198   :  { %v2594_v26 = vshrl.u32 %v5962_v31, 16  ;;  %v2715_v1 = vsel %vm8155_vm9, %v2575_v22, %v2714_v9  ;;  %v2718_v47 = vsel %vm7786_vm5, %v2576_v5, %v2717_v33  ;;  %v2597_v39 = vshll.u32 %v5962_v31, 16  ;;  %v3013_v10 = vld [vmem:[#allocation2 + $0x8] sm:$0xe]  ;;  %v8229_v41 = vld [vmem:[#allocation2 + $0x10] sm:$0xf] }
 0x199   :  { %v2312_v63 = vmax.f32 %v2288_v7, 0.0  ;;  %2716 = vst [vmem:[#allocation2 + $0x60] sm:$0xf] %v2715_v1  ;;  %2719 = vst [vmem:[#allocation2 + $0x64] sm:$0x1] %v2718_v47  ;;  %v2615_v50 = vor.u32 %v2613_v40, %v2612_v61  ;;  %v2616_v49 = vrot.slane %v2612_v61, 4  ;;  %v5814_v33 = vcombine.low %v3127_v19, %v8229_v41 }
 0x19a   :  { %v2596_v53 = vrot.slane %v2594_v26, 7  ;;  %v2618_v62 = vshrl.u32 %v5965_v35, 16  ;;  %v2903_v3 = vrot.slane %v2901_v25, 4  ;;  %v2906_v12 = vrot.slane %v2904_v34, 5  ;;  %v8245_v28 = vld [vmem:[#allocation2 + $0x50] sm:$0xe] }
 0x19b   :  { %v5963_v44 = vpack.c.bf16 %v2312_v63, %v2312_v63  ;;  %v2745_v4 = vsel %vm8155_vm9, %v2615_v50, %v2744_v36  ;;  %v2748_v59 = vsel %vm7786_vm5, %v2616_v49, %v2747_v57  ;;  %v2621_v6 = vshll.u32 %v5965_v35, 16  ;;  %v8247_v32 = vld [vmem:[#allocation2 + $0xc] sm:$0x1]  ;;  %v2738_v23 = vld [vmem:[#allocation2 + $0x80] sm:$0xf]  ;;  %5033 = vmatprep.mubr.bf16.mxu0 %v5814_v33  ;;  %v6829_v47 = vld [vmem:[%s9298_s2 + $0x1b8] sm:$0xff]  }
 0x19c   :  { %v2599_v16 = vor.u32 %v2597_v39, %v2596_v53  ;;  %v2600_v30 = vrot.slane %v2596_v53, 4  ;;  %2746 = vst [vmem:[#allocation2 + $0x88] sm:$0xf] %v2745_v4  ;;  %2749 = vst [vmem:[#allocation2 + $0x8c] sm:$0x1] %v2748_v59  ;;  %v2620_v42 = vrot.slane %v2618_v62, 7  ;;  %v2907_v48 = vor.u32 %v2906_v12, %v2903_v3 }
 0x19d   :  { %v2602_v27 = vshrl.u32 %v5963_v44, 16  ;;  %v8233_v58 = vrot.slane %v2798_v52, 5  ;;  %v8242_v2 = vrot.slane %v2795_v43, 4  ;;  %v2910_v45 = vshll.u32 %v8221_v46, 16  ;;  %v2741_v14 = vld [vmem:[#allocation2 + $0x84] sm:$0x1] }
 0x19e   :  { %v2733_v25 = vsel %vm8155_vm9, %v2599_v16, %v2732_v21  ;;  %v2736_v17 = vsel %vm7786_vm5, %v2600_v30, %v2735_v24  ;;  %v2623_v52 = vor.u32 %v2621_v6, %v2620_v42  ;;  %v2624_v37 = vrot.slane %v2620_v42, 4  ;;  %v8272_v26 = vld [vmem:[#allocation2 + $0x20] sm:$0xf]  ;;  %v8274_v35 = vld [vmem:[#allocation2 + $0x8] sm:$0xf]  ;;  %v6830_v53 = vld [vmem:[%s9298_s2 + $0x1f0] sm:$0xff]  }
 0x19f   :  { %2734 = vst [vmem:[#allocation2 + $0x78] sm:$0xf] %v2733_v25  ;;  %2737 = vst [vmem:[#allocation2 + $0x7c] sm:$0x1] %v2736_v17  ;;  %v2604_v13 = vrot.slane %v2602_v27, 7  ;;  %v2605_v0 = vshll.u32 %v5963_v44, 16  ;;  %v2801_v63 = vsel %vm6989_vm2, %v8242_v2, %v8233_v58 }
 0x1a0   :  { %v3160_v9 = vshrl.u32 %v3127_v19, 16  ;;  %v5727_v18 = vrot.slane %v3013_v10, 9  ;;  %v2751_v43 = vsel %vm8155_vm9, %v2623_v52, %v2750_v60  ;;  %v2754_v31 = vsel %vm7786_vm5, %v2624_v37, %v2753_v11  ;;  %v8281_v15 = vld [vmem:[#allocation2 + $0x18] sm:$0xf]  ;;  %v8283_v56 = vld [vmem:[#allocation2 + $0x10] sm:$0xf] }
 0x1a1   :  { %v2607_v20 = vor.u32 %v2605_v0, %v2604_v13  ;;  %v2608_v7 = vrot.slane %v2604_v13, 4  ;;  %2752 = vst [vmem:[#allocation2 + $0x90] sm:$0xf] %v2751_v43  ;;  %2755 = vst [vmem:[#allocation2 + $0x94] sm:$0x1] %v2754_v31  ;;  %v3163_v55 = vshll.u32 %v3127_v19, 16  ;;  %v5815_v62 = vcombine.low %v8281_v15, %v8272_v26 }
 0x1a2   :  { %v3069_v22 = vrot.slane %v8247_v32, 5  ;;  %v5734_v5 = vrot.slane %v8245_v28, 9  ;;  %v8276_v38 = vrot.slane %v2910_v45, 5  ;;  %v3097_v8 = vrot.slane %v8221_v46, 5  ;;  %v8296_v50 = vld [vmem:[#allocation2 + $0x18] sm:$0xf] }
 0x1a3   :  { %v2739_v61 = vsel %vm8155_vm9, %v2607_v20, %v2738_v23  ;;  %v2742_v40 = vsel %vm7786_vm5, %v2608_v7, %v2741_v14  ;;  %v8285_v1 = vrot.slane %v2907_v48, 4  ;;  %v8290_v36 = vrot.slane %v3160_v9, 4  ;;  %v2775_v49 = vld [vmem:[#allocation2 + $0x1c] sm:$0x1]  ;;  %v2774_v3 = vld [vmem:[#allocation2 + $0x14] sm:$0x1] }
 0x1a4   :  { %2740 = vst [vmem:[#allocation2 + $0x80] sm:$0xf] %v2739_v61  ;;  %2743 = vst [vmem:[#allocation2 + $0x84] sm:$0x1] %v2742_v40  ;;  %v3070_v51 = vsel %vm8256_vm12, %v5727_v18, %v3069_v22  ;;  %v8301_v21 = vrot.slane %v3163_v55, 5  ;;  %v2803_v24 = vshrl.u32 %v8274_v35, 16 }
 0x1a5   :  { %v5806_v57 = vcombine.low %v3066_v54, %v3070_v51  ;;  %v2806_v44 = vshll.u32 %v8274_v35, 16  ;;  %v6833_v12 = vld [vmem:[%s9298_s2 + $0x1b0] sm:$0xff]   ;;  %v3174_v4 = vshrl.u32 %v8229_v41, 16  ;;  %v3177_v59 = vshll.u32 %v8229_v41, 16  ;;  %v3015_v27 = vld [vmem:[#allocation2 + $0x18] sm:$0xe] }
 0x1a6   :  { %v2817_v16 = vshrl.u32 %v8283_v56, 16  ;;  %v2820_v30 = vshll.u32 %v8283_v56, 16  ;;  %v3014_v60 = vld [vmem:[#allocation2 + $0x10] sm:$0xe]  ;;  %v2805_v19 = vrot.slane %v2803_v24, 4  ;;  %v2812_v42 = vshll.u32 %v8247_v32, 16 }
 0x1a7   :  { %5034 = vmatmul.mubr.bf16.vlgmr.msra.gmra.mxu0 %v5806_v57  ;;  %v2808_v10 = vrot.slane %v2806_v44, 5  ;;  %v2831_v6 = vshrl.u32 %v8296_v50, 16  ;;  %v2826_v17 = vshll.u32 %v2774_v3, 16  ;;  %v2834_v41 = vshll.u32 %v8296_v50, 16  ;;  %v6835_v11 = vld [vmem:[%s9298_s2 + $0x1e8] sm:$0xff]   ;;  %v6814_v61 = vld [vmem:[%s9298_s2 + $0x138] sm:$0xff]  }
 0x1a8   :  { %5041 = vmatprep.mubr.bf16.mxu0 %v5815_v62  ;;  %6478 = vmatpush3.bf16.msra.mxu0 %v6829_v47  ;;  %v2819_v58 = vrot.slane %v2817_v16, 4  ;;  %v2822_v25 = vrot.slane %v2820_v30, 5  ;;  %v2840_v52 = vshll.u32 %v2775_v49, 16  ;;  %v5728_v37 = vrot.slane %v3014_v60, 9  ;;  %v6837_v48 = vld [vmem:[%s9298_s2 + $0x1a8] sm:$0xff]   ;;  %v6843_v60 = vld [vmem:[%s9298_s2 + $0x1d8] sm:$0xff]  }
 0x1a9   :  { %6479 = vmatprep.subr.bf16.mxu0 %v6830_v53  ;;  %v2809_v2 = vor.u32 %v2808_v10, %v2805_v19  ;;  %v2833_v45 = vrot.slane %v2831_v6, 4  ;;  %v2836_v0 = vrot.slane %v2834_v41, 5  ;;  %v3073_v32 = vrot.slane %v2774_v3, 5  ;;  %v8327_v55 = vld [vmem:[#allocation2 + $0x30] sm:$0xf]  ;;  %v6838_v3 = vld [vmem:[%s9298_s2 + $0x1e0] sm:$0xff]  }
 0x1aa   :  { %v2823_v13 = vor.u32 %v2822_v25, %v2819_v58  ;;  %v5729_v23 = vrot.slane %v3015_v27, 9  ;;  %v8320_v14 = vrot.slane %v3174_v4, 4  ;;  %v2814_v33 = vrot.slane %v2812_v42, 5  ;;  %v8336_v47 = vld [vmem:[#allocation2 + $0x20] sm:$0xf] }
 0x1ab   :  { %v2810_v9 = vrot.slane %v2809_v2, 4  ;;  %v3077_v18 = vrot.slane %v2775_v49, 5  ;;  %v2828_v31 = vrot.slane %v2826_v17, 5  ;;  %v2837_v20 = vor.u32 %v2836_v0, %v2833_v45  ;;  %v8340_v24 = vld [vmem:[#allocation2 + $0x28] sm:$0xf]  ;;  %v6818_v2 = vld [vmem:[%s9298_s2 + $0x130] sm:$0xff]  }
 0x1ac   :  { %6480 = vmatpush3.bf16.msra.mxu0 %v6833_v12  ;;  %v2824_v43 = vrot.slane %v2823_v13, 4  ;;  %v3074_v7 = vsel %vm8256_vm12, %v5728_v37, %v3073_v32  ;;  %v3179_v54 = vrot.slane %v3177_v59, 5  ;;  %v2842_v40 = vrot.slane %v2840_v52, 5  ;;  %v8342_v44 = vld [vmem:[#allocation2 + $0x28] sm:$0xf] }
 0x1ad   :  { %6481 = vmatprep.subr.bf16.mxu0 %v6835_v11  ;;  %v2815_v22 = vsel %vm6989_vm2, %v2810_v9, %v2814_v33  ;;  %v3078_v51 = vsel %vm8256_vm12, %v5729_v23, %v3077_v18  ;;  %v2838_v53 = vrot.slane %v2837_v20, 4  ;;  %v9371_v12 = vld [vmem:[#allocation30_spill] sm:$0xff]  ;;  %v5816_v59 = vcombine.low %v8340_v24, %v8327_v55  ;;  %v2776_v28 = vld [vmem:[#allocation2 + $0x24] sm:$0x1]  ;;  %v3016_v10 = vld [vmem:[#allocation2 + $0x20] sm:$0xe] }
 0x1ae   :  { %v5798_v57 = vcombine.low %v2801_v63, %v2815_v22  ;;  %v2829_v49 = vsel %vm6989_vm2, %v2824_v43, %v2828_v31  ;;  %v5807_v62 = vcombine.low %v3074_v7, %v3078_v51  ;;  %v5790_v4 = vcombine.low %v9371_v12, %v8274_v35  ;;  %v6817_v63 = vld [vmem:[%s9298_s2 + $0x170] sm:$0xff]   ;;  %v6841_v35 = vld [vmem:[%s9298_s2 + $0x1a0] sm:$0xff]   ;;  %v2777_v58 = vld [vmem:[#allocation2 + $0x2c] sm:$0x1] }
 0x1af   :  { %v2913_v16 = vsel %vm6989_vm2, %v8285_v1, %v8276_v38  ;;  %v8364_v30 = vsel %vm8256_vm12, %v5734_v5, %v3097_v8  ;;  %v3166_v19 = vor.u32 %v8301_v21, %v8290_v36  ;;  %v2843_v46 = vsel %vm6989_vm2, %v2838_v53, %v2842_v40  ;;  %v3017_v21 = vld [vmem:[#allocation2 + $0x28] sm:$0xe]  ;;  %v6845_v9 = vld [vmem:[%s9298_s2 + $0x198] sm:$0xff]   ;;  %v6846_v33 = vld [vmem:[%s9298_s2 + $0x1d0] sm:$0xff]  }
 0x1b0   :  { %6482 = vmatpush3.bf16.msra.mxu0 %v6837_v48  ;;  %4936 = vmatprep.mubr.bf16.mxu1 %v5798_v57  ;;  %v2845_v5 = vshrl.u32 %v8336_v47, 16  ;;  %v2848_v8 = vshll.u32 %v8336_v47, 16  ;;  %v3180_v42 = vor.u32 %v3179_v54, %v8320_v14  ;;  %v3188_v6 = vshrl.u32 %v8281_v15, 16  ;;  %v8400_v20 = vld [vmem:[#allocation2 + $0x40] sm:$0xf]  ;;  %v6822_v57 = vld [vmem:[%s9298_s2 + $0x128] sm:$0xff]  }
 0x1b1   :  { %5042 = vmatmul.mubr.bf16.gmra.mxu0 %v5807_v62  ;;  %4937 = vmatmul.mubr.bf16.vlgmr.msra.gmra.mxu1 %v5790_v4  ;;  %v5799_v27 = vcombine.low %v2829_v49, %v2843_v46  ;;  %v2859_v36 = vshrl.u32 %v8342_v44, 16  ;;  %v3191_v25 = vshll.u32 %v8281_v15, 16  ;;  %v2862_v11 = vshll.u32 %v8342_v44, 16  ;;  %v6821_v15 = vld [vmem:[%s9298_s2 + $0x168] sm:$0xff]   ;;  %v8405_v40 = vld [vmem:[#allocation2 + $0x38] sm:$0xf] }
 0x1b2   :  { %5049 = vmatprep.mubr.bf16.mxu0 %v5816_v59  ;;  %6414 = vmatpush3.bf16.msra.mxu1 %v6814_v61  ;;  %v2847_v17 = vrot.slane %v2845_v5, 4  ;;  %v2850_v41 = vrot.slane %v2848_v8, 5  ;;  %v2854_v45 = vshll.u32 %v2776_v28, 16  ;;  %v5730_v37 = vrot.slane %v3016_v10, 9  ;;  %v8407_v51 = vld [vmem:[#allocation2 + $0x30] sm:$0xf] }
 0x1b3   :  { %6483 = vmatprep.subr.bf16.mxu0 %v6838_v3  ;;  %4944 = vmatprep.mubr.bf16.mxu1 %v5799_v27  ;;  %v2861_v52 = vrot.slane %v2859_v36, 4  ;;  %v3081_v13 = vrot.slane %v2776_v28, 5  ;;  %v2864_v32 = vrot.slane %v2862_v11, 5  ;;  %v2868_v23 = vshll.u32 %v2777_v58, 16  ;;  %v8420_v3 = vld [vmem:[#allocation2 + $0x38] sm:$0xf] }
 0x1b4   :  { %6415 = vmatprep.subr.bf16.mxu1 %v6817_v63  ;;  %v2851_v0 = vor.u32 %v2850_v41, %v2847_v17  ;;  %v5731_v14 = vrot.slane %v3017_v21, 9  ;;  %6484 = vmatpush3.bf16.msra.mxu0 %v6841_v35  ;;  %v8395_v18 = vrot.slane %v3166_v19, 4  ;;  %v8397_v48 = vrot.slane %v3180_v42, 4  ;;  %v8422_v12 = vld [vmem:[#allocation2 + $0x3c] sm:$0x1]  ;;  %v6825_v4 = vld [vmem:[%s9298_s2 + $0x160] sm:$0xff]  }
 0x1b5   :  { %v3202_v43 = vshrl.u32 %v8272_v26, 16  ;;  %v3085_v31 = vrot.slane %v2777_v58, 5  ;;  %6485 = vmatprep.subr.bf16.mxu0 %v6843_v60  ;;  %v8402_v7 = vrot.slane %v3188_v6, 4  ;;  %v3205_v54 = vshll.u32 %v8272_v26, 16  ;;  %v3018_v8 = vld [vmem:[#allocation2 + $0x30] sm:$0xe] }
 0x1b6   :  { %v2852_v22 = vrot.slane %v2851_v0, 4  ;;  %v2865_v61 = vor.u32 %v2864_v32, %v2861_v52  ;;  %6416 = vmatpush3.bf16.msra.mxu1 %v6818_v2  ;;  %v8412_v49 = vrot.slane %v3191_v25, 5  ;;  %v5791_v53 = vcombine.low %v8283_v56, %v8296_v50  ;;  %v2778_v56 = vld [vmem:[#allocation2 + $0x34] sm:$0x1]  ;;  %v6851_v10 = vld [vmem:[%s9298_s2 + $0x1c8] sm:$0xff]   ;;  %v6826_v21 = vld [vmem:[%s9298_s2 + $0x120] sm:$0xff]  }
 0x1b7   :  { %v3082_v62 = vsel %vm8256_vm12, %v5730_v37, %v3081_v13  ;;  %v3086_v26 = vsel %vm8256_vm12, %v5731_v14, %v3085_v31  ;;  %6417 = vmatprep.subr.bf16.mxu1 %v6821_v15  ;;  %v2856_v59 = vrot.slane %v2854_v45, 5  ;;  %v2870_v35 = vrot.slane %v2868_v23, 5  ;;  %v6849_v50 = vld [vmem:[%s9298_s2 + $0x190] sm:$0xff]   ;;  %v3019_v36 = vld [vmem:[#allocation2 + $0x38] sm:$0xe]  ;;  %v6852_v15 = vld [vmem:[%s9298_s2 + $0x188] sm:$0xff]  }
 0x1b8   :  { %v2866_v63 = vrot.slane %v2865_v61, 4  ;;  %v5808_v60 = vcombine.low %v3082_v62, %v3086_v26  ;;  %6486 = vmatpush3.bf16.msra.mxu0 %v6845_v9  ;;  %v8430_v19 = vrot.slane %v3202_v43, 4  ;;  %v5817_v46 = vcombine.low %v8405_v40, %v8400_v20  ;;  %v6832_v2 = vld [vmem:[%s9298_s2 + $0x158] sm:$0xff]   ;;  %v6854_v9 = vld [vmem:[%s9298_s2 + $0x1c0] sm:$0xff]   ;;  %v6840_v61 = vld [vmem:[%s9298_s2 + $0x150] sm:$0xff]  }
 0x1b9   :  { %4945 = vmatmul.mubr.bf16.gmra.mxu1 %v5791_v53  ;;  %v2873_v28 = vshrl.u32 %v8407_v51, 16  ;;  %v2876_v5 = vshll.u32 %v8407_v51, 16  ;;  %6487 = vmatprep.subr.bf16.mxu0 %v6846_v33  ;;  %v2857_v42 = vsel %vm6989_vm2, %v2852_v22, %v2856_v59  ;;  %v2887_v27 = vshrl.u32 %v8420_v3, 16  ;;  %v8571_v1 = vld [vmem:[#allocation2 + $0x80] sm:$0xf] }
 0x1ba   :  { %v2871_v6 = vsel %vm6989_vm2, %v2866_v63, %v2870_v35  ;;  %5050 = vmatmul.mubr.bf16.gmra.mxu0 %v5808_v60  ;;  %v2890_v58 = vshll.u32 %v8420_v3, 16  ;;  %6418 = vmatpush3.bf16.msra.mxu1 %v6822_v57  ;;  %v2882_v11 = vshll.u32 %v2778_v56, 16  ;;  %v2896_v37 = vshll.u32 %v8422_v12, 16  ;;  %v6857_v57 = vld [vmem:[%s9298_s2 + $0x180] sm:$0xff]   ;;  %v6885_v39 = vld [vmem:[%s9296_s0 + $0x108] ss:$8 sps:$4 sm:$0xff]  }
 0x1bb   :  { %v5800_v25 = vcombine.low %v2857_v42, %v2871_v6  ;;  %5057 = vmatprep.mubr.bf16.mxu0 %v5817_v46  ;;  %v2875_v17 = vrot.slane %v2873_v28, 4  ;;  %v2878_v41 = vrot.slane %v2876_v5, 5  ;;  %6419 = vmatprep.subr.bf16.mxu1 %v6825_v4  ;;  %v2889_v45 = vrot.slane %v2887_v27, 4  ;;  %v8478_v4 = vld [vmem:[#allocation2 + $0x60] sm:$0xf]  ;;  %v6842_v27 = vld [vmem:[%s9298_s2 + $0x110] sm:$0xff]  }
 0x1bc   :  { %v2892_v52 = vrot.slane %v2890_v58, 5  ;;  %v5732_v13 = vrot.slane %v3018_v8, 9  ;;  %6488 = vmatpush3.bf16.msra.mxu0 %v6849_v50  ;;  %v8455_v0 = vrot.slane %v3205_v54, 5  ;;  %v3089_v23 = vrot.slane %v2778_v56, 5  ;;  %v6834_v54 = vld [vmem:[%s9298_s2 + $0x118] sm:$0xff]  }
 0x1bd   :  { %4952 = vmatprep.mubr.bf16.mxu1 %v5800_v25  ;;  %v2879_v32 = vor.u32 %v2878_v41, %v2875_v17  ;;  %v5733_v14 = vrot.slane %v3019_v36, 9  ;;  %6489 = vmatprep.subr.bf16.mxu0 %v6851_v10  ;;  %v3216_v33 = vshrl.u32 %v8340_v24, 16  ;;  %v3219_v43 = vshll.u32 %v8340_v24, 16  ;;  %v8483_v56 = vld [vmem:[#allocation2 + $0x58] sm:$0xf]  ;;  %v6848_v25 = vld [vmem:[%s9298_s2 + $0x148] sm:$0xff]  }
 0x1be   :  { %v2893_v31 = vor.u32 %v2892_v52, %v2889_v45  ;;  %v3093_v22 = vrot.slane %v8422_v12, 5  ;;  %6420 = vmatpush3.bf16.msra.mxu1 %v6826_v21  ;;  %v5792_v53 = vcombine.low %v8336_v47, %v8342_v44  ;;  %v2884_v62 = vrot.slane %v2882_v11, 5  ;;  %v8476_v12 = vld [vmem:[#allocation2 + $0x58] sm:$0xf]  ;;  %v2781_v5 = vld [vmem:[#allocation2 + $0x5c] sm:$0x1] }
 0x1bf   :  { %v2880_v24 = vrot.slane %v2879_v32, 4  ;;  %v3090_v26 = vsel %vm8256_vm12, %v5732_v13, %v3089_v23  ;;  %6421 = vmatprep.subr.bf16.mxu1 %v6832_v2  ;;  %v3230_v59 = vshrl.u32 %v8327_v55, 16  ;;  %v2898_v35 = vrot.slane %v2896_v37, 5  ;;  %v8488_v47 = vld [vmem:[%s9298_s2 + $0x278] sm:$0xff]   ;;  %v6850_v13 = vld [vmem:[%s9298_s2 + $0x108] sm:$0xff]  }
 0x1c0   :  { %v2894_v63 = vrot.slane %v2893_v31, 4  ;;  %v3094_v60 = vsel %vm8256_vm12, %v5733_v14, %v3093_v22  ;;  %6490 = vmatpush3.bf16.msra.mxu0 %v6852_v15  ;;  %v3233_v44 = vshll.u32 %v8327_v55, 16  ;;  %v3244_v50 = vshrl.u32 %v8405_v40, 16  ;;  %v3021_v8 = vld [vmem:[#allocation2 + $0x58] sm:$0xe] }
 0x1c1   :  { %4953 = vmatmul.mubr.bf16.gmra.mxu1 %v5792_v53  ;;  %v2885_v46 = vsel %vm6989_vm2, %v2880_v24, %v2884_v62  ;;  %v5809_v28 = vcombine.low %v3090_v26, %v3094_v60  ;;  %6491 = vmatprep.subr.bf16.mxu0 %v6854_v9  ;;  %v3247_v10 = vshll.u32 %v8405_v40, 16  ;;  %v3258_v42 = vshrl.u32 %v8400_v20, 16  ;;  %v8527_v9 = vld [vmem:[#allocation2 + $0x60] sm:$0xf]  ;;  %v8542_v53 = vld [vmem:[#allocation2 + $0x68] sm:$0xf] }
 0x1c2   :  { %v2899_v6 = vsel %vm6989_vm2, %v2894_v63, %v2898_v35  ;;  %v5818_v55 = vcombine.low %v8476_v12, %v8478_v4  ;;  %6422 = vmatpush3.bf16.msra.mxu1 %v6834_v54  ;;  %v3261_v58 = vshll.u32 %v8400_v20, 16  ;;  %v2915_v21 = vshrl.u32 %v8483_v56, 16  ;;  %v2782_v63 = vld [vmem:[#allocation2 + $0x64] sm:$0x1] }
 0x1c3   :  { %v5801_v36 = vcombine.low %v2885_v46, %v2899_v6  ;;  %5058 = vmatmul.mubr.bf16.gmra.mxu0 %v5809_v28  ;;  %v2918_v40 = vshll.u32 %v8483_v56, 16  ;;  %6423 = vmatprep.subr.bf16.mxu1 %v6840_v61  ;;  %v8509_v17 = vrot.slane %v3216_v33, 4  ;;  %v2924_v41 = vshll.u32 %v2781_v5, 16  ;;  %v6856_v33 = vld [vmem:[%s9298_s2 + $0x140] sm:$0xff]   ;;  %v8538_v61 = vld [vmem:[#allocation2 + $0x68] sm:$0xf] }
 0x1c4   :  { %5065 = vmatprep.mubr.bf16.mxu0 %v5818_v55  ;;  %v5735_v11 = vrot.slane %v3021_v8, 9  ;;  %v3101_v2 = vrot.slane %v2781_v5, 5  ;;  %6492 = vmatpush3.bf16.msra.mxu0 %v6857_v57  ;;  %v8511_v45 = vrot.slane %v3219_v43, 5  ;;  %v8513_v20 = vrot.slane %v3230_v59, 4  ;;  %v8540_v57 = vld [vmem:[#allocation2 + $0x70] sm:$0xf] }
 0x1c5   :  { %4960 = vmatprep.mubr.bf16.mxu1 %v5801_v36  ;;  %v2917_v52 = vrot.slane %v2915_v21, 4  ;;  %v2920_v37 = vrot.slane %v2918_v40, 5  ;;  %6541 = vmatprep.subr.bf16.mxu0 %v8488_v47  ;;  %v8519_v15 = vrot.slane %v3233_v44, 5  ;;  %v8521_v32 = vrot.slane %v3244_v50, 4  ;;  %v3023_v5 = vld [vmem:[#allocation2 + $0x68] sm:$0xe] }
 0x1c6   :  { %v8523_v23 = vrot.slane %v3247_v10, 5  ;;  %v3102_v14 = vsel %vm8256_vm12, %v5735_v11, %v3101_v2  ;;  %6424 = vmatpush3.bf16.msra.mxu1 %v6842_v27  ;;  %v8532_v43 = vrot.slane %v3258_v42, 4  ;;  %v8534_v31 = vrot.slane %v3261_v58, 5  ;;  %v3022_v6 = vld [vmem:[#allocation2 + $0x60] sm:$0xe] }
 0x1c7   :  { %v5793_v22 = vcombine.low %v8407_v51, %v8420_v3  ;;  %v2921_v54 = vor.u32 %v2920_v37, %v2917_v52  ;;  %6425 = vmatprep.subr.bf16.mxu1 %v6848_v25  ;;  %v3272_v24 = vshrl.u32 %v8476_v12, 16  ;;  %v3275_v62 = vshll.u32 %v8476_v12, 16  ;;  %v2783_v3 = vld [vmem:[#allocation2 + $0x6c] sm:$0x1] }
 0x1c8   :  { %v3286_v26 = vshrl.u32 %v8478_v4, 16  ;;  %v2926_v59 = vrot.slane %v2924_v41, 5  ;;  %v5810_v51 = vcombine.low %v8364_v30, %v3102_v14  ;;  %v2929_v60 = vshrl.u32 %v8527_v9, 16  ;;  %v6858_v30 = vld [vmem:[%s9298_s2 + $0x100] sm:$0xff]  }
 0x1c9   :  { %4961 = vmatmul.mubr.bf16.gmra.mxu1 %v5793_v22  ;;  %v2922_v35 = vrot.slane %v2921_v54, 4  ;;  %v2932_v44 = vshll.u32 %v8527_v9, 16  ;;  %v3289_v50 = vshll.u32 %v8478_v4, 16  ;;  %v5819_v46 = vcombine.low %v8538_v61, %v8540_v57 }
 0x1ca   :  { %v2943_v12 = vshrl.u32 %v8542_v53, 16  ;;  %v2946_v28 = vshll.u32 %v8542_v53, 16  ;;  %6426 = vmatpush3.bf16.msra.mxu1 %v6850_v13  ;;  %v2931_v10 = vrot.slane %v2929_v60, 4  ;;  %v2938_v4 = vshll.u32 %v2782_v63, 16  ;;  %v6890_v13 = vld [vmem:[#allocation2 + $0x50] sm:$0xf] }
 0x1cb   :  { %v2927_v8 = vsel %vm6989_vm2, %v2922_v35, %v2926_v59  ;;  %5066 = vmatmul.mubr.bf16.gmra.mxu0 %v5810_v51  ;;  %v2934_v42 = vrot.slane %v2932_v44, 5  ;;  %6427 = vmatprep.subr.bf16.mxu1 %v6856_v33  ;;  %v8560_v55 = vrot.slane %v3272_v24, 4  ;;  %v8562_v27 = vrot.slane %v3275_v62, 5  ;;  %v8580_v59 = vld [vmem:[#allocation2 + $0x70] sm:$0xf] }
 0x1cc   :  { %v5802_v58 = vcombine.low %v2913_v16, %v2927_v8  ;;  %5073 = vmatprep.mubr.bf16.mxu0 %v5819_v46  ;;  %v2945_v36 = vrot.slane %v2943_v12, 4  ;;  %v3300_v21 = vshrl.u32 %v8538_v61, 16  ;;  %v2948_v25 = vrot.slane %v2946_v28, 5  ;;  %v8590_v46 = vld [vmem:[#allocation2 + $0x78] sm:$0xf] }
 0x1cd   :  { %v2935_v40 = vor.u32 %v2934_v42, %v2931_v10  ;;  %v2952_v41 = vshll.u32 %v2783_v3, 16  ;;  %v5736_v11 = vrot.slane %v3022_v6, 9  ;;  %v3105_v2 = vrot.slane %v2782_v63, 5 }
 0x1ce   :  { %4968 = vmatprep.mubr.bf16.mxu1 %v5802_v58  ;;  %v5737_v52 = vrot.slane %v3023_v5, 9  ;;  %v3109_v37 = vrot.slane %v2783_v3, 5  ;;  %6428 = vmatpush3.bf16.msra.mxu1 %v6858_v30  ;;  %v5794_v14 = vcombine.low %v6890_v13, %v8483_v56  ;;  %v2940_v22 = vrot.slane %v2938_v4, 5  ;;  %v2784_v5 = vld [vmem:[#allocation2 + $0x74] sm:$0x1] }
 0x1cf   :  { %v2936_v33 = vrot.slane %v2935_v40, 4  ;;  %v2949_v38 = vor.u32 %v2948_v25, %v2945_v36  ;;  %6637 = vmatprep.subr.bf16.mxu1 %v8488_v47  ;;  %v3303_v16 = vshll.u32 %v8538_v61, 16  ;;  %v3314_v54 = vshrl.u32 %v8540_v57, 16  ;;  %v3139_v47 = vld [vmem:[#allocation2 + $0x78] sm:$0xf] }
 0x1d0   :  { %v3106_v24 = vsel %vm8256_vm12, %v5736_v11, %v3105_v2  ;;  %v3110_v62 = vsel %vm8256_vm12, %v5737_v52, %v3109_v37  ;;  %v2954_v35 = vrot.slane %v2952_v41, 5  ;;  %v8584_v3 = vrot.slane %v3286_v26, 4  ;;  %v2785_v30 = vld [vmem:[#allocation2 + $0x7c] sm:$0x1]  ;;  %v3024_v4 = vld [vmem:[#allocation2 + $0x70] sm:$0xe] }
 0x1d1   :  { %4969 = vmatmul.mubr.bf16.gmra.mxu1 %v5794_v14  ;;  %v2941_v56 = vsel %vm6989_vm2, %v2936_v33, %v2940_v22  ;;  %v2950_v63 = vrot.slane %v2949_v38, 4  ;;  %v5811_v51 = vcombine.low %v3106_v24, %v3110_v62  ;;  %v8586_v61 = vrot.slane %v3289_v50, 5  ;;  %v3025_v36 = vld [vmem:[#allocation2 + $0x78] sm:$0xe]  ;;  %v8612_v62 = vld [vmem:[#allocation2 + $0x90] sm:$0xf] }
 0x1d2   :  { %v3317_v60 = vshll.u32 %v8540_v57, 16  ;;  %v5820_v44 = vcombine.low %v3139_v47, %v8571_v1  ;;  %v3278_v12 = vor.u32 %v8562_v27, %v8560_v55  ;;  %v2957_v26 = vshrl.u32 %v8580_v59, 16 }
 0x1d3   :  { %v2955_v28 = vsel %vm6989_vm2, %v2950_v63, %v2954_v35  ;;  %5074 = vmatmul.mubr.bf16.gmra.mxu0 %v5811_v51  ;;  %v2960_v50 = vshll.u32 %v8580_v59, 16  ;;  %v8598_v8 = vrot.slane %v3300_v21, 4  ;;  %v8600_v57 = vrot.slane %v3303_v16, 5  ;;  %v8619_v35 = vld [vmem:[#allocation2 + $0x80] sm:$0xf] }
 0x1d4   :  { %v8602_v10 = vrot.slane %v3314_v54, 4  ;;  %v5803_v42 = vcombine.low %v2941_v56, %v2955_v28  ;;  %5081 = vmatprep.mubr.bf16.mxu0 %v5820_v44  ;;  %v2959_v6 = vrot.slane %v2957_v26, 4  ;;  %v2971_v27 = vshrl.u32 %v8590_v46, 16  ;;  %v8625_v28 = vld [vmem:[#allocation2 + $0x88] sm:$0xf] }
 0x1d5   :  { %v2962_v55 = vrot.slane %v2960_v50, 5  ;;  %v2974_v58 = vshll.u32 %v8590_v46, 16  ;;  %v8606_v40 = vrot.slane %v3317_v60, 5  ;;  %v5795_v21 = vcombine.low %v8527_v9, %v8542_v53  ;;  %v8633_v50 = vld [vmem:[#allocation2 + $0x88] sm:$0xf] }
 0x1d6   :  { %4976 = vmatprep.mubr.bf16.mxu1 %v5803_v42  ;;  %v2966_v25 = vshll.u32 %v2784_v5, 16  ;;  %v2980_v41 = vshll.u32 %v2785_v30, 16  ;;  %v2973_v2 = vrot.slane %v2971_v27, 4  ;;  %v5738_v37 = vrot.slane %v3024_v4, 9  ;;  %v2786_v42 = vld [vmem:[#allocation2 + $0x84] sm:$0x1] }
 0x1d7   :  { %v2963_v11 = vor.u32 %v2962_v55, %v2959_v6  ;;  %v2976_v52 = vrot.slane %v2974_v58, 5  ;;  %v3328_v13 = vshrl.u32 %v3139_v47, 16  ;;  %v3331_v14 = vshll.u32 %v3139_v47, 16  ;;  %v2787_v27 = vld [vmem:[#allocation2 + $0x8c] sm:$0x1] }
 0x1d8   :  { %v3113_v33 = vrot.slane %v2784_v5, 5  ;;  %v5739_v22 = vrot.slane %v3025_v36, 9  ;;  %v3292_v38 = vor.u32 %v8586_v61, %v8584_v3  ;;  %v3117_v24 = vrot.slane %v2785_v30, 5  ;;  %v3384_v61 = vld [vmem:[#allocation2 + $0x10] sm:$0xe] }
 0x1d9   :  { %4977 = vmatmul.mubr.bf16.gmra.mxu1 %v5795_v21  ;;  %v2964_v16 = vrot.slane %v2963_v11, 4  ;;  %v2977_v54 = vor.u32 %v2976_v52, %v2973_v2  ;;  %v8614_v9 = vrot.slane %v3278_v12, 4  ;;  %v3306_v53 = vor.u32 %v8600_v57, %v8598_v8  ;;  %v3026_v11 = vld [vmem:[#allocation2 + $0x80] sm:$0xe]  ;;  %v8647_v2 = vld [vmem:[#allocation2 + $0x10] sm:$0xf] }
 0x1da   :  { %v3342_v56 = vshrl.u32 %v8571_v1, 16  ;;  %v2968_v63 = vrot.slane %v2966_v25, 5  ;;  %v2982_v47 = vrot.slane %v2980_v41, 5  ;;  %v3114_v60 = vsel %vm8256_vm12, %v5738_v37, %v3113_v33  ;;  %v3027_v33 = vld [vmem:[#allocation2 + $0x88] sm:$0xe] }
 0x1db   :  { %v2978_v51 = vrot.slane %v2977_v54, 4  ;;  %v3118_v44 = vsel %vm8256_vm12, %v5739_v22, %v3117_v24  ;;  %v3320_v12 = vor.u32 %v8606_v40, %v8602_v10  ;;  %v8629_v5 = vrot.slane %v3328_v13, 4  ;;  %v8654_v54 = vld [vmem:[#allocation2 + $0x18] sm:$0xf]  ;;  %v8698_v40 = vld [vmem:[#allocation2 + $0x20] sm:$0xf] }
 0x1dc   :  { %v8631_v30 = vrot.slane %v3331_v14, 5  ;;  %v5812_v26 = vcombine.low %v3114_v60, %v3118_v44  ;;  %v2969_v4 = vsel %vm6989_vm2, %v2964_v16, %v2968_v63  ;;  %v5821_v55 = vcombine.low %v8625_v28, %v8612_v62 }
 0x1dd   :  { %v2983_v6 = vsel %vm6989_vm2, %v2978_v51, %v2982_v47  ;;  %v2985_v58 = vshrl.u32 %v8619_v35, 16  ;;  %v8642_v36 = vrot.slane %v3342_v56, 4  ;;  %v5796_v25 = vcombine.low %v8580_v59, %v8590_v46  ;;  %v8656_v47 = vld [vmem:[#allocation2 + $0x14] sm:$0x1] }
 0x1de   :  { %v5804_v21 = vcombine.low %v2969_v4, %v2983_v6  ;;  %5082 = vmatmul.mubr.bf16.gmra.mxu0 %v5812_v26  ;;  %v2988_v41 = vshll.u32 %v8619_v35, 16  ;;  %v2994_v37 = vshll.u32 %v2786_v42, 16  ;;  %v2999_v13 = vshrl.u32 %v8633_v50, 16 }
 0x1df   :  { %5089 = vmatprep.mubr.bf16.mxu0 %v5821_v55  ;;  %v2987_v52 = vrot.slane %v2985_v58, 4  ;;  %v3002_v14 = vshll.u32 %v8633_v50, 16  ;;  %v3334_v22 = vor.u32 %v8631_v30, %v8629_v5  ;;  %v3345_v16 = vshll.u32 %v8571_v1, 16 }
 0x1e0   :  { %4984 = vmatprep.mubr.bf16.mxu1 %v5804_v21  ;;  %v2990_v59 = vrot.slane %v2988_v41, 5  ;;  %v3008_v46 = vshll.u32 %v2787_v27, 16  ;;  %v2996_v24 = vrot.slane %v2994_v37, 5  ;;  %v3001_v56 = vrot.slane %v2999_v13, 4  ;;  %v8662_v21 = vld [vmem:[#allocation2 + $0x1c] sm:$0x1] }
 0x1e1   :  { %4985 = vmatmul.mubr.bf16.gmra.mxu1 %v5796_v25  ;;  %v3004_v63 = vrot.slane %v3002_v14, 5  ;;  %v5740_v51 = vrot.slane %v3026_v11, 9  ;;  %v3121_v26 = vrot.slane %v2786_v42, 5  ;;  %v5741_v4 = vrot.slane %v3027_v33, 9 }
 0x1e2   :  { %v2991_v60 = vor.u32 %v2990_v59, %v2987_v52  ;;  %v3010_v44 = vrot.slane %v3008_v46, 5  ;;  %v3125_v5 = vrot.slane %v2787_v27, 5  ;;  %v3529_v1 = vshrl.u32 %v8647_v2, 16 }
 0x1e3   :  { %v3005_v6 = vor.u32 %v3004_v63, %v3001_v56  ;;  %v3532_v30 = vshll.u32 %v8647_v2, 16  ;;  %v3122_v58 = vsel %vm8256_vm12, %v5740_v51, %v3121_v26  ;;  %v3538_v25 = vshll.u32 %v8656_v47, 16  ;;  %v3143_v51 = vld [vmem:[#allocation2 + $0xc] sm:$0x1] }
 0x1e4   :  { %v2992_v55 = vrot.slane %v2991_v60, 4  ;;  %v3543_v41 = vshrl.u32 %v8654_v54, 16  ;;  %v3126_v42 = vsel %vm8256_vm12, %v5741_v4, %v3125_v5  ;;  %v3531_v52 = vrot.slane %v3529_v1, 4  ;;  %v3144_v60 = vld [vmem:[#allocation2 + $0x14] sm:$0x1] }
 0x1e5   :  { %v3006_v11 = vrot.slane %v3005_v6, 4  ;;  %v3534_v27 = vrot.slane %v3532_v30, 5  ;;  %v8668_v37 = vrot.slane %v3345_v16, 5  ;;  %v5813_v14 = vcombine.low %v3122_v58, %v3126_v42  ;;  %v3383_v4 = vld [vmem:[#allocation2 + $0x8] sm:$0xe] }
 0x1e6   :  { %v2997_v13 = vsel %vm6989_vm2, %v2992_v55, %v2996_v24  ;;  %v3545_v33 = vrot.slane %v3543_v41, 4  ;;  %v3546_v56 = vshll.u32 %v8654_v54, 16  ;;  %v3552_v63 = vshll.u32 %v8662_v21, 16  ;;  %v8703_v55 = vld [vmem:[#allocation2 + $0x28] sm:$0xf] }
 0x1e7   :  { %v3011_v59 = vsel %vm6989_vm2, %v3006_v11, %v3010_v44  ;;  %v3535_v46 = vor.u32 %v3534_v27, %v3531_v52  ;;  %v8679_v16 = vrot.slane %v3292_v38, 4  ;;  %v8684_v24 = vrot.slane %v3306_v53, 4  ;;  %5090 = vmatmul.mubr.bf16.gmra.mxu0 %v5813_v14  ;;  %v8705_v58 = vld [vmem:[#allocation2 + $0x24] sm:$0x1]  ;;  %v8710_v14 = vld [vmem:[#allocation2 + $0x2c] sm:$0x1] }
 0x1e8   :  { %v8689_v44 = vrot.slane %v3320_v12, 4  ;;  %v5805_v26 = vcombine.low %v2997_v13, %v3011_v59  ;;  %v8691_v6 = vrot.slane %v3334_v22, 4  ;;  %v3540_v1 = vrot.slane %v3538_v25, 5 }
 0x1e9   :  { %v3536_v5 = vrot.slane %v3535_v46, 4  ;;  %v3548_v3 = vrot.slane %v3546_v56, 5  ;;  %v3348_v38 = vor.u32 %v8668_v37, %v8642_v36  ;;  %v3356_v8 = vshrl.u32 %v8625_v28, 16  ;;  %v6868_v37 = vld [vmem:[%s9298_s2 + $0x260] sm:$0xff]  }
 0x1ea   :  { %4992 = vmatprep.mubr.bf16.mxu1 %v5805_v26  ;;  %v5797_v57 = vcombine.low %v8619_v35, %v8633_v50  ;;  %v3169_v10 = vshll.u32 %v3143_v51, 16  ;;  %v3359_v53 = vshll.u32 %v8625_v28, 16  ;;  %v3554_v30 = vrot.slane %v3552_v63, 5  ;;  %v8720_v26 = vld [vmem:[#allocation2 + $0x1c] sm:$0x1]  ;;  %v6869_v28 = vld [vmem:[%s9298_s2 + $0x220] sm:$0xff]  }
 0x1eb   :  { %v3541_v12 = vsel %vm6989_vm2, %v3536_v5, %v3540_v1  ;;  %v3549_v22 = vor.u32 %v3548_v3, %v3545_v33  ;;  %v3183_v25 = vshll.u32 %v3144_v60, 16  ;;  %v5742_v41 = vrot.slane %v3383_v4, 9  ;;  %v6860_v4 = vld [vmem:[%s9298_s2 + $0x238] sm:$0xff]  }
 0x1ec   :  { %4993 = vmatmul.mubr.bf16.gmra.mxu1 %v5797_v57  ;;  %v3433_v11 = vrot.slane %v3143_v51, 5  ;;  %v5743_v42 = vrot.slane %v3384_v61, 9  ;;  %v3171_v50 = vrot.slane %v3169_v10, 5  ;;  %v3437_v52 = vrot.slane %v3144_v60, 5  ;;  %v8725_v57 = vld [vmem:[#allocation2 + $0x24] sm:$0x1] }
 0x1ed   :  { %v3550_v35 = vrot.slane %v3549_v22, 4  ;;  %v3557_v27 = vshrl.u32 %v8698_v40, 16  ;;  %v3560_v33 = vshll.u32 %v8698_v40, 16  ;;  %v3566_v59 = vshll.u32 %v8705_v58, 16  ;;  %v3385_v10 = vld [vmem:[#allocation2 + $0x18] sm:$0xe] }
 0x1ee   :  { %v3434_v13 = vsel %vm8256_vm12, %v5742_v41, %v3433_v11  ;;  %v3571_v46 = vshrl.u32 %v8703_v55, 16  ;;  %v3438_v63 = vsel %vm8256_vm12, %v5743_v42, %v3437_v52  ;;  %v3574_v60 = vshll.u32 %v8703_v55, 16  ;;  %v3386_v42 = vld [vmem:[#allocation2 + $0x20] sm:$0xe] }
 0x1ef   :  { %v3555_v56 = vsel %vm6989_vm2, %v3550_v35, %v3554_v30  ;;  %v3559_v51 = vrot.slane %v3557_v27, 4  ;;  %v3185_v1 = vrot.slane %v3183_v25, 5  ;;  %v5830_v3 = vcombine.low %v3434_v13, %v3438_v63  ;;  %v6862_v35 = vld [vmem:[%s9298_s2 + $0x270] sm:$0xff]  }
 0x1f0   :  { %v5846_v5 = vcombine.low %v3541_v12, %v3555_v56  ;;  %v3562_v61 = vrot.slane %v3560_v33, 5  ;;  %v5838_v22 = vcombine.low %v8647_v2, %v8654_v54  ;;  %v3573_v30 = vrot.slane %v3571_v46, 4  ;;  %v8740_v54 = vld [vmem:[#allocation2 + $0x30] sm:$0xf]  ;;  %v8742_v56 = vld [vmem:[#allocation2 + $0x34] sm:$0x1] }
 0x1f1   :  { %v3576_v41 = vrot.slane %v3574_v60, 5  ;;  %v3580_v11 = vshll.u32 %v8710_v14, 16  ;;  %v3370_v12 = vshrl.u32 %v8612_v62, 16  ;;  %5130 = vmatprep.mubr.bf16.mxu1 %v5830_v3  ;;  %v3172_v52 = vsel %vm6989_vm2, %v8395_v18, %v3171_v50  ;;  %v6863_v18 = vld [vmem:[%s9298_s2 + $0x230] sm:$0xff]  }
 0x1f2   :  { %5227 = vmatprep.mubr.bf16.mxu0 %v5846_v5  ;;  %v3563_v25 = vor.u32 %v3562_v61, %v3559_v51  ;;  %v3186_v2 = vsel %vm6989_vm2, %v8397_v48, %v3185_v1  ;;  %v3568_v27 = vrot.slane %v3566_v59, 5  ;;  %v5744_v46 = vrot.slane %v3385_v10, 9  ;;  %v6865_v48 = vld [vmem:[%s9298_s2 + $0x268] sm:$0xff]   ;;  %v8752_v1 = vld [vmem:[#allocation2 + $0x38] sm:$0xf] }
 0x1f3   :  { %5228 = vmatmul.mubr.bf16.vlgmr.msra.gmra.mxu0 %v5838_v22  ;;  %v3577_v13 = vor.u32 %v3576_v41, %v3573_v30  ;;  %v5822_v33 = vcombine.low %v3172_v52, %v3186_v2  ;;  %v3441_v51 = vrot.slane %v8720_v26, 5  ;;  %v5745_v60 = vrot.slane %v3386_v42, 9  ;;  %v8762_v41 = vld [vmem:[#allocation2 + $0x3c] sm:$0x1] }
 0x1f4   :  { %v3564_v63 = vrot.slane %v3563_v25, 4  ;;  %v3445_v5 = vrot.slane %v8725_v57, 5  ;;  %6542 = vmatpush3.bf16.msra.mxu0 %v6860_v4  ;;  %v3582_v59 = vrot.slane %v3580_v11, 5  ;;  %v3585_v3 = vshrl.u32 %v8740_v54, 16 }
 0x1f5   :  { %v3578_v50 = vrot.slane %v3577_v13, 4  ;;  %5131 = vmatmul.mubr.bf16.vlgmr.msra.gmra.mxu1 %v5822_v33  ;;  %v3588_v61 = vshll.u32 %v8740_v54, 16  ;;  %6543 = vmatprep.subr.bf16.mxu0 %v6862_v35  ;;  %v3442_v22 = vsel %vm8256_vm12, %v5744_v46, %v3441_v51  ;;  %v3594_v11 = vshll.u32 %v8742_v56, 16  ;;  %v6866_v46 = vld [vmem:[%s9298_s2 + $0x228] sm:$0xff]  }
 0x1f6   :  { %v3569_v10 = vsel %vm6989_vm2, %v3564_v63, %v3568_v27  ;;  %v3446_v30 = vsel %vm8256_vm12, %v5745_v60, %v3445_v5  ;;  %6645 = vmatpush3.bf16.msra.mxu1 %v6860_v4  ;;  %v3587_v52 = vrot.slane %v3585_v3, 4  ;;  %v8770_v27 = vrot.slane %v3348_v38, 4 }
 0x1f7   :  { %v3583_v42 = vsel %vm6989_vm2, %v3578_v50, %v3582_v59  ;;  %v5831_v25 = vcombine.low %v3442_v22, %v3446_v30  ;;  %v3590_v2 = vrot.slane %v3588_v61, 5  ;;  %6638 = vmatprep.subr.bf16.mxu1 %v6862_v35  ;;  %v3599_v33 = vshrl.u32 %v8752_v1, 16  ;;  %v8796_v61 = vld [vmem:[#allocation2 + $0x2c] sm:$0x1]  ;;  %v3388_v22 = vld [vmem:[#allocation2 + $0x30] sm:$0xe] }
 0x1f8   :  { %v5847_v13 = vcombine.low %v3569_v10, %v3583_v42  ;;  %v3602_v4 = vshll.u32 %v8752_v1, 16  ;;  %6544 = vmatpush3.bf16.msra.mxu0 %v6863_v18  ;;  %v3373_v63 = vshll.u32 %v8612_v62, 16  ;;  %v5839_v35 = vcombine.low %v8698_v40, %v8703_v55  ;;  %v3387_v40 = vld [vmem:[#allocation2 + $0x28] sm:$0xe]  ;;  %v6871_v42 = vld [vmem:[%s9298_s2 + $0x258] sm:$0xff]  }
 0x1f9   :  { %5138 = vmatprep.mubr.bf16.mxu1 %v5831_v25  ;;  %v3591_v51 = vor.u32 %v3590_v2, %v3587_v52  ;;  %v3608_v36 = vshll.u32 %v8762_v41, 16  ;;  %6545 = vmatprep.subr.bf16.mxu0 %v6865_v48  ;;  %v8786_v38 = vrot.slane %v3356_v8, 4  ;;  %v8790_v60 = vrot.slane %v3359_v53, 5  ;;  %v2424_v52 = vld [vmem:[#allocation2 + $0x4c] sm:$0x1] }
 0x1fa   :  { %5235 = vmatprep.mubr.bf16.mxu0 %v5847_v13  ;;  %v3601_v62 = vrot.slane %v3599_v33, 4  ;;  %v3604_v5 = vrot.slane %v3602_v4, 5  ;;  %6646 = vmatpush3.bf16.msra.mxu1 %v6863_v18  ;;  %v8792_v55 = vrot.slane %v3370_v12, 4  ;;  %v3596_v59 = vrot.slane %v3594_v11, 5  ;;  %v8804_v18 = vld [vmem:[#allocation2 + $0x34] sm:$0x1] }
 0x1fb   :  { %5236 = vmatmul.mubr.bf16.gmra.mxu0 %v5839_v35  ;;  %v3592_v50 = vrot.slane %v3591_v51, 4  ;;  %v3194_v3 = vor.u32 %v8412_v49, %v8402_v7  ;;  %6639 = vmatprep.subr.bf16.mxu1 %v6865_v48  ;;  %v3610_v53 = vrot.slane %v3608_v36, 5  ;;  %v3197_v10 = vshll.u32 %v8720_v26, 16  ;;  %v2362_v11 = vld [vmem:[#allocation2 + $0x48] sm:$0x1] }
 0x1fc   :  { %v3605_v8 = vor.u32 %v3604_v5, %v3601_v62  ;;  %v3208_v12 = vor.u32 %v8455_v0, %v8430_v19  ;;  %6546 = vmatpush3.bf16.msra.mxu0 %v6866_v46  ;;  %v3211_v48 = vshll.u32 %v8725_v57, 16  ;;  %v5746_v30 = vrot.slane %v3387_v40, 9  ;;  %v8816_v4 = vld [vmem:[#allocation2 + $0x40] sm:$0xf] }
 0x1fd   :  { %v3597_v7 = vsel %vm6989_vm2, %v3592_v50, %v3596_v59  ;;  %v3195_v49 = vrot.slane %v3194_v3, 4  ;;  %6547 = vmatprep.subr.bf16.mxu0 %v6868_v37  ;;  %v3199_v25 = vrot.slane %v3197_v10, 5  ;;  %v3449_v0 = vrot.slane %v8796_v61, 5  ;;  %v6872_v50 = vld [vmem:[%s9298_s2 + $0x218] sm:$0xff]  }
 0x1fe   :  { %v3606_v26 = vrot.slane %v3605_v8, 4  ;;  %v3209_v19 = vrot.slane %v3208_v12, 4  ;;  %6647 = vmatpush3.bf16.msra.mxu1 %v6866_v46  ;;  %v8813_v2 = vrot.slane %v3373_v63, 5  ;;  %v3213_v13 = vrot.slane %v3211_v48, 5  ;;  %v3389_v10 = vld [vmem:[#allocation2 + $0x38] sm:$0xe] }
 0x1ff   :  { %v5747_v33 = vrot.slane %v3388_v22, 9  ;;  %v3453_v57 = vrot.slane %v8804_v18, 5  ;;  %6640 = vmatprep.subr.bf16.mxu1 %v6868_v37  ;;  %v3200_v51 = vsel %vm6989_vm2, %v3195_v49, %v3199_v25  ;;  %v5840_v36 = vcombine.low %v8740_v54, %v8752_v1  ;;  %v6874_v54 = vld [vmem:[%s9298_s2 + $0x250] sm:$0xff]   ;;  %v8849_v48 = vld [vmem:[#allocation2 + $0x44] sm:$0x1] }
 0x200   :  { %v3611_v35 = vsel %vm6989_vm2, %v3606_v26, %v3610_v53  ;;  %v2363_v46 = vsel %vm7786_vm5, 0, %v2362_v11  ;;  %6548 = vmatpush3.bf16.msra.mxu0 %v6869_v28  ;;  %v3214_v62 = vsel %vm6989_vm2, %v3209_v19, %v3213_v13  ;;  %v2425_v40 = vsel %vm7796_vm7, 0, %v2424_v52  ;;  %v8842_v53 = vld [vmem:[#allocation2 + $0x3c] sm:$0x1]  ;;  %v6875_v19 = vld [vmem:[%s9298_s2 + $0x210] sm:$0xff]  }
 0x201   :  { %v5848_v63 = vcombine.low %v3597_v7, %v3611_v35  ;;  %v3454_v37 = vsel %vm8256_vm12, %v5747_v33, %v3453_v57  ;;  %2364 = vst [vmem:[#allocation2 + $0x48] sm:$0x1] %v2363_v46  ;;  %6549 = vmatprep.subr.bf16.mxu0 %v6871_v42  ;;  %v5823_v1 = vcombine.low %v3200_v51, %v3214_v62  ;;  %2426 = vst [vmem:[#allocation2 + $0x4c] sm:$0x1] %v2425_v40  ;;  %v6878_v62 = vld [vmem:[%s9298_s2 + $0x208] sm:$0xff]  }
 0x202   :  { %v3450_v59 = vsel %vm8256_vm12, %v5746_v30, %v3449_v0  ;;  %v3613_v3 = vshrl.u32 %v8816_v4, 16  ;;  %v3616_v8 = vshll.u32 %v8816_v4, 16  ;;  %6648 = vmatpush3.bf16.msra.mxu1 %v6869_v28  ;;  %v3362_v12 = vor.u32 %v8790_v60, %v8786_v38  ;;  %v3390_v30 = vld [vmem:[#allocation2 + $0x40] sm:$0xe] }
 0x203   :  { %5243 = vmatprep.mubr.bf16.mxu0 %v5848_v63  ;;  %v5832_v22 = vcombine.low %v3450_v59, %v3454_v37  ;;  %v3222_v7 = vor.u32 %v8511_v45, %v8509_v17  ;;  %v3225_v49 = vshll.u32 %v8796_v61, 16  ;;  %6641 = vmatprep.subr.bf16.mxu1 %v6871_v42  ;;  %v3236_v28 = vor.u32 %v8519_v15, %v8513_v20  ;;  %v8854_v60 = vld [vmem:[#allocation2 + $0x60] sm:$0xf]  ;;  %v8858_v45 = vld [vmem:[#allocation2 + $0x44] sm:$0x1] }
 0x204   :  { %5139 = vmatmul.mubr.bf16.gmra.mxu1 %v5823_v1  ;;  %5244 = vmatmul.mubr.bf16.gmra.mxu0 %v5840_v36  ;;  %v3615_v11 = vrot.slane %v3613_v3, 4  ;;  %v3618_v26 = vrot.slane %v3616_v8, 5  ;;  %v3239_v38 = vshll.u32 %v8804_v18, 16  ;;  %v3376_v17 = vor.u32 %v8813_v2, %v8792_v55  ;;  %v6877_v55 = vld [vmem:[%s9298_s2 + $0x248] sm:$0xff]   ;;  %v8869_v2 = vld [vmem:[#allocation2 + $0x10] sm:$0xe] }
 0x205   :  { %5146 = vmatprep.mubr.bf16.mxu1 %v5832_v22  ;;  %v3223_v61 = vrot.slane %v3222_v7, 4  ;;  %v3227_v25 = vrot.slane %v3225_v49, 5  ;;  %v5748_v42 = vrot.slane %v3389_v10, 9  ;;  %6550 = vmatpush3.bf16.msra.mxu0 %v6872_v50  ;;  %v3237_v20 = vrot.slane %v3236_v28, 4  ;;  %v8890_v59 = vld [vmem:[#allocation2 + $0x68] sm:$0xf] }
 0x206   :  { %v3619_v0 = vor.u32 %v3618_v26, %v3615_v11  ;;  %v3241_v15 = vrot.slane %v3239_v38, 5  ;;  %v3457_v18 = vrot.slane %v8842_v53, 5  ;;  %6649 = vmatpush3.bf16.msra.mxu1 %v6872_v50  ;;  %6551 = vmatprep.subr.bf16.mxu0 %v6874_v54  ;;  %v8867_v52 = vrot.slane %v3362_v12, 4  ;;  %v8897_v22 = vld [vmem:[#allocation2 + $0x64] sm:$0x1] }
 0x207   :  { %v5749_v13 = vrot.slane %v3390_v30, 9  ;;  %v3461_v33 = vrot.slane %v8849_v48, 5  ;;  %v3641_v57 = vshrl.u32 %v8854_v60, 16  ;;  %6642 = vmatprep.subr.bf16.mxu1 %v6874_v54  ;;  %v3622_v51 = vshll.u32 %v8858_v45, 16  ;;  %v6880_v7 = vld [vmem:[%s9298_s2 + $0x240] sm:$0xff]  }
 0x208   :  { %v8873_v35 = vld [vmem:[#allocation2 + $0x48] sm:$0xf]  ;;  %v3228_v36 = vsel %vm6989_vm2, %v3223_v61, %v3227_v25  ;;  %v3242_v46 = vsel %vm6989_vm2, %v3237_v20, %v3241_v15  ;;  %v3644_v63 = vshll.u32 %v8854_v60, 16  ;;  %v8884_v37 = vld [vmem:[#allocation2 + $0x4c] sm:$0x1]  ;;  %v8892_v3 = vrot.slane %v3376_v17, 4 }
 0x209   :  { %v3627_v40 = vshrl.u32 %v8873_v35, 16  ;;  %v3630_v50 = vshll.u32 %v8873_v35, 16  ;;  %v5824_v54 = vcombine.low %v3228_v36, %v3242_v46  ;;  %v3462_v1 = vsel %vm8256_vm12, %v5749_v13, %v3461_v33  ;;  %6552 = vmatpush3.bf16.msra.mxu0 %v6875_v19  ;;  %v8902_v26 = vld [vmem:[#allocation2 + $0x6c] sm:$0x1]  ;;  %v6881_v15 = vld [vmem:[%s9298_s2 + $0x200] sm:$0xff]  }
 0x20a   :  { %v3620_v8 = vrot.slane %v3619_v0, 4  ;;  %v3636_v10 = vshll.u32 %v8884_v37, 16  ;;  %v3458_v12 = vsel %vm8256_vm12, %v5748_v42, %v3457_v18  ;;  %6650 = vmatpush3.bf16.msra.mxu1 %v6875_v19  ;;  %6553 = vmatprep.subr.bf16.mxu0 %v6877_v55  ;;  %v3643_v28 = vrot.slane %v3641_v57, 4 }
 0x20b   :  { %v3629_v49 = vrot.slane %v3627_v40, 4  ;;  %v3632_v30 = vrot.slane %v3630_v50, 5  ;;  %v5833_v11 = vcombine.low %v3458_v12, %v3462_v1  ;;  %6643 = vmatprep.subr.bf16.mxu1 %v6877_v55  ;;  %v5758_v38 = vrot.slane %v8869_v2, 9  ;;  %v3391_v12 = vld [vmem:[#allocation2 + $0x58] sm:$0xe] }
 0x20c   :  { %v3624_v17 = vrot.slane %v3622_v51, 5  ;;  %5147 = vmatmul.mubr.bf16.gmra.mxu1 %v5824_v54  ;;  %v3646_v61 = vrot.slane %v3644_v63, 5  ;;  %v3655_v25 = vshrl.u32 %v8890_v59, 16  ;;  %v3638_v19 = vrot.slane %v3636_v10, 5  ;;  %v3151_v63 = vld [vmem:[#allocation2 + $0x5c] sm:$0x1] }
 0x20d   :  { %v3633_v42 = vor.u32 %v3632_v30, %v3629_v49  ;;  %5154 = vmatprep.mubr.bf16.mxu1 %v5833_v11  ;;  %v3650_v0 = vshll.u32 %v8897_v22, 16  ;;  %v3658_v20 = vshll.u32 %v8890_v59, 16  ;;  %6554 = vmatpush3.bf16.msra.mxu0 %v6878_v62  ;;  %v3664_v33 = vshll.u32 %v8902_v26, 16  ;;  %v3392_v49 = vld [vmem:[#allocation2 + $0x60] sm:$0xe] }
 0x20e   :  { %v3625_v18 = vsel %vm6989_vm2, %v3620_v8, %v3624_v17  ;;  %v3647_v55 = vor.u32 %v3646_v61, %v3643_v28  ;;  %v3657_v13 = vrot.slane %v3655_v25, 4  ;;  %6651 = vmatpush3.bf16.msra.mxu1 %v6878_v62  ;;  %6555 = vmatprep.subr.bf16.mxu0 %v6880_v7  ;;  %v5841_v51 = vcombine.low %v8816_v4, %v8873_v35  ;;  %v3152_v62 = vld [vmem:[#allocation2 + $0x64] sm:$0x1]  ;;  %v8926_v25 = vld [vmem:[#allocation2 + $0x70] sm:$0xf] }
 0x20f   :  { %v3634_v57 = vrot.slane %v3633_v42, 4  ;;  %v3660_v36 = vrot.slane %v3658_v20, 5  ;;  %v3250_v46 = vor.u32 %v8523_v23, %v8521_v32  ;;  %6644 = vmatprep.subr.bf16.mxu1 %v6880_v7  ;;  %v3253_v50 = vshll.u32 %v8842_v53, 16 }
 0x210   :  { %v3648_v40 = vrot.slane %v3647_v55, 4  ;;  %v3264_v54 = vor.u32 %v8534_v31, %v8532_v43  ;;  %v3267_v1 = vshll.u32 %v8849_v48, 16  ;;  %v3652_v10 = vrot.slane %v3650_v0, 5 }
 0x211   :  { %v3639_v8 = vsel %vm6989_vm2, %v3634_v57, %v3638_v19  ;;  %v3661_v4 = vor.u32 %v3660_v36, %v3657_v13  ;;  %v3251_v35 = vrot.slane %v3250_v46, 4  ;;  %6556 = vmatpush3.bf16.msra.mxu0 %v6881_v15  ;;  %v3666_v23 = vrot.slane %v3664_v33, 5  ;;  %v8941_v36 = vld [vmem:[#allocation2 + $0x18] sm:$0xe] }
 0x212   :  { %v5849_v32 = vcombine.low %v3625_v18, %v3639_v8  ;;  %v3265_v7 = vrot.slane %v3264_v54, 4  ;;  %v3281_v30 = vshll.u32 %v3151_v63, 16  ;;  %6652 = vmatpush3.bf16.msra.mxu1 %v6881_v15  ;;  %v3653_v43 = vsel %vm6989_vm2, %v3648_v40, %v3652_v10  ;;  %v8934_v15 = vld [vmem:[#allocation2 + $0x78] sm:$0xf]  ;;  %v8936_v18 = vld [vmem:[#allocation2 + $0x74] sm:$0x1] }
 0x213   :  { %v3662_v31 = vrot.slane %v3661_v4, 4  ;;  %v3255_v53 = vrot.slane %v3253_v50, 5  ;;  %v3269_v48 = vrot.slane %v3267_v1, 5  ;;  %v3295_v11 = vshll.u32 %v3152_v62, 16  ;;  %v3153_v10 = vld [vmem:[#allocation2 + $0x6c] sm:$0x1] }
 0x214   :  { %5251 = vmatprep.mubr.bf16.mxu0 %v5849_v32  ;;  %v5750_v28 = vrot.slane %v3391_v12, 9  ;;  %v3465_v17 = vrot.slane %v3151_v63, 5  ;;  %v5751_v61 = vrot.slane %v3392_v49, 9  ;;  %v3469_v20 = vrot.slane %v3152_v62, 5  ;;  %v3393_v32 = vld [vmem:[#allocation2 + $0x68] sm:$0xe] }
 0x215   :  { %5252 = vmatmul.mubr.bf16.gmra.mxu0 %v5841_v51  ;;  %v3667_v42 = vsel %vm6989_vm2, %v3662_v31, %v3666_v23  ;;  %v3256_v19 = vsel %vm6989_vm2, %v3251_v35, %v3255_v53  ;;  %v3270_v0 = vsel %vm6989_vm2, %v3265_v7, %v3269_v48  ;;  %v3802_v55 = vrot.slane %v8656_v47, 5  ;;  %v8939_v51 = vld [vmem:[#allocation2 + $0x7c] sm:$0x1]  ;;  %v3394_v31 = vld [vmem:[#allocation2 + $0x70] sm:$0xe] }
 0x216   :  { %v5850_v13 = vcombine.low %v3653_v43, %v3667_v42  ;;  %v5825_v33 = vcombine.low %v3256_v19, %v3270_v0  ;;  %v3283_v57 = vrot.slane %v3281_v30, 5  ;;  %v3466_v46 = vsel %vm8256_vm12, %v5750_v28, %v3465_v17  ;;  %v3154_v17 = vld [vmem:[#allocation2 + $0x74] sm:$0x1] }
 0x217   :  { %v3470_v63 = vsel %vm8256_vm12, %v5751_v61, %v3469_v20  ;;  %v3669_v40 = vshrl.u32 %v8926_v25, 16  ;;  %v3672_v50 = vshll.u32 %v8926_v25, 16  ;;  %v3678_v1 = vshll.u32 %v8936_v18, 16  ;;  %v8963_v20 = vld [vmem:[#allocation2 + $0x80] sm:$0xf] }
 0x218   :  { %5259 = vmatprep.mubr.bf16.mxu0 %v5850_v13  ;;  %5155 = vmatmul.mubr.bf16.gmra.mxu1 %v5825_v33  ;;  %v5834_v54 = vcombine.low %v3466_v46, %v3470_v63  ;;  %v3683_v62 = vshrl.u32 %v8934_v15, 16  ;;  %v3686_v8 = vshll.u32 %v8934_v15, 16  ;;  %v3297_v4 = vrot.slane %v3295_v11, 5  ;;  %v8965_v13 = vld [vmem:[#allocation2 + $0x88] sm:$0xf] }
 0x219   :  { %v3671_v35 = vrot.slane %v3669_v40, 4  ;;  %v3674_v12 = vrot.slane %v3672_v50, 5  ;;  %v3692_v49 = vshll.u32 %v8939_v51, 16  ;;  %v5759_v23 = vrot.slane %v8941_v36, 9  ;;  %v8967_v63 = vld [vmem:[#allocation2 + $0x84] sm:$0x1] }
 0x21a   :  { %v3806_v7 = vrot.slane %v8662_v21, 5  ;;  %5162 = vmatprep.mubr.bf16.mxu1 %v5834_v54  ;;  %v3685_v30 = vrot.slane %v3683_v62, 4  ;;  %v3688_v43 = vrot.slane %v3686_v8, 5  ;;  %v5842_v53 = vcombine.low %v8854_v60, %v8890_v59 }
 0x21b   :  { %v3675_v48 = vor.u32 %v3674_v12, %v3671_v35  ;;  %v3284_v11 = vsel %vm6989_vm2, %v8614_v9, %v3283_v57  ;;  %v3298_v28 = vsel %vm6989_vm2, %v8679_v16, %v3297_v4  ;;  %v3680_v61 = vrot.slane %v3678_v1, 5 }
 0x21c   :  { %v3689_v42 = vor.u32 %v3688_v43, %v3685_v30  ;;  %v5826_v19 = vcombine.low %v3284_v11, %v3298_v28  ;;  %v5752_v0 = vrot.slane %v3393_v32, 9  ;;  %v3694_v59 = vrot.slane %v3692_v49, 5 }
 0x21d   :  { %5260 = vmatmul.mubr.bf16.gmra.mxu0 %v5842_v53  ;;  %v3676_v60 = vrot.slane %v3675_v48, 4  ;;  %v3473_v33 = vrot.slane %v3153_v10, 5  ;;  %v5753_v46 = vrot.slane %v3394_v31, 9  ;;  %v3309_v57 = vshll.u32 %v3153_v10, 16  ;;  %v8979_v10 = vld [vmem:[#allocation2 + $0x8c] sm:$0x1] }
 0x21e   :  { %v3690_v9 = vrot.slane %v3689_v42, 4  ;;  %v3323_v40 = vshll.u32 %v3154_v17, 16  ;;  %v3477_v16 = vrot.slane %v3154_v17, 5  ;;  %v3697_v1 = vshrl.u32 %v8963_v20, 16  ;;  %v3155_v31 = vld [vmem:[#allocation2 + $0x7c] sm:$0x1] }
 0x21f   :  { %v3681_v50 = vsel %vm6989_vm2, %v3676_v60, %v3680_v61  ;;  %v3474_v54 = vsel %vm8256_vm12, %v5752_v0, %v3473_v33  ;;  %v3700_v62 = vshll.u32 %v8963_v20, 16  ;;  %v3706_v35 = vshll.u32 %v8967_v63, 16  ;;  %v3395_v17 = vld [vmem:[#allocation2 + $0x78] sm:$0xe]  ;;  %v3156_v60 = vld [vmem:[#allocation2 + $0x84] sm:$0x1] }
 0x220   :  { %v3695_v8 = vsel %vm6989_vm2, %v3690_v9, %v3694_v59  ;;  %5163 = vmatmul.mubr.bf16.gmra.mxu1 %v5826_v19  ;;  %v3478_v4 = vsel %vm8256_vm12, %v5753_v46, %v3477_v16  ;;  %v3711_v12 = vshrl.u32 %v8965_v13, 16  ;;  %v3699_v30 = vrot.slane %v3697_v1, 4  ;;  %v3396_v59 = vld [vmem:[#allocation2 + $0x80] sm:$0xe]  ;;  %v9001_v1 = vld [vmem:[#allocation2 + $0x90] sm:$0xf] }
 0x221   :  { %v5851_v49 = vcombine.low %v3681_v50, %v3695_v8  ;;  %v5835_v32 = vcombine.low %v3474_v54, %v3478_v4  ;;  %v3702_v43 = vrot.slane %v3700_v62, 5  ;;  %v3311_v53 = vrot.slane %v3309_v57, 5  ;;  %v2454_v57 = vld [vmem:[#allocation2 + $0x9c] sm:$0x1] }
 0x222   :  { %v3325_v48 = vrot.slane %v3323_v40, 5  ;;  %v3713_v11 = vrot.slane %v3711_v12, 4  ;;  %v3714_v28 = vshll.u32 %v8965_v13, 16  ;;  %v8990_v61 = vsel %vm8256_vm12, %v5758_v38, %v3802_v55  ;;  %v2392_v55 = vld [vmem:[#allocation2 + $0x98] sm:$0x1] }
 0x223   :  { %5267 = vmatprep.mubr.bf16.mxu0 %v5851_v49  ;;  %5170 = vmatprep.mubr.bf16.mxu1 %v5835_v32  ;;  %v5843_v42 = vcombine.low %v8926_v25, %v8934_v15  ;;  %v3703_v19 = vor.u32 %v3702_v43, %v3699_v30  ;;  %v3720_v0 = vshll.u32 %v8979_v10, 16  ;;  %v3312_v47 = vsel %vm6989_vm2, %v8684_v24, %v3311_v53  ;;  %v3157_v49 = vld [vmem:[#allocation2 + $0x8c] sm:$0x1]  ;;  %v3158_v30 = vld [vmem:[#allocation2 + $0x94] sm:$0x1] }
 0x224   :  { %v3716_v33 = vrot.slane %v3714_v28, 5  ;;  %v3326_v2 = vsel %vm6989_vm2, %v8689_v44, %v3325_v48  ;;  %v3337_v38 = vshll.u32 %v3155_v31, 16  ;;  %v3708_v9 = vrot.slane %v3706_v35, 5  ;;  %v3397_v43 = vld [vmem:[#allocation2 + $0x88] sm:$0xe] }
 0x225   :  { %5268 = vmatmul.mubr.bf16.gmra.mxu0 %v5843_v42  ;;  %v3704_v46 = vrot.slane %v3703_v19, 4  ;;  %v5827_v25 = vcombine.low %v3312_v47, %v3326_v2  ;;  %v5754_v15 = vrot.slane %v3395_v17, 9  ;;  %v3351_v16 = vshll.u32 %v3156_v60, 16  ;;  %v3398_v48 = vld [vmem:[#allocation2 + $0x90] sm:$0xe] }
 0x226   :  { %v3717_v40 = vor.u32 %v3716_v33, %v3713_v11  ;;  %v3481_v50 = vrot.slane %v3155_v31, 5  ;;  %v5755_v54 = vrot.slane %v3396_v59, 9  ;;  %v9009_v24 = vsel %vm8256_vm12, %v5759_v23, %v3806_v7  ;;  %v9027_v28 = vld [vmem:[#allocation2 + $0x94] sm:$0x1]  ;;  %v3754_v47 = vld [vmem:[#allocation2 + $0x20] sm:$0xe] }
 0x227   :  { %v3722_v44 = vrot.slane %v3720_v0, 5  ;;  %v3339_v62 = vrot.slane %v3337_v38, 5  ;;  %v3485_v8 = vrot.slane %v3156_v60, 5  ;;  %v3709_v4 = vsel %vm6989_vm2, %v3704_v46, %v3708_v9 }
 0x228   :  { %v3718_v35 = vrot.slane %v3717_v40, 4  ;;  %5171 = vmatmul.mubr.bf16.gmra.mxu1 %v5827_v25  ;;  %v2393_v12 = vsel %vm7786_vm5, 0, %v2392_v55  ;;  %v2455_v21 = vsel %vm7796_vm7, 0, %v2454_v57  ;;  %v3482_v36 = vsel %vm8256_vm12, %v5754_v15, %v3481_v50  ;;  %v3755_v55 = vld [vmem:[#allocation2 + $0x28] sm:$0xe] }
 0x229   :  { %v3486_v23 = vsel %vm8256_vm12, %v5755_v54, %v3485_v8  ;;  %2394 = vst [vmem:[#allocation2 + $0x98] sm:$0x1] %v2393_v12  ;;  %2456 = vst [vmem:[#allocation2 + $0x9c] sm:$0x1] %v2455_v21  ;;  %v3725_v7 = vshrl.u32 %v9001_v1, 16  ;;  %v3728_v32 = vshll.u32 %v9001_v1, 16  ;;  %v5844_v53 = vcombine.low %v8963_v20, %v8965_v13 }
 0x22a   :  { %v3723_v29 = vsel %vm6989_vm2, %v3718_v35, %v3722_v44  ;;  %v3353_v5 = vrot.slane %v3351_v16, 5  ;;  %v5836_v31 = vcombine.low %v3482_v36, %v3486_v23  ;;  %v3340_v19 = vsel %vm6989_vm2, %v8691_v6, %v3339_v62  ;;  %v3756_v36 = vld [vmem:[#allocation2 + $0x30] sm:$0xe] }
 0x22b   :  { %v5852_v11 = vcombine.low %v3709_v4, %v3723_v29  ;;  %v3727_v17 = vrot.slane %v3725_v7, 4  ;;  %v3730_v42 = vrot.slane %v3728_v32, 5  ;;  %v3365_v60 = vshll.u32 %v3157_v49, 16  ;;  %v3757_v29 = vld [vmem:[#allocation2 + $0x38] sm:$0xe] }
 0x22c   :  { %5178 = vmatprep.mubr.bf16.mxu1 %v5836_v31  ;;  %v3354_v0 = vsel %vm6989_vm2, %v8770_v27, %v3353_v5  ;;  %v3379_v59 = vshll.u32 %v3158_v30, 16  ;;  %v5756_v33 = vrot.slane %v3397_v43, 9  ;;  %v3810_v20 = vrot.slane %v8705_v58, 5 }
 0x22d   :  { %5275 = vmatprep.mubr.bf16.mxu0 %v5852_v11  ;;  %v5828_v13 = vcombine.low %v3340_v19, %v3354_v0  ;;  %v3489_v2 = vrot.slane %v3157_v49, 5  ;;  %v5757_v38 = vrot.slane %v3398_v48, 9  ;;  %v3814_v46 = vrot.slane %v8710_v14, 5  ;;  %v6882_v0 = vld [vmem:[%s9296_s0 + $0xd8] ss:$8 sps:$4 sm:$0xff]  }
 0x22e   :  { %5276 = vmatmul.mubr.bf16.gmra.mxu0 %v5844_v53  ;;  %v3381_v6 = vrot.slane %v3379_v59, 5  ;;  %v3493_v9 = vrot.slane %v3158_v30, 5  ;;  %v5854_v25 = vcombine.low %v8990_v61, %v9009_v24  ;;  %v3731_v27 = vor.u32 %v3730_v42, %v3727_v17  ;;  %v3758_v59 = vld [vmem:[#allocation2 + $0x40] sm:$0xe] }
 0x22f   :  { %v3734_v15 = vshll.u32 %v9027_v28, 16  ;;  %v3367_v57 = vrot.slane %v3365_v60, 5  ;;  %v3490_v58 = vsel %vm8256_vm12, %v5756_v33, %v3489_v2  ;;  %v5760_v54 = vrot.slane %v3754_v47, 9  ;;  %v3759_v33 = vld [vmem:[#allocation2 + $0x48] sm:$0xe] }
 0x230   :  { %v3511_v40 = vld [vmem:[#allocation2 + $0x98] sm:$0xf]  ;;  %v9042_v16 = vld [vmem:[#allocation2 + $0x9c] sm:$0x1]  ;;  %5179 = vmatmul.mubr.bf16.gmra.mxu1 %v5828_v13  ;;  %v3494_v14 = vsel %vm8256_vm12, %v5757_v38, %v3493_v9  ;;  %v3382_v50 = vsel %vm6989_vm2, %v8892_v3, %v3381_v6  ;;  %v5761_v61 = vrot.slane %v3755_v55, 9  ;;  %v3732_v12 = vrot.slane %v3731_v27, 4 }
 0x231   :  { %v3739_v24 = vshrl.u32 %v3511_v40, 16  ;;  %v3742_v44 = vshll.u32 %v3511_v40, 16  ;;  %v3748_v62 = vshll.u32 %v9042_v16, 16  ;;  %v3368_v8 = vsel %vm6989_vm2, %v8867_v52, %v3367_v57  ;;  %v6883_v52 = vld [vmem:[%s9296_s0 + $0xf8] ss:$8 sps:$4 sm:$0xff]  }
 0x232   :  { %v5837_v4 = vcombine.low %v3490_v58, %v3494_v14  ;;  %v5829_v35 = vcombine.low %v3368_v8, %v3382_v50  ;;  %v3811_v3 = vsel %vm8256_vm12, %v5760_v54, %v3810_v20  ;;  %v3815_v23 = vsel %vm8256_vm12, %v5761_v61, %v3814_v46  ;;  %v3760_v6 = vld [vmem:[#allocation2 + $0x60] sm:$0xe]  ;;  %v3761_v9 = vld [vmem:[#allocation2 + $0x68] sm:$0xe]  ;;  %v3763_v14 = vld [vmem:[#allocation2 + $0x78] sm:$0xe] }
 0x233   :  { %v3741_v21 = vrot.slane %v3739_v24, 4  ;;  %v3744_v49 = vrot.slane %v3742_v44, 5  ;;  %v3736_v7 = vrot.slane %v3734_v15, 5  ;;  %v3750_v30 = vrot.slane %v3748_v62, 5  ;;  %v6887_v50 = vld [vmem:[%s9296_s0 + $0x208] ss:$8 sps:$4 sm:$0xff]  }
 0x234   :  { %5186 = vmatprep.mubr.bf16.mxu1 %v5837_v4  ;;  %v5855_v43 = vcombine.low %v3811_v3, %v3815_v23  ;;  %v5762_v5 = vrot.slane %v3756_v36, 9  ;;  %v3818_v31 = vrot.slane %v8742_v56, 5  ;;  %v5763_v11 = vrot.slane %v3757_v29, 9  ;;  %v3764_v8 = vld [vmem:[#allocation2 + $0x80] sm:$0xe] }
 0x235   :  { %v3745_v32 = vor.u32 %v3744_v49, %v3741_v21  ;;  %v3737_v53 = vsel %vm6989_vm2, %v3732_v12, %v3736_v7  ;;  %v3822_v17 = vrot.slane %v8762_v41, 5  ;;  %v5845_v60 = vcombine.low %v9001_v1, %v3511_v40  ;;  %v6884_v1 = vld [vmem:[%s9296_s0 + $0xe8] ss:$8 sps:$4 sm:$0xff]   ;;  %v3767_v7 = vld [vmem:[#allocation2 + $0x98] sm:$0xe] }
 0x236   :  { %v3819_v56 = vsel %vm8256_vm12, %v5762_v5, %v3818_v31  ;;  %v3826_v20 = vrot.slane %v8858_v45, 5  ;;  %v3830_v13 = vrot.slane %v8884_v37, 5  ;;  %v5764_v2 = vrot.slane %v3758_v59, 9  ;;  %v6886_v45 = vld [vmem:[%s9296_s0 + $0x1f8] ss:$8 sps:$4 sm:$0xff]  }
 0x237   :  { %v3746_v48 = vrot.slane %v3745_v32, 4  ;;  %v3823_v41 = vsel %vm8256_vm12, %v5763_v11, %v3822_v17  ;;  %v5765_v38 = vrot.slane %v3759_v33, 9  ;;  %v3834_v27 = vrot.slane %v8897_v22, 5  ;;  %v3762_v22 = vld [vmem:[#allocation2 + $0x70] sm:$0xe] }
 0x238   :  { %5187 = vmatmul.mubr.bf16.gmra.mxu1 %v5829_v35  ;;  %v5856_v47 = vcombine.low %v3819_v56, %v3823_v41  ;;  %v3827_v55 = vsel %vm8256_vm12, %v5764_v2, %v3826_v20  ;;  %v5766_v15 = vrot.slane %v3760_v6, 9  ;;  %v3838_v57 = vrot.slane %v8902_v26, 5  ;;  %v6888_v35 = vld [vmem:[%s9296_s0 + $0x218] ss:$8 sps:$4 sm:$0xff]   ;;  %v3765_v21 = vld [vmem:[#allocation2 + $0x88] sm:$0xe] }
 0x239   :  { %v3751_v42 = vsel %vm6989_vm2, %v3746_v48, %v3750_v30  ;;  %5340 = vmatprep.mubr.bf16.mxu1 %v6883_v52  ;;  %v3831_v46 = vsel %vm8256_vm12, %v5765_v38, %v3830_v13  ;;  %v5767_v58 = vrot.slane %v3761_v9, 9  ;;  %v3846_v61 = vrot.slane %v8939_v51, 5  ;;  %v3766_v23 = vld [vmem:[#allocation2 + $0x90] sm:$0xe] }
 0x23a   :  { %v5853_v19 = vcombine.low %v3737_v53, %v3751_v42  ;;  %v5857_v37 = vcombine.low %v3827_v55, %v3831_v46  ;;  %v3835_v40 = vsel %vm8256_vm12, %v5766_v15, %v3834_v27  ;;  %v5769_v24 = vrot.slane %v3763_v14, 9  ;;  %v6889_v30 = vld [vmem:[%s9296_s0 + $0x228] ss:$8 sps:$4 sm:$0xff]   ;;  %s6939_s0 = smov [#allocation6]  }
 0x23b   :  { %v3842_v26 = vrot.slane %v8936_v18, 5  ;;  %v5768_v44 = vrot.slane %v3762_v22, 9  ;;  %v3850_v51 = vrot.slane %v8967_v63, 5  ;;  %v5770_v49 = vrot.slane %v3764_v8, 9  ;;  %s5442_s18 = sshll.u32 %s6939_s0, 4  ;;  %s5443_s18 = int_to_ptr.vmem [resolvable:$true] %s5442_s18 }
 0x23c   :  { %5283 = vmatprep.mubr.bf16.mxu0 %v5853_v19  ;;  %v3847_v62 = vsel %vm8256_vm12, %v5769_v24, %v3846_v61  ;;  %v3854_v18 = vrot.slane %v8979_v10, 5  ;;  %v5771_v36 = vrot.slane %v3765_v21, 9  ;;  %v3858_v63 = vrot.slane %v9027_v28, 5  ;;  %s6911_s1 = scalar_lea.vmem %s5443_s18, 1024  ;;  %p6916_p6 = scmp.lt.s32.totalorder %s5443_s18, %s5443_s18 }
 0x23d   :  { %5284 = vmatmul.mubr.bf16.gmra.mxu0 %v5845_v60  ;;  %v3843_v4 = vsel %vm8256_vm12, %v5768_v44, %v3842_v26  ;;  %v3851_v3 = vsel %vm8256_vm12, %v5770_v49, %v3850_v51  ;;  %v5772_v10 = vrot.slane %v3766_v23, 9  ;;  %v5773_v29 = vrot.slane %v3767_v7, 9  ;;  %p6912_p5 = scmp.ne.s32.totalorder %s5443_s18, %s6911_s1  ;;  %p6917_p7 = scmp.lt.s32.totalorder %s6911_s1, %s6911_s1 }
 0x23e   :  { %5324 = vmatprep.mubr.bf16.mxu0 %v6882_v0  ;;  %v5859_v12 = vcombine.low %v3843_v4, %v3847_v62  ;;  %v3855_v32 = vsel %vm8256_vm12, %v5771_v36, %v3854_v18 }
 0x23f   :  { %v5860_v52 = vcombine.low %v3851_v3, %v3855_v32  ;;  %v3859_v5 = vsel %vm8256_vm12, %v5772_v10, %v3858_v63  ;;  %p6918_p8 = por %p6917_p7, %p6916_p6 }
 0x240   :  { %5341 = vmatmul.mubr.bf16.vlgmr.msra.gmra.mxu1 %v5856_v47 }
 0x241   :  { %5348 = vmatprep.mubr.bf16.mxu1 %v6885_v39  ;;  %p6919_p9 = pnand %p6918_p8, %p6912_p5 }
 0x245   :  { %5325 = vmatmul.mubr.bf16.vlgmr.msra.gmra.mxu0 %v5854_v25  ;;  %v3839_v25 = vsel %vm8256_vm12, %v5767_v58, %v3838_v57 }
 0x246   :  { %5332 = vmatprep.mubr.bf16.mxu0 %v6884_v1  ;;  %v5858_v54 = vcombine.low %v3835_v40, %v3839_v25 }
 0x248   :  { %5349 = vmatmul.mubr.bf16.gmra.mxu1 %v5857_v37 }
 0x249   :  { %5356 = vmatprep.mubr.bf16.mxu1 %v6886_v45 }
 0x24d   :  { %5333 = vmatmul.mubr.bf16.gmra.mxu0 %v5855_v43  ;;  %v3862_v43 = vrot.slane %v9042_v16, 5 }
 0x24f   :  { %v3863_v31 = vsel %vm8256_vm12, %v5773_v29, %v3862_v43 }
 0x250   :  { %5357 = vmatmul.mubr.bf16.gmra.mxu1 %v5858_v54  ;;  %v5861_v53 = vcombine.low %v3859_v5, %v3863_v31 }
 0x251   :  { %5364 = vmatprep.mubr.bf16.mxu1 %v6887_v50 }
 0x258   :  { %5365 = vmatmul.mubr.bf16.gmra.mxu1 %v5859_v12 }
 0x259   :  { %5372 = vmatprep.mubr.bf16.mxu1 %v6888_v35 }
 0x260   :  { %5373 = vmatmul.mubr.bf16.gmra.mxu1 %v5860_v52 }
 0x261   :  { %5380 = vmatprep.mubr.bf16.mxu1 %v6889_v30 }
 0x267   :  { %v6365_v48 = vpop.f32.mrf.mxu0 }
 0x268   :  { %5381 = vmatmul.mubr.bf16.gmra.mxu1 %v5861_v53 }
 0x269   :  { %v6366_v11 = vpop.f32.mrf.mxu0 }
 0x26a   :  { %v6367_v17 = vadd.f32 %v6366_v11, %v6365_v48 }
 0x26b   :  { %v6368_v42 = vpop.f32.mrf.mxu0 }
 0x26d   :  { %v6369_v19 = vpop.f32.mrf.mxu0 }
 0x26e   :  { %v6370_v28 = vadd.f32 %v6369_v19, %v6368_v42 }
 0x271   :  { %v6371_v0 = vpop.f32.mrf.mxu0  ;;  %v6301_v16 = vpop.f32.mrf.mxu1 }
 0x273   :  { %v6372_v56 = vpop.f32.mrf.mxu0  ;;  %v6302_v60 = vpop.f32.mrf.mxu1 }
 0x274   :  { %v6373_v59 = vadd.f32 %v6372_v56, %v6371_v0  ;;  %v6303_v33 = vadd.f32 %v6302_v60, %v6301_v16 }
 0x275   :  { %v6374_v41 = vpop.f32.mrf.mxu0  ;;  %v6304_v39 = vpop.f32.mrf.mxu1 }
 0x276   :  { %v9122_v47 = vadd.f32 %v6367_v17, %v6303_v33 }
 0x277   :  { %v6375_v34 = vpop.f32.mrf.mxu0  ;;  %v6305_v20 = vpop.f32.mrf.mxu1 }
 0x278   :  { %v6376_v13 = vadd.f32 %v6375_v34, %v6374_v41  ;;  %v6306_v2 = vadd.f32 %v6305_v20, %v6304_v39 }
 0x279   :  { %v6307_v38 = vpop.f32.mrf.mxu1 }
 0x27a   :  { %v9124_v1 = vadd.f32 %v6370_v28, %v6306_v2  ;;  %v6377_v55 = vpop.f32.mrf.mxu0 }
 0x27b   :  { %v6308_v46 = vpop.f32.mrf.mxu1 }
 0x27c   :  { %v6309_v6 = vadd.f32 %v6308_v46, %v6307_v38  ;;  %v6378_v45 = vpop.f32.mrf.mxu0 }
 0x27d   :  { %v6310_v37 = vpop.f32.mrf.mxu1  ;;  %v6379_v9 = vadd.f32 %v6378_v45, %v6377_v55 }
 0x27e   :  { %v9126_v27 = vadd.f32 %v6373_v59, %v6309_v6  ;;  %v6380_v15 = vpop.f32.mrf.mxu0 }
 0x27f   :  { %v6311_v57 = vpop.f32.mrf.mxu1 }
 0x280   :  { %v6312_v58 = vadd.f32 %v6311_v57, %v6310_v37  ;;  %v6381_v40 = vpop.f32.mrf.mxu0 }
 0x281   :  { %v6313_v14 = vpop.f32.mrf.mxu1  ;;  %v6382_v25 = vadd.f32 %v6381_v40, %v6380_v15 }
 0x282   :  { %v9128_v50 = vadd.f32 %v6376_v13, %v6312_v58 }
 0x283   :  { %v6314_v54 = vpop.f32.mrf.mxu1  ;;  %v6383_v22 = vpop.f32.mrf.mxu0 }
 0x284   :  { %v6315_v61 = vadd.f32 %v6314_v54, %v6313_v14 }
 0x285   :  { %v6316_v24 = vpop.f32.mrf.mxu1  ;;  %v6384_v26 = vpop.f32.mrf.mxu0 }
 0x286   :  { %v9130_v44 = vadd.f32 %v6379_v9, %v6315_v61  ;;  %v6385_v62 = vadd.f32 %v6384_v26, %v6383_v22 }
 0x287   :  { %v6317_v8 = vpop.f32.mrf.mxu1  ;;  %v6386_v4 = vpop.f32.mrf.mxu0 }
 0x288   :  { %v6318_v35 = vadd.f32 %v6317_v8, %v6316_v24 }
 0x289   :  { %v6319_v12 = vpop.f32.mrf.mxu1  ;;  %v6387_v21 = vpop.f32.mrf.mxu0 }
 0x28a   :  { %v9132_v51 = vadd.f32 %v6382_v25, %v6318_v35  ;;  %v6388_v49 = vadd.f32 %v6387_v21, %v6386_v4 }
 0x28b   :  { %v6320_v18 = vpop.f32.mrf.mxu1  ;;  %v6389_v36 = vpop.f32.mrf.mxu0 }
 0x28c   :  { %v6321_v3 = vadd.f32 %v6320_v18, %v6319_v12 }
 0x28d   :  { %v6322_v23 = vpop.f32.mrf.mxu1  ;;  %v6390_v7 = vpop.f32.mrf.mxu0 }
 0x28e   :  { %v9134_v32 = vadd.f32 %v6385_v62, %v6321_v3  ;;  %v6391_v30 = vadd.f32 %v6390_v7, %v6389_v36 }
 0x28f   :  { %v6323_v52 = vpop.f32.mrf.mxu1  ;;  %v6392_v63 = vpop.f32.mrf.mxu0 }
 0x290   :  { %v6324_v43 = vadd.f32 %v6323_v52, %v6322_v23 }
 0x291   :  { %v6325_v10 = vpop.f32.mrf.mxu1  ;;  %v6393_v29 = vpop.f32.mrf.mxu0 }
 0x292   :  { %v9136_v5 = vadd.f32 %v6388_v49, %v6324_v43  ;;  %v6394_v31 = vadd.f32 %v6393_v29, %v6392_v63 }
 0x293   :  { %v6326_v53 = vpop.f32.mrf.mxu1  ;;  %v6395_v48 = vpop.f32.mrf.mxu0 }
 0x294   :  { %v6327_v11 = vadd.f32 %v6326_v53, %v6325_v10 }
 0x295   :  { %v6328_v17 = vpop.f32.mrf.mxu1  ;;  %v6396_v42 = vpop.f32.mrf.mxu0 }
 0x296   :  { %v9138_v19 = vadd.f32 %v6391_v30, %v6327_v11  ;;  %v6397_v28 = vadd.f32 %v6396_v42, %v6395_v48 }
 0x297   :  { %v6329_v0 = vpop.f32.mrf.mxu1  ;;  %v6398_v16 = vpop.f32.mrf.mxu0 }
 0x298   :  { %v6330_v56 = vadd.f32 %v6329_v0, %v6328_v17 }
 0x299   :  { %v6331_v60 = vpop.f32.mrf.mxu1  ;;  %v6399_v59 = vpop.f32.mrf.mxu0 }
 0x29a   :  { %v9140_v33 = vadd.f32 %v6394_v31, %v6330_v56  ;;  %v6400_v41 = vadd.f32 %v6399_v59, %v6398_v16 }
 0x29b   :  { %v6332_v39 = vpop.f32.mrf.mxu1 }
 0x29c   :  { %v6333_v34 = vadd.f32 %v6332_v39, %v6331_v60 }
 0x29d   :  { %v6334_v20 = vpop.f32.mrf.mxu1 }
 0x29e   :  { %v9142_v13 = vadd.f32 %v6397_v28, %v6333_v34  ;;  %v6401_v2 = vpop.f32.mrf.mxu0 }
 0x29f   :  { %v6335_v38 = vpop.f32.mrf.mxu1 }
 0x2a0   :  { %v6402_v55 = vpop.f32.mrf.mxu0  ;;  %v6336_v46 = vadd.f32 %v6335_v38, %v6334_v20 }
 0x2a1   :  { %v6403_v6 = vadd.f32 %v6402_v55, %v6401_v2  ;;  %v6337_v45 = vpop.f32.mrf.mxu1 }
 0x2a2   :  { %v9144_v37 = vadd.f32 %v6400_v41, %v6336_v46  ;;  %v6404_v9 = vpop.f32.mrf.mxu0 }
 0x2a3   :  { %v6338_v15 = vpop.f32.mrf.mxu1 }
 0x2a4   :  { %v6405_v57 = vpop.f32.mrf.mxu0  ;;  %v6339_v58 = vadd.f32 %v6338_v15, %v6337_v45 }
 0x2a5   :  { %v6406_v40 = vadd.f32 %v6405_v57, %v6404_v9  ;;  %v6340_v14 = vpop.f32.mrf.mxu1 }
 0x2a6   :  { %v9146_v25 = vadd.f32 %v6403_v6, %v6339_v58 }
 0x2a7   :  { %v6341_v54 = vpop.f32.mrf.mxu1  ;;  %v6407_v22 = vpop.f32.mrf.mxu0 }
 0x2a8   :  { %9373 = vst [vmem:[#allocation17_spill] sm:$0xff] %v9146_v25  ;;  %v6342_v61 = vadd.f32 %v6341_v54, %v6340_v14 }
 0x2a9   :  { %v6408_v24 = vpop.f32.mrf.mxu0 }
 0x2aa   :  { %v9148_v26 = vadd.f32 %v6406_v40, %v6342_v61  ;;  %v6409_v62 = vadd.f32 %v6408_v24, %v6407_v22 }
 0x2ab   :  { %v6410_v8 = vpop.f32.mrf.mxu0 }
 0x2ac   :  { %9374 = vst [vmem:[#allocation19_spill] sm:$0xff] %v9148_v26  ;;  %v6343_v4 = vpop.f32.mrf.mxu1 }
 0x2ad   :  { %v6411_v35 = vpop.f32.mrf.mxu0 }
 0x2ae   :  { %v6344_v12 = vpop.f32.mrf.mxu1  ;;  %v6412_v21 = vadd.f32 %v6411_v35, %v6410_v8 }
 0x2af   :  { %v6345_v49 = vadd.f32 %v6344_v12, %v6343_v4 }
 0x2b0   :  { %v6346_v18 = vpop.f32.mrf.mxu1 }
 0x2b1   :  { %v9150_v36 = vadd.f32 %v6409_v62, %v6345_v49 }
 0x2b2   :  { %v6347_v3 = vpop.f32.mrf.mxu1 }
 0x2b3   :  { %9375 = vst [vmem:[#allocation20_spill] sm:$0xff] %v9150_v36  ;;  %v6493_v23 = vpop.f32.mrf.mxu0  ;;  %v6348_v7 = vadd.f32 %v6347_v3, %v6346_v18 }
 0x2b5   :  { %v6494_v30 = vpop.f32.mrf.mxu0  ;;  %v9152_v52 = vadd.f32 %v6412_v21, %v6348_v7  ;;  %v6429_v63 = vpop.f32.mrf.mxu1 }
 0x2b6   :  { %v6495_v43 = vadd.f32 %v6494_v30, %v6493_v23 }
 0x2b7   :  { %9376 = vst [vmem:[#allocation22_spill] sm:$0xff] %v9152_v52  ;;  %v6496_v10 = vpop.f32.mrf.mxu0  ;;  %v6430_v29 = vpop.f32.mrf.mxu1 }
 0x2b8   :  { %v6431_v31 = vadd.f32 %v6430_v29, %v6429_v63 }
 0x2b9   :  { %v6497_v53 = vpop.f32.mrf.mxu0  ;;  %v6432_v48 = vpop.f32.mrf.mxu1 }
 0x2ba   :  { %v5133_v11 = vadd.f32 %v6431_v31, %v9122_v47  ;;  %v6498_v56 = vadd.f32 %v6497_v53, %v6496_v10 }
 0x2bb   :  { %v6499_v17 = vpop.f32.mrf.mxu0  ;;  %v6433_v42 = vpop.f32.mrf.mxu1 }
 0x2bc   :  { %v6434_v28 = vadd.f32 %v6433_v42, %v6432_v48  ;;  %v9155_v0 = vadd.f32 %v6495_v43, %v5133_v11 }
 0x2bd   :  { %v6500_v16 = vpop.f32.mrf.mxu0 }
 0x2be   :  { %v6501_v60 = vadd.f32 %v6500_v16, %v6499_v17  ;;  %v5136_v59 = vadd.f32 %v6434_v28, %v9124_v1 }
 0x2bf   :  { %v6502_v41 = vpop.f32.mrf.mxu0 }
 0x2c0   :  { %v9158_v39 = vadd.f32 %v6498_v56, %v5136_v59 }
 0x2c1   :  { %v6503_v34 = vpop.f32.mrf.mxu0 }
 0x2c2   :  { %v6504_v58 = vadd.f32 %v6503_v34, %v6502_v41 }
 0x2c4   :  { %v6435_v20 = vpop.f32.mrf.mxu1  ;;  %v6505_v2 = vpop.f32.mrf.mxu0 }
 0x2c6   :  { %v6436_v38 = vpop.f32.mrf.mxu1  ;;  %v6506_v6 = vpop.f32.mrf.mxu0 }
 0x2c7   :  { %v6437_v55 = vadd.f32 %v6436_v38, %v6435_v20  ;;  %v6507_v26 = vadd.f32 %v6506_v6, %v6505_v2 }
 0x2c8   :  { %v6438_v46 = vpop.f32.mrf.mxu1  ;;  %v6508_v40 = vpop.f32.mrf.mxu0 }
 0x2c9   :  { %v5141_v47 = vadd.f32 %v6437_v55, %v9126_v27 }
 0x2ca   :  { %v6439_v45 = vpop.f32.mrf.mxu1  ;;  %v6509_v61 = vpop.f32.mrf.mxu0 }
 0x2cb   :  { %v6440_v9 = vadd.f32 %v6439_v45, %v6438_v46  ;;  %v9161_v15 = vadd.f32 %v6501_v60, %v5141_v47 }
 0x2cc   :  { %v6441_v57 = vpop.f32.mrf.mxu1 }
 0x2cd   :  { %v5144_v1 = vadd.f32 %v6440_v9, %v9128_v50 }
 0x2ce   :  { %v6442_v14 = vpop.f32.mrf.mxu1 }
 0x2cf   :  { %v9164_v54 = vadd.f32 %v6504_v58, %v5144_v1  ;;  %v6443_v47 = vadd.f32 %v6442_v14, %v6441_v57  ;;  %v6510_v14 = vadd.f32 %v6509_v61, %v6508_v40 }
 0x2d0   :  { %v6444_v22 = vpop.f32.mrf.mxu1 }
 0x2d1   :  { %v5149_v36 = vadd.f32 %v6443_v47, %v9130_v44 }
 0x2d2   :  { %v6445_v24 = vpop.f32.mrf.mxu1 }
 0x2d3   :  { %v6446_v58 = vadd.f32 %v6445_v24, %v6444_v22 }
 0x2d5   :  { %v9166_v62 = vpop.f32.mrf.mxu0 }
 0x2d7   :  { %v9168_v8 = vpop.f32.mrf.mxu0 }
 0x2d8   :  { %v6447_v27 = vpop.f32.mrf.mxu1 }
 0x2d9   :  { %v9170_v4 = vpop.f32.mrf.mxu0 }
 0x2da   :  { %v6448_v35 = vpop.f32.mrf.mxu1 }
 0x2db   :  { %v9172_v12 = vpop.f32.mrf.mxu0 }
 0x2dc   :  { %v6450_v21 = vpop.f32.mrf.mxu1 }
 0x2dd   :  { %v9174_v49 = vpop.f32.mrf.mxu0 }
 0x2de   :  { %v6451_v50 = vpop.f32.mrf.mxu1 }
 0x2df   :  { %v9176_v18 = vpop.f32.mrf.mxu0  ;;  %v6452_v24 = vadd.f32 %v6451_v50, %v6450_v21 }
 0x2e0   :  { %v9178_v3 = vpop.f32.mrf.mxu1 }
 0x2e1   :  { %v9180_v23 = vpop.f32.mrf.mxu0  ;;  %v5160_v40 = vadd.f32 %v6452_v24, %v9136_v5 }
 0x2e2   :  { %v9182_v7 = vpop.f32.mrf.mxu1 }
 0x2e3   :  { %v9184_v30 = vpop.f32.mrf.mxu0 }
 0x2e4   :  { %v9186_v63 = vpop.f32.mrf.mxu1 }
 0x2e5   :  { %v9188_v43 = vpop.f32.mrf.mxu0 }
 0x2e6   :  { %v9190_v10 = vpop.f32.mrf.mxu1 }
 0x2e7   :  { %v9192_v29 = vpop.f32.mrf.mxu0 }
 0x2e8   :  { %v9194_v31 = vpop.f32.mrf.mxu1 }
 0x2e9   :  { %v9196_v53 = vpop.f32.mrf.mxu0 }
 0x2ea   :  { %v9198_v48 = vpop.f32.mrf.mxu1 }
 0x2eb   :  { %v9200_v11 = vpop.f32.mrf.mxu0 }
 0x2ec   :  { %v9202_v17 = vpop.f32.mrf.mxu1 }
 0x2ee   :  { %v9204_v42 = vpop.f32.mrf.mxu0  ;;  %v9206_v28 = vpop.f32.mrf.mxu1 }
 0x2ef   :  { %9377 = vst [vmem:[#allocation24_spill] sm:$0xff] %v9204_v42 }
 0x2f0   :  { %v9208_v16 = vpop.f32.mrf.mxu1  ;;  %v9210_v56 = vpop.f32.mrf.mxu0 }
 0x2f1   :  { %9378 = vst [vmem:[#allocation26_spill] sm:$0xff] %v9210_v56 }
 0x2f2   :  { %v9212_v60 = vpop.f32.mrf.mxu1  ;;  %v9216_v41 = vpop.f32.mrf.mxu0 }
 0x2f3   :  { %9379 = vst [vmem:[#allocation28_spill] sm:$0xff] %v9216_v41 }
 0x2f4   :  { %v9214_v59 = vpop.f32.mrf.mxu1  ;;  %v9222_v38 = vpop.f32.mrf.mxu0 }
 0x2f5   :  { %9381 = vst [vmem:[#allocation34_spill] sm:$0xff] %v9222_v38  ;;  %v5152_v38 = vadd.f32 %v6446_v58, %v9132_v51 }
 0x2f6   :  { %v9218_v34 = vpop.f32.mrf.mxu1 }
 0x2f7   :  { %v5249_v25 = vadd.f32 %v6510_v14, %v5152_v38 }
 0x2f8   :  { %v9220_v20 = vpop.f32.mrf.mxu1 }
 0x2f9   :  { %9380 = vst [vmem:[#allocation31_spill] sm:$0xff] %v9220_v20 }
 0x2fa   :  { %v9224_v55 = vpop.f32.mrf.mxu1 }
 0x2fb   :  { %9382 = vst [vmem:[#allocation12_spill] sm:$0xff] %v9224_v55 }
 0x2fc   :  { %v9226_v46 = vpop.f32.mrf.mxu1 }
 0x2fd   :  { %9383 = vst [vmem:[#allocation21_spill] sm:$0xff] %v9226_v46  ;;  %v9228_v45 = vpop.f32.mrf.mxu0 }
 0x2fe   :  { %9384 = vst [vmem:[#allocation23_spill] sm:$0xff] %v9228_v45  ;;  %v9230_v9 = vpop.f32.mrf.mxu1  ;;  %v6449_v45 = vadd.f32 %v6448_v35, %v6447_v27 }
 0x2ff   :  { %9385 = vst [vmem:[#allocation13_spill] sm:$0xff] %v9230_v9  ;;  %v9232_v1 = vpop.f32.mrf.mxu0  ;;  %v5246_v9 = vadd.f32 %v6507_v26, %v5149_v36 }
 0x300   :  { %9386 = vst [vmem:[#allocation25_spill] sm:$0xff] %v9232_v1  ;;  %v6569_v52 = vpop.f32.mrf.mxu1  ;;  %v5157_v2 = vadd.f32 %v6449_v45, %v9134_v32  ;;  %v6455_v32 = vadd.f32 %v9182_v7, %v9178_v3 }
 0x301   :  { %v9235_v41 = vpop.f32.mrf.mxu0 }
 0x302   :  { %9387 = vst [vmem:[#allocation27_spill] sm:$0xff] %v9235_v41  ;;  %v6570_v20 = vpop.f32.mrf.mxu1  ;;  %v5165_v3 = vadd.f32 %v6455_v32, %v9138_v19  ;;  %v6522_v19 = vadd.f32 %v9184_v30, %v9180_v23  ;;  %v6467_v32 = vadd.f32 %v9212_v60, %v9208_v16 }
 0x303   :  { %v9238_v55 = vpop.f32.mrf.mxu0  ;;  %v6571_v46 = vadd.f32 %v6570_v20, %v6569_v52  ;;  %v6513_v52 = vadd.f32 %v9168_v8, %v9166_v62 }
 0x304   :  { %v6572_v57 = vpop.f32.mrf.mxu1 }
 0x305   :  { %v6557_v56 = vpop.f32.mrf.mxu0  ;;  %v5343_v42 = vadd.f32 %v6571_v46, %v5246_v9  ;;  %v5254_v62 = vadd.f32 %v6513_v52, %v5157_v2 }
 0x306   :  { %v6573_v22 = vpop.f32.mrf.mxu1 }
 0x307   :  { %v6558_v1 = vpop.f32.mrf.mxu0  ;;  %v6574_v44 = vadd.f32 %v6573_v22, %v6572_v57  ;;  %v5393_v26 = vmax.f32 %v5343_v42, 0.0  ;;  %v6458_v42 = vadd.f32 %v9190_v10, %v9186_v63 }
 0x308   :  { %v6559_v47 = vadd.f32 %v6558_v1, %v6557_v56  ;;  %v6575_v41 = vpop.f32.mrf.mxu1  ;;  %v6516_v56 = vadd.f32 %v9172_v12, %v9170_v4 }
 0x309   :  { %v6560_v6 = vpop.f32.mrf.mxu0  ;;  %v5346_v51 = vadd.f32 %v6574_v44, %v5249_v25  ;;  %v5168_v63 = vadd.f32 %v6458_v42, %v9140_v33 }
 0x30a   :  { %v6576_v20 = vpop.f32.mrf.mxu1  ;;  %v5327_v35 = vadd.f32 %v6559_v47, %v9155_v0  ;;  %v5257_v46 = vadd.f32 %v6516_v56, %v5160_v40  ;;  %v6528_v56 = vadd.f32 %v9200_v11, %v9196_v53 }
 0x30b   :  { %v6561_v61 = vpop.f32.mrf.mxu0  ;;  %v5394_v36 = vmax.f32 %v5346_v51, 0.0  ;;  %v6577_v27 = vadd.f32 %v6576_v20, %v6575_v41  ;;  %v6461_v51 = vadd.f32 %v9198_v48, %v9194_v31  ;;  %v6464_v20 = vadd.f32 %v9206_v28, %v9202_v17 }
 0x30c   :  { %v6562_v21 = vadd.f32 %v6561_v61, %v6560_v6  ;;  %v6578_v50 = vpop.f32.mrf.mxu1  ;;  %v5389_v9 = vmax.f32 %v5327_v35, 0.0  ;;  %v5265_v61 = vadd.f32 %v6522_v19, %v5168_v63  ;;  %v6525_v31 = vadd.f32 %v9192_v29, %v9188_v43  ;;  %v9396_v63 = vld [vmem:[#allocation21_spill] sm:$0xff] }
 0x30d   :  { %v6563_v25 = vpop.f32.mrf.mxu0  ;;  %v5979_v38 = vpack.c.bf16 %v5394_v36, %v5393_v26  ;;  %v5351_v0 = vadd.f32 %v6577_v27, %v5254_v62  ;;  %v5173_v23 = vadd.f32 %v6461_v51, %v9142_v13  ;;  %v6470_v43 = vadd.f32 %v9218_v34, %v9214_v59  ;;  %v9393_v59 = vld [vmem:[#allocation34_spill] sm:$0xff] }
 0x30e   :  { %v5330_v8 = vadd.f32 %v6562_v21, %v9158_v39  ;;  %v6579_v5 = vpop.f32.mrf.mxu1  ;;  %v6519_v39 = vadd.f32 %v9176_v18, %v9174_v49 }
 0x30f   :  { %v6564_v41 = vpop.f32.mrf.mxu0  ;;  %6007 = vst [vmem:[#allocation6 + $0x10] sm:$0xff] %v5979_v38   ;;  %v6580_v45 = vadd.f32 %v6579_v5, %v6578_v50  ;;  %v5395_v22 = vmax.f32 %v5351_v0, 0.0  ;;  %v9388_v5 = vld [vmem:[#allocation17_spill] sm:$0xff]  ;;  %v9389_v0 = vld [vmem:[#allocation24_spill] sm:$0xff] }
 0x310   :  { %v5390_v58 = vmax.f32 %v5330_v8, 0.0  ;;  %v6565_v4 = vadd.f32 %v6564_v41, %v6563_v25  ;;  %v6581_v12 = vpop.f32.mrf.mxu1  ;;  %v5262_v18 = vadd.f32 %v6519_v39, %v5165_v3  ;;  %v5270_v25 = vadd.f32 %v6525_v31, %v5173_v23  ;;  %v9394_v3 = vld [vmem:[#allocation31_spill] sm:$0xff] }
 0x311   :  { %v6566_v7 = vpop.f32.mrf.mxu0  ;;  %v5354_v1 = vadd.f32 %v6580_v45, %v5257_v46  ;;  %v5181_v42 = vadd.f32 %v6467_v32, %v9388_v5  ;;  %v9390_v46 = vld [vmem:[#allocation26_spill] sm:$0xff]  ;;  %v9391_v45 = vld [vmem:[#allocation19_spill] sm:$0xff] }
 0x312   :  { %v5969_v57 = vpack.c.bf16 %v5390_v58, %v5389_v9  ;;  %v6582_v14 = vpop.f32.mrf.mxu1  ;;  %v5335_v47 = vadd.f32 %v6565_v4, %v9161_v15  ;;  %v6531_v53 = vadd.f32 %v9390_v46, %v9389_v0  ;;  %v5184_v16 = vadd.f32 %v6470_v43, %v9391_v45 }
 0x313   :  { %v6567_v10 = vpop.f32.mrf.mxu0  ;;  %v5396_v24 = vmax.f32 %v5354_v1, 0.0  ;;  %v6583_v44 = vadd.f32 %v6582_v14, %v6581_v12  ;;  %v9392_v12 = vld [vmem:[#allocation28_spill] sm:$0xff] }
 0x314   :  { %5970 = vst [vmem:[#allocation6] sm:$0xff] %v5969_v57   ;;  %v6568_v2 = vadd.f32 %v6567_v10, %v6566_v7  ;;  %v6584_v6 = vpop.f32.mrf.mxu1  ;;  %v5391_v26 = vmax.f32 %v5335_v47, 0.0  ;;  %v6534_v34 = vadd.f32 %v9393_v59, %v9392_v12  ;;  %v9395_v7 = vld [vmem:[#allocation12_spill] sm:$0xff]  ;;  %v5278_v57 = vadd.f32 %v6531_v53, %v5181_v42  ;;  %v9397_v10 = vld [vmem:[#allocation13_spill] sm:$0xff] }
 0x315   :  { %v5984_v49 = vpack.c.bf16 %v5396_v24, %v5395_v22  ;;  %v5359_v40 = vadd.f32 %v6583_v44, %v5262_v18  ;;  %v6473_v1 = vadd.f32 %v9395_v7, %v9394_v3  ;;  %v6476_v22 = vadd.f32 %v9397_v10, %v9396_v63  ;;  %v9400_v18 = vld [vmem:[#allocation25_spill] sm:$0xff] }
 0x316   :  { %v5338_v52 = vadd.f32 %v6568_v2, %v9164_v54  ;;  %v6585_v33 = vpop.f32.mrf.mxu1  ;;  %v5176_v54 = vadd.f32 %v6464_v20, %v9144_v37  ;;  %v5281_v44 = vadd.f32 %v6534_v34, %v5184_v16  ;;  %v9401_v20 = vld [vmem:[#allocation22_spill] sm:$0xff] }
 0x317   :  { %6008 = vst [vmem:[#allocation6 + $0x18] sm:$0xff] %v5984_v49   ;;  %v6586_v15 = vadd.f32 %v6585_v33, %v6584_v6  ;;  %v5397_v21 = vmax.f32 %v5359_v40, 0.0  ;;  %v9398_v6 = vld [vmem:[#allocation20_spill] sm:$0xff]  ;;  %v9399_v49 = vld [vmem:[#allocation23_spill] sm:$0xff]  ;;  %v5192_v40 = vadd.f32 %v6476_v22, %v9401_v20 }
 0x318   :  { %v5392_v36 = vmax.f32 %v5338_v52, 0.0  ;;  %v6587_v27 = vpop.f32.mrf.mxu1  ;;  %v5273_v37 = vadd.f32 %v6528_v56, %v5176_v54  ;;  %v5189_v19 = vadd.f32 %v6473_v1, %v9398_v6  ;;  %v6537_v52 = vadd.f32 %v9400_v18, %v9399_v49 }
 0x319   :  { %v5362_v30 = vadd.f32 %v6586_v15, %v5265_v61 }
 0x31a   :  { %v5974_v48 = vpack.c.bf16 %v5392_v36, %v5391_v26  ;;  %v6588_v35 = vpop.f32.mrf.mxu1  ;;  %v5286_v31 = vadd.f32 %v6537_v52, %v5189_v19 }
 0x31b   :  { %v5398_v50 = vmax.f32 %v5362_v30, 0.0  ;;  %v6589_v17 = vadd.f32 %v6588_v35, %v6587_v27  ;;  %v9402_v27 = vld [vmem:[#allocation27_spill] sm:$0xff] }
 0x31c   :  { %6006 = vst [vmem:[#allocation6 + $0x8] sm:$0xff] %v5974_v48   ;;  %v6590_v28 = vpop.f32.mrf.mxu1  ;;  %v6540_v23 = vadd.f32 %v9238_v55, %v9402_v27 }
 0x31d   :  { %v5989_v13 = vpack.c.bf16 %v5398_v50, %v5397_v21  ;;  %v5367_v29 = vadd.f32 %v6589_v17, %v5270_v25 }
 0x31e   :  { %v6591_v38 = vpop.f32.mrf.mxu1  ;;  %v5289_v54 = vadd.f32 %v6540_v23, %v5192_v40 }
 0x31f   :  { %6009 = vst [vmem:[#allocation6 + $0x20] sm:$0xff] %v5989_v13   ;;  %v6592_v62 = vadd.f32 %v6591_v38, %v6590_v28  ;;  %v5399_v60 = vmax.f32 %v5367_v29, 0.0 }
 0x320   :  { %v6593_v8 = vpop.f32.mrf.mxu1 }
 0x321   :  { %v5370_v41 = vadd.f32 %v6592_v62, %v5273_v37 }
 0x322   :  { %v6594_v11 = vpop.f32.mrf.mxu1 }
 0x323   :  { %v5400_v9 = vmax.f32 %v5370_v41, 0.0  ;;  %v6595_v58 = vadd.f32 %v6594_v11, %v6593_v8 }
 0x324   :  { %v6596_v4 = vpop.f32.mrf.mxu1 }
 0x325   :  { %v5994_v39 = vpack.c.bf16 %v5400_v9, %v5399_v60  ;;  %v5375_v24 = vadd.f32 %v6595_v58, %v5278_v57 }
 0x326   :  { %v6597_v14 = vpop.f32.mrf.mxu1 }
 0x327   :  { %6010 = vst [vmem:[#allocation6 + $0x28] sm:$0xff] %v5994_v39   ;;  %v6598_v47 = vadd.f32 %v6597_v14, %v6596_v4  ;;  %v5401_v61 = vmax.f32 %v5375_v24, 0.0 }
 0x328   :  { %v6599_v2 = vpop.f32.mrf.mxu1 }
 0x329   :  { %v5378_v51 = vadd.f32 %v6598_v47, %v5281_v44 }
 0x32a   :  { %v6600_v33 = vpop.f32.mrf.mxu1 }
 0x32b   :  { %v5402_v15 = vmax.f32 %v5378_v51, 0.0  ;;  %v6601_v26 = vadd.f32 %v6600_v33, %v6599_v2 }
 0x32c   :  { %v6602_v36 = vpop.f32.mrf.mxu1 }
 0x32d   :  { %v5999_v30 = vpack.c.bf16 %v5402_v15, %v5401_v61  ;;  %v5383_v35 = vadd.f32 %v6601_v26, %v5286_v31 }
 0x32e   :  { %v6603_v48 = vpop.f32.mrf.mxu1 }
 0x32f   :  { %6011 = vst [vmem:[#allocation6 + $0x30] sm:$0xff] %v5999_v30   ;;  %v6604_v21 = vadd.f32 %v6603_v48, %v6602_v36  ;;  %v5403_v17 = vmax.f32 %v5383_v35, 0.0 }
 0x331   :  { %v5386_v50 = vadd.f32 %v6604_v21, %v5289_v54 }
 0x333   :  { %v5404_v28 = vmax.f32 %v5386_v50, 0.0 }
 0x335   :  { %v6004_v56 = vpack.c.bf16 %v5404_v28, %v5403_v17 }
 0x337   :  { %6012 = vst [vmem:[#allocation6 + $0x38] sm:$0xff] %v6004_v56  }
 0x338   :  { %6922 = shalt.err (!%p6919_p9)
}
 0x339   :  { %5448 = dma.vmem_to_hbm [thread:$0]  %s5443_s18, 1024, %s9299_s3, [#allocation5], %s6936_s15, %s6936_s15, %s6937_s16  }
 0x33a   :  { %6933 = dma.done.wait [#allocation5], 1024  }
 0x33b   :  { %6934 = vsyncadd [#allocation5], 4294966272 }
 0x33c   :  { %5452 = vsyncpa [#allocation4], 1 }
 0x33d   :  { %5453 = vsyncpa [#allocation5], 1 }

</bundles_post_ra>
